<compile_context>
chip_gen: v7x
topology: tpu7x:2x2x1
jax: 0.10.0
libtpu: 0.0.40
codegen_flags: <defaults>
</compile_context>

<pallas_src>
import functools

import jax
import jax.numpy as jnp
from jax.experimental import pallas as pl
from jax.experimental.pallas import tpu as pltpu

LANE = 128  # lane-dense channel padding used for every activation / weight


# ----------------------------- Pallas kernels -----------------------------

def _frontend_kernel(x_ref, wb_ref, bb_ref, wib_ref, wix_ref, bi_ref, o_ref, *,
                     kmax, left, t_out):
    """Fused conv-bank (+ raw-x concat) + 1x1 in_conv + ReLU, one batch element.

    x_ref : [T_pad, LANE] reflect-padded input (bf16).
    wb_ref: [kmax, LANE, LANE] all bank kernels embedded on a shared tap axis.
    wib_ref / wix_ref: in_conv rows multiplying bank channels / raw input channels.
    """
    acc = jnp.zeros((t_out, LANE), jnp.float32)
    for k in range(kmax):
        rows = x_ref[pl.ds(k, t_out), :]
        acc = acc + jnp.dot(rows, wb_ref[k], preferred_element_type=jnp.float32)
    bank = jnp.maximum(acc + bb_ref[...], 0.0)            # ReLU on bank outputs only

    h = jnp.dot(bank.astype(jnp.bfloat16), wib_ref[...],
                preferred_element_type=jnp.float32)
    h = h + jnp.dot(x_ref[pl.ds(left, t_out), :], wix_ref[...],
                    preferred_element_type=jnp.float32)
    h = jnp.maximum(h + bi_ref[...], 0.0)
    o_ref[...] = h.astype(o_ref.dtype)


def _conv_kernel(*refs, ksize, stride, t_out, relu, has_res):
    """Conv1d as K shifted matmuls + bias (+ReLU) (+avg-pooled residual), per batch.

    refs: x_ref [stride, Lp, LANE] (stride phases of the reflect-padded input),
          w_ref [K, LANE, LANE], b_ref [1, LANE],
          (res_ref [T_out, sub, LANE] if has_res), o_ref [T_out, LANE].
    """
    if has_res:
        x_ref, w_ref, b_ref, res_ref, o_ref = refs
    else:
        x_ref, w_ref, b_ref, o_ref = refs

    acc = jnp.zeros((t_out, LANE), jnp.float32)
    for k in range(ksize):
        rows = x_ref[k % stride, pl.ds(k // stride, t_out), :]
        acc = acc + jnp.dot(rows, w_ref[k], preferred_element_type=jnp.float32)
    y = acc + b_ref[...]
    if relu:
        y = jnp.maximum(y, 0.0)
    if has_res:
        # avg_pool1d(residual, sub) fused here: mean over the `sub` axis in VMEM.
        y = y + jnp.mean(res_ref[...].astype(jnp.float32), axis=1)
    o_ref[...] = y.astype(o_ref.dtype)


def _tail_kernel(h_ref, w1_ref, b1_ref, w2_ref, b2_ref, wo_ref, bo_ref, o_ref, *,
                 n_blocks):
    """Fused AdaptiveAvgPool1d(1) + dense residual blocks + output projection."""
    out = jnp.mean(h_ref[...].astype(jnp.float32), axis=1)      # [8n, LANE]
    for l in range(n_blocks):
        y = jnp.dot(out.astype(jnp.bfloat16), w1_ref[l],
                    preferred_element_type=jnp.float32)
        y = jnp.maximum(y + b1_ref[l], 0.0)
        z = jnp.dot(y.astype(jnp.bfloat16), w2_ref[l],
                    preferred_element_type=jnp.float32)
        out = jnp.maximum(z + b2_ref[l], 0.0) + out
    o = jnp.dot(out.astype(jnp.bfloat16), wo_ref[...],
                preferred_element_type=jnp.float32) + bo_ref[...]
    o_ref[...] = o.astype(o_ref.dtype)


# ------------------------------ wrappers ----------------------------------

def _reflect_pad_time(x, k):
    """PyTorch pad_layer convention: (k//2, k//2) odd, (k//2, k//2 - 1) even."""
    left = k // 2
    right = k // 2 - 1 if k % 2 == 0 else k // 2
    if left == 0 and right == 0:
        return x, 0
    return jnp.pad(x, ((0, 0), (left, right), (0, 0)), mode="reflect"), left


def frontend(x, p, kmax):
    """x: [B, T, LANE] bf16 -> [B, T, LANE] bf16 (bank + concat + in_conv + ReLU)."""
    B, T, _ = x.shape
    xp, left = _reflect_pad_time(x, kmax)
    t_pad = xp.shape[1]
    kern = functools.partial(_frontend_kernel, kmax=kmax, left=left, t_out=T)
    return pl.pallas_call(
        kern,
        out_shape=jax.ShapeDtypeStruct((B, T, LANE), jnp.bfloat16),
        grid=(B,),
        in_specs=[
            pl.BlockSpec((None, t_pad, LANE), lambda b: (b, 0, 0)),
            pl.BlockSpec((kmax, LANE, LANE), lambda b: (0, 0, 0)),
            pl.BlockSpec((1, LANE), lambda b: (0, 0)),
            pl.BlockSpec((LANE, LANE), lambda b: (0, 0)),
            pl.BlockSpec((LANE, LANE), lambda b: (0, 0)),
            pl.BlockSpec((1, LANE), lambda b: (0, 0)),
        ],
        out_specs=pl.BlockSpec((None, T, LANE), lambda b: (b, 0, 0)),
        compiler_params=pltpu.CompilerParams(dimension_semantics=("parallel",)),
        cost_estimate=pl.CostEstimate(
            flops=int(2 * B * T * LANE * LANE * (kmax + 2)),
            transcendentals=0,
            bytes_accessed=int(xp.size * 2 + B * T * LANE * 2
                               + (kmax + 2) * LANE * LANE * 2)),
    )(xp, p["bank_w"], p["bank_b"], p["in_w_bank"], p["in_w_x"], p["in_b"])


def conv1d(x, w, b, *, stride=1, relu=True, residual=None):
    """Reflect-padded Conv1d via in-kernel shifted matmuls.

    x: [B, T, LANE] bf16;  w: [K, LANE, LANE] bf16;  b: [1, LANE] f32
    residual: [B, T_out, sub, LANE] bf16 or None (avg-pooled + added in-kernel).
    Returns [B, T_out, LANE] bf16.
    """
    B, T, _ = x.shape
    K = w.shape[0]
    xp, _ = _reflect_pad_time(x, K)
    t_pad = xp.shape[1]
    t_out = (t_pad - K) // stride + 1
    lp = -(-t_pad // stride)                      # ceil(t_pad / stride)
    if stride * lp > t_pad:
        xp = jnp.pad(xp, ((0, 0), (0, stride * lp - t_pad), (0, 0)))
    # Split into stride phases so every in-kernel load is contiguous (no strided ld).
    phases = xp.reshape(B, lp, stride, LANE).transpose(0, 2, 1, 3)  # [B,s,Lp,LANE]

    kern = functools.partial(_conv_kernel, ksize=K, stride=stride, t_out=t_out,
                             relu=relu, has_res=residual is not None)
    in_specs = [
        pl.BlockSpec((None, stride, lp, LANE), lambda bb: (bb, 0, 0, 0)),
        pl.BlockSpec((K, LANE, LANE), lambda bb: (0, 0, 0)),
        pl.BlockSpec((1, LANE), lambda bb: (0, 0)),
    ]
    args = [phases, w, b]
    if residual is not None:
        sub = residual.shape[2]
        in_specs.append(pl.BlockSpec((None, t_out, sub, LANE),
                                     lambda bb: (bb, 0, 0, 0)))
        args.append(residual)

    return pl.pallas_call(
        kern,
        out_shape=jax.ShapeDtypeStruct((B, t_out, LANE), jnp.bfloat16),
        grid=(B,),
        in_specs=in_specs,
        out_specs=pl.BlockSpec((None, t_out, LANE), lambda bb: (bb, 0, 0)),
        compiler_params=pltpu.CompilerParams(dimension_semantics=("parallel",)),
        cost_estimate=pl.CostEstimate(
            flops=int(2 * B * t_out * K * LANE * LANE),
            transcendentals=0,
            bytes_accessed=int(phases.size * 2 + w.size * 2 + B * t_out * LANE * 2)),
    )(*args)


def tail(h, p, n_dense_blocks, c_out):
    """Fused mean-pool over time + dense residual blocks + output projection."""
    B, t_last, _ = h.shape
    bp = max(8, ((B + 7) // 8) * 8)               # pad batch to the 8-sublane granule
    hp = jnp.pad(h, ((0, bp - B), (0, 0), (0, 0)))
    out = pl.pallas_call(
        functools.partial(_tail_kernel, n_blocks=n_dense_blocks),
        out_shape=jax.ShapeDtypeStruct((bp, LANE), jnp.float32),
        grid=(1,),
        in_specs=[
            pl.BlockSpec((bp, t_last, LANE), lambda i: (0, 0, 0)),
            pl.BlockSpec((n_dense_blocks, LANE, LANE), lambda i: (0, 0, 0)),
            pl.BlockSpec((n_dense_blocks, 1, LANE), lambda i: (0, 0, 0)),
            pl.BlockSpec((n_dense_blocks, LANE, LANE), lambda i: (0, 0, 0)),
            pl.BlockSpec((n_dense_blocks, 1, LANE), lambda i: (0, 0, 0)),
            pl.BlockSpec((LANE, LANE), lambda i: (0, 0)),
            pl.BlockSpec((1, LANE), lambda i: (0, 0)),
        ],
        out_specs=pl.BlockSpec((bp, LANE), lambda i: (0, 0)),
    )(hp, p["d1_w"], p["d1_b"], p["d2_w"], p["d2_b"], p["out_w"], p["out_b"])
    return out[:B, :c_out]


# ----------------------- parameters & forward pass ------------------------

def init_params(key, cfg):
    c_in, c_h, c_out = cfg["c_in"], cfg["c_h"], cfg["c_out"]
    c_bank, ksz = cfg["c_bank"], cfg["kernel_size"]
    ks = list(range(cfg["bank_scale"], cfg["bank_size"] + 1, cfg["bank_scale"]))
    kmax = max(ks)
    n_bank = len(ks) * c_bank
    assert max(c_in, c_h, c_out, n_bank) <= LANE

    n_keys = 2 * len(ks) + 3 + 4 * cfg["n_conv_blocks"] + 4 * cfg["n_dense_blocks"] + 2
    keys = iter(jax.random.split(key, n_keys + 4))

    def rnd(shape, scale=0.2):
        return scale * jax.random.normal(next(keys), shape, dtype=jnp.float32)

    # Fused conv-bank weights: kernel size k embedded at tap offset (kmax//2 - k//2)
    # so kmax shifted matmuls over the kmax-reflect-padded input reproduce every
    # bank conv's own reflect-padded output.
    bank_w = jnp.zeros((kmax, LANE, LANE), jnp.float32)
    bank_b = jnp.zeros((1, LANE), jnp.float32)
    for idx, k in enumerate(ks):
        off = kmax // 2 - k // 2
        col = idx * c_bank
        bank_w = bank_w.at[off:off + k, :c_in, col:col + c_bank].set(
            rnd((k, c_in, c_bank)))
        bank_b = bank_b.at[0, col:col + c_bank].set(rnd((c_bank,)))

    in_w_bank = jnp.zeros((LANE, LANE), jnp.float32).at[:n_bank, :c_h].set(
        rnd((n_bank, c_h)))
    in_w_x = jnp.zeros((LANE, LANE), jnp.float32).at[:c_in, :c_h].set(
        rnd((c_in, c_h)))
    in_b = jnp.zeros((1, LANE), jnp.float32).at[0, :c_h].set(rnd((c_h,)))

    def conv_w():
        return jnp.zeros((ksz, LANE, LANE), jnp.float32).at[:, :c_h, :c_h].set(
            rnd((ksz, c_h, c_h)))

    def vec_b(n):
        return jnp.zeros((1, LANE), jnp.float32).at[0, :n].set(rnd((n,)))

    nb = cfg["n_conv_blocks"]
    conv1_w = [conv_w() for _ in range(nb)]
    conv1_b = [vec_b(c_h) for _ in range(nb)]
    conv2_w = [conv_w() for _ in range(nb)]
    conv2_b = [vec_b(c_h) for _ in range(nb)]

    L = cfg["n_dense_blocks"]
    d1_w = jnp.zeros((L, LANE, LANE), jnp.float32)
    d1_b = jnp.zeros((L, 1, LANE), jnp.float32)
    d2_w = jnp.zeros((L, LANE, LANE), jnp.float32)
    d2_b = jnp.zeros((L, 1, LANE), jnp.float32)
    for l in range(L):
        d1_w = d1_w.at[l, :c_h, :c_h].set(rnd((c_h, c_h)))
        d1_b = d1_b.at[l, 0, :c_h].set(rnd((c_h,)))
        d2_w = d2_w.at[l, :c_h, :c_h].set(rnd((c_h, c_h)))
        d2_b = d2_b.at[l, 0, :c_h].set(rnd((c_h,)))

    out_w = jnp.zeros((LANE, LANE), jnp.float32).at[:c_h, :c_out].set(
        rnd((c_h, c_out)))
    out_b = jnp.zeros((1, LANE), jnp.float32).at[0, :c_out].set(rnd((c_out,)))

    bf = lambda a: a.astype(jnp.bfloat16)
    return dict(
        bank_w=bf(bank_w), bank_b=bank_b,
        in_w_bank=bf(in_w_bank), in_w_x=bf(in_w_x), in_b=in_b,
        conv1_w=[bf(w) for w in conv1_w], conv1_b=conv1_b,
        conv2_w=[bf(w) for w in conv2_w], conv2_b=conv2_b,
        d1_w=bf(d1_w), d1_b=d1_b, d2_w=bf(d2_w), d2_b=d2_b,
        out_w=bf(out_w), out_b=out_b,
    )


def speaker_encoder_forward(params, x_ncl, cfg):
    """x_ncl: [B, c_in, T] (PyTorch NCL). Returns [B, c_out] (f32)."""
    B, c_in, T = x_ncl.shape
    x = jnp.transpose(x_ncl, (0, 2, 1))                       # [B, T, c_in]
    x = jnp.pad(x, ((0, 0), (0, 0), (0, LANE - c_in))).astype(jnp.bfloat16)

    ks = list(range(cfg["bank_scale"], cfg["bank_size"] + 1, cfg["bank_scale"]))
    h = frontend(x, params, max(ks))                          # bank + in_conv + ReLU

    out = h
    for l in range(cfg["n_conv_blocks"]):
        sub = cfg["subsample"][l]
        y = conv1d(out, params["conv1_w"][l], params["conv1_b"][l],
                   stride=1, relu=True)
        Bc, Tc, _ = out.shape
        # TODO(synk): handle ceil_mode partial last window when Tc % sub != 0.
        res = out.reshape(Bc, Tc // sub, sub, LANE)           # pure reshape view
        out = conv1d(y, params["conv2_w"][l], params["conv2_b"][l],
                     stride=sub, relu=True, residual=res)

    # mean-pool + dense residual blocks + output projection (single fused kernel).
    return tail(out, params, cfg["n_dense_blocks"], cfg["c_out"])


# --------------------------------- main -----------------------------------

if __name__ == "__main__":
    cfg = dict(
        c_in=8, c_h=16, c_out=32, kernel_size=5,
        bank_size=4, bank_scale=1, c_bank=8,
        n_conv_blocks=3, n_dense_blocks=3, subsample=(1, 2, 2),
    )
    B, T = 2, 16  # T divisible by prod(subsample) -> exact ceil_mode pooling

    key = jax.random.PRNGKey(0)
    k_x, k_p = jax.random.split(key)
    x = jax.random.normal(k_x, (B, cfg["c_in"], T), dtype=jnp.float32)  # NCL input
    params = init_params(k_p, cfg)

    fwd = jax.jit(functools.partial(speaker_encoder_forward, cfg=cfg))
    out = fwd(params, x)
    out = jax.block_until_ready(out)
    assert out.shape == (B, cfg["c_out"]), out.shape
    assert bool(jnp.all(jnp.isfinite(out)))
    print("KERNEL_OK")
</pallas_src>

<mosaic_0001>
module attributes {stable_mosaic.version = 11 : i64} {
  func.func @_frontend_kernel(%arg0: i32, %arg1: memref<1x19x128xbf16, #tpu.memory_space<vmem>>, %arg2: memref<4x128x128xbf16, #tpu.memory_space<vmem>>, %arg3: memref<1x128xf32, #tpu.memory_space<vmem>>, %arg4: memref<128x128xbf16, #tpu.memory_space<vmem>>, %arg5: memref<128x128xbf16, #tpu.memory_space<vmem>>, %arg6: memref<1x128xf32, #tpu.memory_space<vmem>>, %arg7: memref<1x16x128xbf16, #tpu.memory_space<vmem>>) attributes {dimension_semantics = [#tpu.dimension_semantics<parallel>], iteration_bounds = array<i64: 2>, scalar_prefetch = 0 : i64, scratch_operands = 0 : i64, tpu.core_type = #tpu.core_type<tc>, window_params = [{transform_indices = @transform_0, window_bounds = array<i64: 1, 19, 128>}, {pipeline_mode = #tpu.pipeline_mode<synchronous>, transform_indices = @transform_1, window_bounds = array<i64: 4, 128, 128>}, {pipeline_mode = #tpu.pipeline_mode<synchronous>, transform_indices = @transform_2, window_bounds = array<i64: 1, 128>}, {pipeline_mode = #tpu.pipeline_mode<synchronous>, transform_indices = @transform_3, window_bounds = array<i64: 128, 128>}, {pipeline_mode = #tpu.pipeline_mode<synchronous>, transform_indices = @transform_4, window_bounds = array<i64: 128, 128>}, {pipeline_mode = #tpu.pipeline_mode<synchronous>, transform_indices = @transform_5, window_bounds = array<i64: 1, 128>}, {transform_indices = @transform_6, window_bounds = array<i64: 1, 16, 128>}]} {
    %cst = arith.constant 0.000000e+00 : f32
    %0 = vector.broadcast %cst : f32 to vector<16x128xf32>
    %c0 = arith.constant 0 : index
    %c0_0 = arith.constant 0 : index
    %c0_1 = arith.constant 0 : index
    %1 = vector.load %arg1[%c0, %c0_0, %c0_1] : memref<1x19x128xbf16, #tpu.memory_space<vmem>>, vector<1x16x128xbf16>
    %2 = vector.shape_cast %1 : vector<1x16x128xbf16> to vector<16x128xbf16>
    %c0_2 = arith.constant 0 : index
    %c0_3 = arith.constant 0 : index
    %c0_4 = arith.constant 0 : index
    %3 = vector.load %arg2[%c0_2, %c0_3, %c0_4] : memref<4x128x128xbf16, #tpu.memory_space<vmem>>, vector<1x128x128xbf16>
    %4 = vector.shape_cast %3 : vector<1x128x128xbf16> to vector<128x128xbf16>
    %cst_5 = arith.constant dense<0.000000e+00> : vector<16x128xf32>
    %5 = tpu.matmul %2, %4, %cst_5 {dimension_numbers = #tpu.dot_dimension_numbers<[1], [0], [0], [1], [0, 0, 1, 1], [], []>} : vector<16x128xbf16>, vector<128x128xbf16>, vector<16x128xf32> -> vector<16x128xf32>
    %6 = arith.addf %0, %5 : vector<16x128xf32>
    %c0_6 = arith.constant 0 : index
    %c1 = arith.constant 1 : index
    %c0_7 = arith.constant 0 : index
    %7 = vector.load %arg1[%c0_6, %c1, %c0_7] : memref<1x19x128xbf16, #tpu.memory_space<vmem>>, vector<1x16x128xbf16>
    %8 = vector.shape_cast %7 : vector<1x16x128xbf16> to vector<16x128xbf16>
    %c1_8 = arith.constant 1 : index
    %c0_9 = arith.constant 0 : index
    %c0_10 = arith.constant 0 : index
    %9 = vector.load %arg2[%c1_8, %c0_9, %c0_10] : memref<4x128x128xbf16, #tpu.memory_space<vmem>>, vector<1x128x128xbf16>
    %10 = vector.shape_cast %9 : vector<1x128x128xbf16> to vector<128x128xbf16>
    %cst_11 = arith.constant dense<0.000000e+00> : vector<16x128xf32>
    %11 = tpu.matmul %8, %10, %cst_11 {dimension_numbers = #tpu.dot_dimension_numbers<[1], [0], [0], [1], [0, 0, 1, 1], [], []>} : vector<16x128xbf16>, vector<128x128xbf16>, vector<16x128xf32> -> vector<16x128xf32>
    %12 = arith.addf %6, %11 : vector<16x128xf32>
    %c0_12 = arith.constant 0 : index
    %c2 = arith.constant 2 : index
    %c0_13 = arith.constant 0 : index
    %13 = vector.load %arg1[%c0_12, %c2, %c0_13] : memref<1x19x128xbf16, #tpu.memory_space<vmem>>, vector<1x16x128xbf16>
    %14 = vector.shape_cast %13 : vector<1x16x128xbf16> to vector<16x128xbf16>
    %c2_14 = arith.constant 2 : index
    %c0_15 = arith.constant 0 : index
    %c0_16 = arith.constant 0 : index
    %15 = vector.load %arg2[%c2_14, %c0_15, %c0_16] : memref<4x128x128xbf16, #tpu.memory_space<vmem>>, vector<1x128x128xbf16>
    %16 = vector.shape_cast %15 : vector<1x128x128xbf16> to vector<128x128xbf16>
    %cst_17 = arith.constant dense<0.000000e+00> : vector<16x128xf32>
    %17 = tpu.matmul %14, %16, %cst_17 {dimension_numbers = #tpu.dot_dimension_numbers<[1], [0], [0], [1], [0, 0, 1, 1], [], []>} : vector<16x128xbf16>, vector<128x128xbf16>, vector<16x128xf32> -> vector<16x128xf32>
    %18 = arith.addf %12, %17 : vector<16x128xf32>
    %c0_18 = arith.constant 0 : index
    %c3 = arith.constant 3 : index
    %c0_19 = arith.constant 0 : index
    %19 = vector.load %arg1[%c0_18, %c3, %c0_19] : memref<1x19x128xbf16, #tpu.memory_space<vmem>>, vector<1x16x128xbf16>
    %20 = vector.shape_cast %19 : vector<1x16x128xbf16> to vector<16x128xbf16>
    %c3_20 = arith.constant 3 : index
    %c0_21 = arith.constant 0 : index
    %c0_22 = arith.constant 0 : index
    %21 = vector.load %arg2[%c3_20, %c0_21, %c0_22] : memref<4x128x128xbf16, #tpu.memory_space<vmem>>, vector<1x128x128xbf16>
    %22 = vector.shape_cast %21 : vector<1x128x128xbf16> to vector<128x128xbf16>
    %cst_23 = arith.constant dense<0.000000e+00> : vector<16x128xf32>
    %23 = tpu.matmul %20, %22, %cst_23 {dimension_numbers = #tpu.dot_dimension_numbers<[1], [0], [0], [1], [0, 0, 1, 1], [], []>} : vector<16x128xbf16>, vector<128x128xbf16>, vector<16x128xf32> -> vector<16x128xf32>
    %24 = arith.addf %18, %23 : vector<16x128xf32>
    %c0_24 = arith.constant 0 : index
    %c0_25 = arith.constant 0 : index
    %25 = vector.load %arg3[%c0_24, %c0_25] : memref<1x128xf32, #tpu.memory_space<vmem>>, vector<1x128xf32>
    %26 = vector.broadcast %25 : vector<1x128xf32> to vector<16x128xf32>
    %27 = arith.addf %24, %26 : vector<16x128xf32>
    %cst_26 = arith.constant 0.000000e+00 : f32
    %28 = vector.broadcast %cst_26 : f32 to vector<16x128xf32>
    %29 = arith.maximumf %27, %28 : vector<16x128xf32>
    %30 = arith.truncf %29 : vector<16x128xf32> to vector<16x128xbf16>
    %c0_27 = arith.constant 0 : index
    %c0_28 = arith.constant 0 : index
    %31 = vector.load %arg4[%c0_27, %c0_28] : memref<128x128xbf16, #tpu.memory_space<vmem>>, vector<128x128xbf16>
    %cst_29 = arith.constant dense<0.000000e+00> : vector<16x128xf32>
    %32 = tpu.matmul %30, %31, %cst_29 {dimension_numbers = #tpu.dot_dimension_numbers<[1], [0], [0], [1], [0, 0, 1, 1], [], []>} : vector<16x128xbf16>, vector<128x128xbf16>, vector<16x128xf32> -> vector<16x128xf32>
    %c0_30 = arith.constant 0 : index
    %c2_31 = arith.constant 2 : index
    %c0_32 = arith.constant 0 : index
    %33 = vector.load %arg1[%c0_30, %c2_31, %c0_32] : memref<1x19x128xbf16, #tpu.memory_space<vmem>>, vector<1x16x128xbf16>
    %34 = vector.shape_cast %33 : vector<1x16x128xbf16> to vector<16x128xbf16>
    %c0_33 = arith.constant 0 : index
    %c0_34 = arith.constant 0 : index
    %35 = vector.load %arg5[%c0_33, %c0_34] : memref<128x128xbf16, #tpu.memory_space<vmem>>, vector<128x128xbf16>
    %cst_35 = arith.constant dense<0.000000e+00> : vector<16x128xf32>
    %36 = tpu.matmul %34, %35, %cst_35 {dimension_numbers = #tpu.dot_dimension_numbers<[1], [0], [0], [1], [0, 0, 1, 1], [], []>} : vector<16x128xbf16>, vector<128x128xbf16>, vector<16x128xf32> -> vector<16x128xf32>
    %37 = arith.addf %32, %36 : vector<16x128xf32>
    %c0_36 = arith.constant 0 : index
    %c0_37 = arith.constant 0 : index
    %38 = vector.load %arg6[%c0_36, %c0_37] : memref<1x128xf32, #tpu.memory_space<vmem>>, vector<1x128xf32>
    %39 = vector.broadcast %38 : vector<1x128xf32> to vector<16x128xf32>
    %40 = arith.addf %37, %39 : vector<16x128xf32>
    %cst_38 = arith.constant 0.000000e+00 : f32
    %41 = vector.broadcast %cst_38 : f32 to vector<16x128xf32>
    %42 = arith.maximumf %40, %41 : vector<16x128xf32>
    %43 = arith.truncf %42 : vector<16x128xf32> to vector<16x128xbf16>
    %c0_39 = arith.constant 0 : index
    %c0_40 = arith.constant 0 : index
    %c0_41 = arith.constant 0 : index
    %44 = vector.load %arg7[%c0_39, %c0_40, %c0_41] : memref<1x16x128xbf16, #tpu.memory_space<vmem>>, vector<1x16x128xbf16>
    %45 = vector.shape_cast %44 : vector<1x16x128xbf16> to vector<16x128xbf16>
    %46 = vector.shape_cast %43 : vector<16x128xbf16> to vector<1x16x128xbf16>
    tpu.vector_store %arg7[%c0_39, %c0_40, %c0_41], %46 {strides = array<i32>} : memref<1x16x128xbf16, #tpu.memory_space<vmem>>, vector<1x16x128xbf16>,
    return
  }
  func.func @transform_0(%arg0: i32) -> (i32, i32, i32) {
    %c0_i32 = arith.constant 0 : i32
    %c0_i32_0 = arith.constant 0 : i32
    %c0_i32_1 = arith.constant 0 : i32
    return %arg0, %c0_i32, %c0_i32_0 : i32, i32, i32
  }
  func.func @transform_1(%arg0: i32) -> (i32, i32, i32) {
    %c0_i32 = arith.constant 0 : i32
    %c0_i32_0 = arith.constant 0 : i32
    %c0_i32_1 = arith.constant 0 : i32
    %c0_i32_2 = arith.constant 0 : i32
    return %c0_i32, %c0_i32_0, %c0_i32_1 : i32, i32, i32
  }
  func.func @transform_2(%arg0: i32) -> (i32, i32) {
    %c0_i32 = arith.constant 0 : i32
    %c0_i32_0 = arith.constant 0 : i32
    %c0_i32_1 = arith.constant 0 : i32
    return %c0_i32, %c0_i32_0 : i32, i32
  }
  func.func @transform_3(%arg0: i32) -> (i32, i32) {
    %c0_i32 = arith.constant 0 : i32
    %c0_i32_0 = arith.constant 0 : i32
    %c0_i32_1 = arith.constant 0 : i32
    return %c0_i32, %c0_i32_0 : i32, i32
  }
  func.func @transform_4(%arg0: i32) -> (i32, i32) {
    %c0_i32 = arith.constant 0 : i32
    %c0_i32_0 = arith.constant 0 : i32
    %c0_i32_1 = arith.constant 0 : i32
    return %c0_i32, %c0_i32_0 : i32, i32
  }
  func.func @transform_5(%arg0: i32) -> (i32, i32) {
    %c0_i32 = arith.constant 0 : i32
    %c0_i32_0 = arith.constant 0 : i32
    %c0_i32_1 = arith.constant 0 : i32
    return %c0_i32, %c0_i32_0 : i32, i32
  }
  func.func @transform_6(%arg0: i32) -> (i32, i32, i32) {
    %c0_i32 = arith.constant 0 : i32
    %c0_i32_0 = arith.constant 0 : i32
    %c0_i32_1 = arith.constant 0 : i32
    return %arg0, %c0_i32, %c0_i32_0 : i32, i32, i32
  }
}

module attributes {stable_mosaic.version = 11 : i64} {
  func.func @_conv_kernel(%arg0: i32, %arg1: memref<1x1x20x128xbf16, #tpu.memory_space<vmem>>, %arg2: memref<5x128x128xbf16, #tpu.memory_space<vmem>>, %arg3: memref<1x128xf32, #tpu.memory_space<vmem>>, %arg4: memref<1x16x128xbf16, #tpu.memory_space<vmem>>) attributes {dimension_semantics = [#tpu.dimension_semantics<parallel>], iteration_bounds = array<i64: 2>, scalar_prefetch = 0 : i64, scratch_operands = 0 : i64, tpu.core_type = #tpu.core_type<tc>, window_params = [{transform_indices = @transform_0, window_bounds = array<i64: 1, 1, 20, 128>}, {pipeline_mode = #tpu.pipeline_mode<synchronous>, transform_indices = @transform_1, window_bounds = array<i64: 5, 128, 128>}, {pipeline_mode = #tpu.pipeline_mode<synchronous>, transform_indices = @transform_2, window_bounds = array<i64: 1, 128>}, {transform_indices = @transform_3, window_bounds = array<i64: 1, 16, 128>}]} {
    %cst = arith.constant 0.000000e+00 : f32
    %0 = vector.broadcast %cst : f32 to vector<16x128xf32>
    %c0 = arith.constant 0 : index
    %c0_0 = arith.constant 0 : index
    %c0_1 = arith.constant 0 : index
    %c0_2 = arith.constant 0 : index
    %1 = vector.load %arg1[%c0, %c0_0, %c0_1, %c0_2] : memref<1x1x20x128xbf16, #tpu.memory_space<vmem>>, vector<1x1x16x128xbf16>
    %2 = vector.shape_cast %1 : vector<1x1x16x128xbf16> to vector<16x128xbf16>
    %c0_3 = arith.constant 0 : index
    %c0_4 = arith.constant 0 : index
    %c0_5 = arith.constant 0 : index
    %3 = vector.load %arg2[%c0_3, %c0_4, %c0_5] : memref<5x128x128xbf16, #tpu.memory_space<vmem>>, vector<1x128x128xbf16>
    %4 = vector.shape_cast %3 : vector<1x128x128xbf16> to vector<128x128xbf16>
    %cst_6 = arith.constant dense<0.000000e+00> : vector<16x128xf32>
    %5 = tpu.matmul %2, %4, %cst_6 {dimension_numbers = #tpu.dot_dimension_numbers<[1], [0], [0], [1], [0, 0, 1, 1], [], []>} : vector<16x128xbf16>, vector<128x128xbf16>, vector<16x128xf32> -> vector<16x128xf32>
    %6 = arith.addf %0, %5 : vector<16x128xf32>
    %c0_7 = arith.constant 0 : index
    %c0_8 = arith.constant 0 : index
    %c1 = arith.constant 1 : index
    %c0_9 = arith.constant 0 : index
    %7 = vector.load %arg1[%c0_7, %c0_8, %c1, %c0_9] : memref<1x1x20x128xbf16, #tpu.memory_space<vmem>>, vector<1x1x16x128xbf16>
    %8 = vector.shape_cast %7 : vector<1x1x16x128xbf16> to vector<16x128xbf16>
    %c1_10 = arith.constant 1 : index
    %c0_11 = arith.constant 0 : index
    %c0_12 = arith.constant 0 : index
    %9 = vector.load %arg2[%c1_10, %c0_11, %c0_12] : memref<5x128x128xbf16, #tpu.memory_space<vmem>>, vector<1x128x128xbf16>
    %10 = vector.shape_cast %9 : vector<1x128x128xbf16> to vector<128x128xbf16>
    %cst_13 = arith.constant dense<0.000000e+00> : vector<16x128xf32>
    %11 = tpu.matmul %8, %10, %cst_13 {dimension_numbers = #tpu.dot_dimension_numbers<[1], [0], [0], [1], [0, 0, 1, 1], [], []>} : vector<16x128xbf16>, vector<128x128xbf16>, vector<16x128xf32> -> vector<16x128xf32>
    %12 = arith.addf %6, %11 : vector<16x128xf32>
    %c0_14 = arith.constant 0 : index
    %c0_15 = arith.constant 0 : index
    %c2 = arith.constant 2 : index
    %c0_16 = arith.constant 0 : index
    %13 = vector.load %arg1[%c0_14, %c0_15, %c2, %c0_16] : memref<1x1x20x128xbf16, #tpu.memory_space<vmem>>, vector<1x1x16x128xbf16>
    %14 = vector.shape_cast %13 : vector<1x1x16x128xbf16> to vector<16x128xbf16>
    %c2_17 = arith.constant 2 : index
    %c0_18 = arith.constant 0 : index
    %c0_19 = arith.constant 0 : index
    %15 = vector.load %arg2[%c2_17, %c0_18, %c0_19] : memref<5x128x128xbf16, #tpu.memory_space<vmem>>, vector<1x128x128xbf16>
    %16 = vector.shape_cast %15 : vector<1x128x128xbf16> to vector<128x128xbf16>
    %cst_20 = arith.constant dense<0.000000e+00> : vector<16x128xf32>
    %17 = tpu.matmul %14, %16, %cst_20 {dimension_numbers = #tpu.dot_dimension_numbers<[1], [0], [0], [1], [0, 0, 1, 1], [], []>} : vector<16x128xbf16>, vector<128x128xbf16>, vector<16x128xf32> -> vector<16x128xf32>
    %18 = arith.addf %12, %17 : vector<16x128xf32>
    %c0_21 = arith.constant 0 : index
    %c0_22 = arith.constant 0 : index
    %c3 = arith.constant 3 : index
    %c0_23 = arith.constant 0 : index
    %19 = vector.load %arg1[%c0_21, %c0_22, %c3, %c0_23] : memref<1x1x20x128xbf16, #tpu.memory_space<vmem>>, vector<1x1x16x128xbf16>
    %20 = vector.shape_cast %19 : vector<1x1x16x128xbf16> to vector<16x128xbf16>
    %c3_24 = arith.constant 3 : index
    %c0_25 = arith.constant 0 : index
    %c0_26 = arith.constant 0 : index
    %21 = vector.load %arg2[%c3_24, %c0_25, %c0_26] : memref<5x128x128xbf16, #tpu.memory_space<vmem>>, vector<1x128x128xbf16>
    %22 = vector.shape_cast %21 : vector<1x128x128xbf16> to vector<128x128xbf16>
    %cst_27 = arith.constant dense<0.000000e+00> : vector<16x128xf32>
    %23 = tpu.matmul %20, %22, %cst_27 {dimension_numbers = #tpu.dot_dimension_numbers<[1], [0], [0], [1], [0, 0, 1, 1], [], []>} : vector<16x128xbf16>, vector<128x128xbf16>, vector<16x128xf32> -> vector<16x128xf32>
    %24 = arith.addf %18, %23 : vector<16x128xf32>
    %c0_28 = arith.constant 0 : index
    %c0_29 = arith.constant 0 : index
    %c4 = arith.constant 4 : index
    %c0_30 = arith.constant 0 : index
    %25 = vector.load %arg1[%c0_28, %c0_29, %c4, %c0_30] : memref<1x1x20x128xbf16, #tpu.memory_space<vmem>>, vector<1x1x16x128xbf16>
    %26 = vector.shape_cast %25 : vector<1x1x16x128xbf16> to vector<16x128xbf16>
    %c4_31 = arith.constant 4 : index
    %c0_32 = arith.constant 0 : index
    %c0_33 = arith.constant 0 : index
    %27 = vector.load %arg2[%c4_31, %c0_32, %c0_33] : memref<5x128x128xbf16, #tpu.memory_space<vmem>>, vector<1x128x128xbf16>
    %28 = vector.shape_cast %27 : vector<1x128x128xbf16> to vector<128x128xbf16>
    %cst_34 = arith.constant dense<0.000000e+00> : vector<16x128xf32>
    %29 = tpu.matmul %26, %28, %cst_34 {dimension_numbers = #tpu.dot_dimension_numbers<[1], [0], [0], [1], [0, 0, 1, 1], [], []>} : vector<16x128xbf16>, vector<128x128xbf16>, vector<16x128xf32> -> vector<16x128xf32>
    %30 = arith.addf %24, %29 : vector<16x128xf32>
    %c0_35 = arith.constant 0 : index
    %c0_36 = arith.constant 0 : index
    %31 = vector.load %arg3[%c0_35, %c0_36] : memref<1x128xf32, #tpu.memory_space<vmem>>, vector<1x128xf32>
    %32 = vector.broadcast %31 : vector<1x128xf32> to vector<16x128xf32>
    %33 = arith.addf %30, %32 : vector<16x128xf32>
    %cst_37 = arith.constant 0.000000e+00 : f32
    %34 = vector.broadcast %cst_37 : f32 to vector<16x128xf32>
    %35 = arith.maximumf %33, %34 : vector<16x128xf32>
    %36 = arith.truncf %35 : vector<16x128xf32> to vector<16x128xbf16>
    %c0_38 = arith.constant 0 : index
    %c0_39 = arith.constant 0 : index
    %c0_40 = arith.constant 0 : index
    %37 = vector.load %arg4[%c0_38, %c0_39, %c0_40] : memref<1x16x128xbf16, #tpu.memory_space<vmem>>, vector<1x16x128xbf16>
    %38 = vector.shape_cast %37 : vector<1x16x128xbf16> to vector<16x128xbf16>
    %39 = vector.shape_cast %36 : vector<16x128xbf16> to vector<1x16x128xbf16>
    tpu.vector_store %arg4[%c0_38, %c0_39, %c0_40], %39 {strides = array<i32>} : memref<1x16x128xbf16, #tpu.memory_space<vmem>>, vector<1x16x128xbf16>,
    return
  }
  func.func @transform_0(%arg0: i32) -> (i32, i32, i32, i32) {
    %c0_i32 = arith.constant 0 : i32
    %c0_i32_0 = arith.constant 0 : i32
    %c0_i32_1 = arith.constant 0 : i32
    %c0_i32_2 = arith.constant 0 : i32
    return %arg0, %c0_i32, %c0_i32_0, %c0_i32_1 : i32, i32, i32, i32
  }
  func.func @transform_1(%arg0: i32) -> (i32, i32, i32) {
    %c0_i32 = arith.constant 0 : i32
    %c0_i32_0 = arith.constant 0 : i32
    %c0_i32_1 = arith.constant 0 : i32
    %c0_i32_2 = arith.constant 0 : i32
    return %c0_i32, %c0_i32_0, %c0_i32_1 : i32, i32, i32
  }
  func.func @transform_2(%arg0: i32) -> (i32, i32) {
    %c0_i32 = arith.constant 0 : i32
    %c0_i32_0 = arith.constant 0 : i32
    %c0_i32_1 = arith.constant 0 : i32
    return %c0_i32, %c0_i32_0 : i32, i32
  }
  func.func @transform_3(%arg0: i32) -> (i32, i32, i32) {
    %c0_i32 = arith.constant 0 : i32
    %c0_i32_0 = arith.constant 0 : i32
    %c0_i32_1 = arith.constant 0 : i32
    return %arg0, %c0_i32, %c0_i32_0 : i32, i32, i32
  }
}

module attributes {stable_mosaic.version = 11 : i64} {
  func.func @_conv_kernel(%arg0: i32, %arg1: memref<1x1x20x128xbf16, #tpu.memory_space<vmem>>, %arg2: memref<5x128x128xbf16, #tpu.memory_space<vmem>>, %arg3: memref<1x128xf32, #tpu.memory_space<vmem>>, %arg4: memref<1x16x1x128xbf16, #tpu.memory_space<vmem>>, %arg5: memref<1x16x128xbf16, #tpu.memory_space<vmem>>) attributes {dimension_semantics = [#tpu.dimension_semantics<parallel>], iteration_bounds = array<i64: 2>, scalar_prefetch = 0 : i64, scratch_operands = 0 : i64, tpu.core_type = #tpu.core_type<tc>, window_params = [{transform_indices = @transform_0, window_bounds = array<i64: 1, 1, 20, 128>}, {pipeline_mode = #tpu.pipeline_mode<synchronous>, transform_indices = @transform_1, window_bounds = array<i64: 5, 128, 128>}, {pipeline_mode = #tpu.pipeline_mode<synchronous>, transform_indices = @transform_2, window_bounds = array<i64: 1, 128>}, {transform_indices = @transform_3, window_bounds = array<i64: 1, 16, 1, 128>}, {transform_indices = @transform_4, window_bounds = array<i64: 1, 16, 128>}]} {
    %cst = arith.constant 0.000000e+00 : f32
    %0 = vector.broadcast %cst : f32 to vector<16x128xf32>
    %c0 = arith.constant 0 : index
    %c0_0 = arith.constant 0 : index
    %c0_1 = arith.constant 0 : index
    %c0_2 = arith.constant 0 : index
    %1 = vector.load %arg1[%c0, %c0_0, %c0_1, %c0_2] : memref<1x1x20x128xbf16, #tpu.memory_space<vmem>>, vector<1x1x16x128xbf16>
    %2 = vector.shape_cast %1 : vector<1x1x16x128xbf16> to vector<16x128xbf16>
    %c0_3 = arith.constant 0 : index
    %c0_4 = arith.constant 0 : index
    %c0_5 = arith.constant 0 : index
    %3 = vector.load %arg2[%c0_3, %c0_4, %c0_5] : memref<5x128x128xbf16, #tpu.memory_space<vmem>>, vector<1x128x128xbf16>
    %4 = vector.shape_cast %3 : vector<1x128x128xbf16> to vector<128x128xbf16>
    %cst_6 = arith.constant dense<0.000000e+00> : vector<16x128xf32>
    %5 = tpu.matmul %2, %4, %cst_6 {dimension_numbers = #tpu.dot_dimension_numbers<[1], [0], [0], [1], [0, 0, 1, 1], [], []>} : vector<16x128xbf16>, vector<128x128xbf16>, vector<16x128xf32> -> vector<16x128xf32>
    %6 = arith.addf %0, %5 : vector<16x128xf32>
    %c0_7 = arith.constant 0 : index
    %c0_8 = arith.constant 0 : index
    %c1 = arith.constant 1 : index
    %c0_9 = arith.constant 0 : index
    %7 = vector.load %arg1[%c0_7, %c0_8, %c1, %c0_9] : memref<1x1x20x128xbf16, #tpu.memory_space<vmem>>, vector<1x1x16x128xbf16>
    %8 = vector.shape_cast %7 : vector<1x1x16x128xbf16> to vector<16x128xbf16>
    %c1_10 = arith.constant 1 : index
    %c0_11 = arith.constant 0 : index
    %c0_12 = arith.constant 0 : index
    %9 = vector.load %arg2[%c1_10, %c0_11, %c0_12] : memref<5x128x128xbf16, #tpu.memory_space<vmem>>, vector<1x128x128xbf16>
    %10 = vector.shape_cast %9 : vector<1x128x128xbf16> to vector<128x128xbf16>
    %cst_13 = arith.constant dense<0.000000e+00> : vector<16x128xf32>
    %11 = tpu.matmul %8, %10, %cst_13 {dimension_numbers = #tpu.dot_dimension_numbers<[1], [0], [0], [1], [0, 0, 1, 1], [], []>} : vector<16x128xbf16>, vector<128x128xbf16>, vector<16x128xf32> -> vector<16x128xf32>
    %12 = arith.addf %6, %11 : vector<16x128xf32>
    %c0_14 = arith.constant 0 : index
    %c0_15 = arith.constant 0 : index
    %c2 = arith.constant 2 : index
    %c0_16 = arith.constant 0 : index
    %13 = vector.load %arg1[%c0_14, %c0_15, %c2, %c0_16] : memref<1x1x20x128xbf16, #tpu.memory_space<vmem>>, vector<1x1x16x128xbf16>
    %14 = vector.shape_cast %13 : vector<1x1x16x128xbf16> to vector<16x128xbf16>
    %c2_17 = arith.constant 2 : index
    %c0_18 = arith.constant 0 : index
    %c0_19 = arith.constant 0 : index
    %15 = vector.load %arg2[%c2_17, %c0_18, %c0_19] : memref<5x128x128xbf16, #tpu.memory_space<vmem>>, vector<1x128x128xbf16>
    %16 = vector.shape_cast %15 : vector<1x128x128xbf16> to vector<128x128xbf16>
    %cst_20 = arith.constant dense<0.000000e+00> : vector<16x128xf32>
    %17 = tpu.matmul %14, %16, %cst_20 {dimension_numbers = #tpu.dot_dimension_numbers<[1], [0], [0], [1], [0, 0, 1, 1], [], []>} : vector<16x128xbf16>, vector<128x128xbf16>, vector<16x128xf32> -> vector<16x128xf32>
    %18 = arith.addf %12, %17 : vector<16x128xf32>
    %c0_21 = arith.constant 0 : index
    %c0_22 = arith.constant 0 : index
    %c3 = arith.constant 3 : index
    %c0_23 = arith.constant 0 : index
    %19 = vector.load %arg1[%c0_21, %c0_22, %c3, %c0_23] : memref<1x1x20x128xbf16, #tpu.memory_space<vmem>>, vector<1x1x16x128xbf16>
    %20 = vector.shape_cast %19 : vector<1x1x16x128xbf16> to vector<16x128xbf16>
    %c3_24 = arith.constant 3 : index
    %c0_25 = arith.constant 0 : index
    %c0_26 = arith.constant 0 : index
    %21 = vector.load %arg2[%c3_24, %c0_25, %c0_26] : memref<5x128x128xbf16, #tpu.memory_space<vmem>>, vector<1x128x128xbf16>
    %22 = vector.shape_cast %21 : vector<1x128x128xbf16> to vector<128x128xbf16>
    %cst_27 = arith.constant dense<0.000000e+00> : vector<16x128xf32>
    %23 = tpu.matmul %20, %22, %cst_27 {dimension_numbers = #tpu.dot_dimension_numbers<[1], [0], [0], [1], [0, 0, 1, 1], [], []>} : vector<16x128xbf16>, vector<128x128xbf16>, vector<16x128xf32> -> vector<16x128xf32>
    %24 = arith.addf %18, %23 : vector<16x128xf32>
    %c0_28 = arith.constant 0 : index
    %c0_29 = arith.constant 0 : index
    %c4 = arith.constant 4 : index
    %c0_30 = arith.constant 0 : index
    %25 = vector.load %arg1[%c0_28, %c0_29, %c4, %c0_30] : memref<1x1x20x128xbf16, #tpu.memory_space<vmem>>, vector<1x1x16x128xbf16>
    %26 = vector.shape_cast %25 : vector<1x1x16x128xbf16> to vector<16x128xbf16>
    %c4_31 = arith.constant 4 : index
    %c0_32 = arith.constant 0 : index
    %c0_33 = arith.constant 0 : index
    %27 = vector.load %arg2[%c4_31, %c0_32, %c0_33] : memref<5x128x128xbf16, #tpu.memory_space<vmem>>, vector<1x128x128xbf16>
    %28 = vector.shape_cast %27 : vector<1x128x128xbf16> to vector<128x128xbf16>
    %cst_34 = arith.constant dense<0.000000e+00> : vector<16x128xf32>
    %29 = tpu.matmul %26, %28, %cst_34 {dimension_numbers = #tpu.dot_dimension_numbers<[1], [0], [0], [1], [0, 0, 1, 1], [], []>} : vector<16x128xbf16>, vector<128x128xbf16>, vector<16x128xf32> -> vector<16x128xf32>
    %30 = arith.addf %24, %29 : vector<16x128xf32>
    %c0_35 = arith.constant 0 : index
    %c0_36 = arith.constant 0 : index
    %31 = vector.load %arg3[%c0_35, %c0_36] : memref<1x128xf32, #tpu.memory_space<vmem>>, vector<1x128xf32>
    %32 = vector.broadcast %31 : vector<1x128xf32> to vector<16x128xf32>
    %33 = arith.addf %30, %32 : vector<16x128xf32>
    %cst_37 = arith.constant 0.000000e+00 : f32
    %34 = vector.broadcast %cst_37 : f32 to vector<16x128xf32>
    %35 = arith.maximumf %33, %34 : vector<16x128xf32>
    %c0_38 = arith.constant 0 : index
    %c0_39 = arith.constant 0 : index
    %c0_40 = arith.constant 0 : index
    %c0_41 = arith.constant 0 : index
    %36 = vector.load %arg4[%c0_38, %c0_39, %c0_40, %c0_41] : memref<1x16x1x128xbf16, #tpu.memory_space<vmem>>, vector<1x16x1x128xbf16>
    %37 = vector.shape_cast %36 : vector<1x16x1x128xbf16> to vector<16x1x128xbf16>
    %38 = arith.extf %37 : vector<16x1x128xbf16> to vector<16x1x128xf32>
    %cst_42 = arith.constant dense<0.000000e+00> : vector<16x128xf32>
    %39 = vector.multi_reduction <add>, %38, %cst_42 [1] : vector<16x1x128xf32> to vector<16x128xf32>
    %cst_43 = arith.constant 1.000000e+00 : f32
    %40 = vector.broadcast %cst_43 : f32 to vector<16x128xf32>
    %41 = arith.divf %39, %40 : vector<16x128xf32>
    %42 = arith.addf %35, %41 : vector<16x128xf32>
    %43 = arith.truncf %42 : vector<16x128xf32> to vector<16x128xbf16>
    %c0_44 = arith.constant 0 : index
    %c0_45 = arith.constant 0 : index
    %c0_46 = arith.constant 0 : index
    %44 = vector.load %arg5[%c0_44, %c0_45, %c0_46] : memref<1x16x128xbf16, #tpu.memory_space<vmem>>, vector<1x16x128xbf16>
    %45 = vector.shape_cast %44 : vector<1x16x128xbf16> to vector<16x128xbf16>
    %46 = vector.shape_cast %43 : vector<16x128xbf16> to vector<1x16x128xbf16>
    tpu.vector_store %arg5[%c0_44, %c0_45, %c0_46], %46 {strides = array<i32>} : memref<1x16x128xbf16, #tpu.memory_space<vmem>>, vector<1x16x128xbf16>,
    return
  }
  func.func @transform_0(%arg0: i32) -> (i32, i32, i32, i32) {
    %c0_i32 = arith.constant 0 : i32
    %c0_i32_0 = arith.constant 0 : i32
    %c0_i32_1 = arith.constant 0 : i32
    %c0_i32_2 = arith.constant 0 : i32
    return %arg0, %c0_i32, %c0_i32_0, %c0_i32_1 : i32, i32, i32, i32
  }
  func.func @transform_1(%arg0: i32) -> (i32, i32, i32) {
    %c0_i32 = arith.constant 0 : i32
    %c0_i32_0 = arith.constant 0 : i32
    %c0_i32_1 = arith.constant 0 : i32
    %c0_i32_2 = arith.constant 0 : i32
    return %c0_i32, %c0_i32_0, %c0_i32_1 : i32, i32, i32
  }
  func.func @transform_2(%arg0: i32) -> (i32, i32) {
    %c0_i32 = arith.constant 0 : i32
    %c0_i32_0 = arith.constant 0 : i32
    %c0_i32_1 = arith.constant 0 : i32
    return %c0_i32, %c0_i32_0 : i32, i32
  }
  func.func @transform_3(%arg0: i32) -> (i32, i32, i32, i32) {
    %c0_i32 = arith.constant 0 : i32
    %c0_i32_0 = arith.constant 0 : i32
    %c0_i32_1 = arith.constant 0 : i32
    %c0_i32_2 = arith.constant 0 : i32
    return %arg0, %c0_i32, %c0_i32_0, %c0_i32_1 : i32, i32, i32, i32
  }
  func.func @transform_4(%arg0: i32) -> (i32, i32, i32) {
    %c0_i32 = arith.constant 0 : i32
    %c0_i32_0 = arith.constant 0 : i32
    %c0_i32_1 = arith.constant 0 : i32
    return %arg0, %c0_i32, %c0_i32_0 : i32, i32, i32
  }
}

module attributes {stable_mosaic.version = 11 : i64} {
  func.func @_conv_kernel(%arg0: i32, %arg1: memref<1x2x10x128xbf16, #tpu.memory_space<vmem>>, %arg2: memref<5x128x128xbf16, #tpu.memory_space<vmem>>, %arg3: memref<1x128xf32, #tpu.memory_space<vmem>>, %arg4: memref<1x8x2x128xbf16, #tpu.memory_space<vmem>>, %arg5: memref<1x8x128xbf16, #tpu.memory_space<vmem>>) attributes {dimension_semantics = [#tpu.dimension_semantics<parallel>], iteration_bounds = array<i64: 2>, scalar_prefetch = 0 : i64, scratch_operands = 0 : i64, tpu.core_type = #tpu.core_type<tc>, window_params = [{transform_indices = @transform_0, window_bounds = array<i64: 1, 2, 10, 128>}, {pipeline_mode = #tpu.pipeline_mode<synchronous>, transform_indices = @transform_1, window_bounds = array<i64: 5, 128, 128>}, {pipeline_mode = #tpu.pipeline_mode<synchronous>, transform_indices = @transform_2, window_bounds = array<i64: 1, 128>}, {transform_indices = @transform_3, window_bounds = array<i64: 1, 8, 2, 128>}, {transform_indices = @transform_4, window_bounds = array<i64: 1, 8, 128>}]} {
    %cst = arith.constant 0.000000e+00 : f32
    %0 = vector.broadcast %cst : f32 to vector<8x128xf32>
    %c0 = arith.constant 0 : index
    %c0_0 = arith.constant 0 : index
    %c0_1 = arith.constant 0 : index
    %c0_2 = arith.constant 0 : index
    %1 = vector.load %arg1[%c0, %c0_0, %c0_1, %c0_2] : memref<1x2x10x128xbf16, #tpu.memory_space<vmem>>, vector<1x1x8x128xbf16>
    %2 = vector.shape_cast %1 : vector<1x1x8x128xbf16> to vector<8x128xbf16>
    %c0_3 = arith.constant 0 : index
    %c0_4 = arith.constant 0 : index
    %c0_5 = arith.constant 0 : index
    %3 = vector.load %arg2[%c0_3, %c0_4, %c0_5] : memref<5x128x128xbf16, #tpu.memory_space<vmem>>, vector<1x128x128xbf16>
    %4 = vector.shape_cast %3 : vector<1x128x128xbf16> to vector<128x128xbf16>
    %cst_6 = arith.constant dense<0.000000e+00> : vector<8x128xf32>
    %5 = tpu.matmul %2, %4, %cst_6 {dimension_numbers = #tpu.dot_dimension_numbers<[1], [0], [0], [1], [0, 0, 1, 1], [], []>} : vector<8x128xbf16>, vector<128x128xbf16>, vector<8x128xf32> -> vector<8x128xf32>
    %6 = arith.addf %0, %5 : vector<8x128xf32>
    %c0_7 = arith.constant 0 : index
    %c1 = arith.constant 1 : index
    %c0_8 = arith.constant 0 : index
    %c0_9 = arith.constant 0 : index
    %7 = vector.load %arg1[%c0_7, %c1, %c0_8, %c0_9] : memref<1x2x10x128xbf16, #tpu.memory_space<vmem>>, vector<1x1x8x128xbf16>
    %8 = vector.shape_cast %7 : vector<1x1x8x128xbf16> to vector<8x128xbf16>
    %c1_10 = arith.constant 1 : index
    %c0_11 = arith.constant 0 : index
    %c0_12 = arith.constant 0 : index
    %9 = vector.load %arg2[%c1_10, %c0_11, %c0_12] : memref<5x128x128xbf16, #tpu.memory_space<vmem>>, vector<1x128x128xbf16>
    %10 = vector.shape_cast %9 : vector<1x128x128xbf16> to vector<128x128xbf16>
    %cst_13 = arith.constant dense<0.000000e+00> : vector<8x128xf32>
    %11 = tpu.matmul %8, %10, %cst_13 {dimension_numbers = #tpu.dot_dimension_numbers<[1], [0], [0], [1], [0, 0, 1, 1], [], []>} : vector<8x128xbf16>, vector<128x128xbf16>, vector<8x128xf32> -> vector<8x128xf32>
    %12 = arith.addf %6, %11 : vector<8x128xf32>
    %c0_14 = arith.constant 0 : index
    %c0_15 = arith.constant 0 : index
    %c1_16 = arith.constant 1 : index
    %c0_17 = arith.constant 0 : index
    %13 = vector.load %arg1[%c0_14, %c0_15, %c1_16, %c0_17] : memref<1x2x10x128xbf16, #tpu.memory_space<vmem>>, vector<1x1x8x128xbf16>
    %14 = vector.shape_cast %13 : vector<1x1x8x128xbf16> to vector<8x128xbf16>
    %c2 = arith.constant 2 : index
    %c0_18 = arith.constant 0 : index
    %c0_19 = arith.constant 0 : index
    %15 = vector.load %arg2[%c2, %c0_18, %c0_19] : memref<5x128x128xbf16, #tpu.memory_space<vmem>>, vector<1x128x128xbf16>
    %16 = vector.shape_cast %15 : vector<1x128x128xbf16> to vector<128x128xbf16>
    %cst_20 = arith.constant dense<0.000000e+00> : vector<8x128xf32>
    %17 = tpu.matmul %14, %16, %cst_20 {dimension_numbers = #tpu.dot_dimension_numbers<[1], [0], [0], [1], [0, 0, 1, 1], [], []>} : vector<8x128xbf16>, vector<128x128xbf16>, vector<8x128xf32> -> vector<8x128xf32>
    %18 = arith.addf %12, %17 : vector<8x128xf32>
    %c0_21 = arith.constant 0 : index
    %c1_22 = arith.constant 1 : index
    %c1_23 = arith.constant 1 : index
    %c0_24 = arith.constant 0 : index
    %19 = vector.load %arg1[%c0_21, %c1_22, %c1_23, %c0_24] : memref<1x2x10x128xbf16, #tpu.memory_space<vmem>>, vector<1x1x8x128xbf16>
    %20 = vector.shape_cast %19 : vector<1x1x8x128xbf16> to vector<8x128xbf16>
    %c3 = arith.constant 3 : index
    %c0_25 = arith.constant 0 : index
    %c0_26 = arith.constant 0 : index
    %21 = vector.load %arg2[%c3, %c0_25, %c0_26] : memref<5x128x128xbf16, #tpu.memory_space<vmem>>, vector<1x128x128xbf16>
    %22 = vector.shape_cast %21 : vector<1x128x128xbf16> to vector<128x128xbf16>
    %cst_27 = arith.constant dense<0.000000e+00> : vector<8x128xf32>
    %23 = tpu.matmul %20, %22, %cst_27 {dimension_numbers = #tpu.dot_dimension_numbers<[1], [0], [0], [1], [0, 0, 1, 1], [], []>} : vector<8x128xbf16>, vector<128x128xbf16>, vector<8x128xf32> -> vector<8x128xf32>
    %24 = arith.addf %18, %23 : vector<8x128xf32>
    %c0_28 = arith.constant 0 : index
    %c0_29 = arith.constant 0 : index
    %c2_30 = arith.constant 2 : index
    %c0_31 = arith.constant 0 : index
    %25 = vector.load %arg1[%c0_28, %c0_29, %c2_30, %c0_31] : memref<1x2x10x128xbf16, #tpu.memory_space<vmem>>, vector<1x1x8x128xbf16>
    %26 = vector.shape_cast %25 : vector<1x1x8x128xbf16> to vector<8x128xbf16>
    %c4 = arith.constant 4 : index
    %c0_32 = arith.constant 0 : index
    %c0_33 = arith.constant 0 : index
    %27 = vector.load %arg2[%c4, %c0_32, %c0_33] : memref<5x128x128xbf16, #tpu.memory_space<vmem>>, vector<1x128x128xbf16>
    %28 = vector.shape_cast %27 : vector<1x128x128xbf16> to vector<128x128xbf16>
    %cst_34 = arith.constant dense<0.000000e+00> : vector<8x128xf32>
    %29 = tpu.matmul %26, %28, %cst_34 {dimension_numbers = #tpu.dot_dimension_numbers<[1], [0], [0], [1], [0, 0, 1, 1], [], []>} : vector<8x128xbf16>, vector<128x128xbf16>, vector<8x128xf32> -> vector<8x128xf32>
    %30 = arith.addf %24, %29 : vector<8x128xf32>
    %c0_35 = arith.constant 0 : index
    %c0_36 = arith.constant 0 : index
    %31 = vector.load %arg3[%c0_35, %c0_36] : memref<1x128xf32, #tpu.memory_space<vmem>>, vector<1x128xf32>
    %32 = vector.broadcast %31 : vector<1x128xf32> to vector<8x128xf32>
    %33 = arith.addf %30, %32 : vector<8x128xf32>
    %cst_37 = arith.constant 0.000000e+00 : f32
    %34 = vector.broadcast %cst_37 : f32 to vector<8x128xf32>
    %35 = arith.maximumf %33, %34 : vector<8x128xf32>
    %c0_38 = arith.constant 0 : index
    %c0_39 = arith.constant 0 : index
    %c0_40 = arith.constant 0 : index
    %c0_41 = arith.constant 0 : index
    %36 = vector.load %arg4[%c0_38, %c0_39, %c0_40, %c0_41] : memref<1x8x2x128xbf16, #tpu.memory_space<vmem>>, vector<1x8x2x128xbf16>
    %37 = vector.shape_cast %36 : vector<1x8x2x128xbf16> to vector<8x2x128xbf16>
    %38 = arith.extf %37 : vector<8x2x128xbf16> to vector<8x2x128xf32>
    %cst_42 = arith.constant dense<0.000000e+00> : vector<8x128xf32>
    %39 = vector.multi_reduction <add>, %38, %cst_42 [1] : vector<8x2x128xf32> to vector<8x128xf32>
    %cst_43 = arith.constant 2.000000e+00 : f32
    %40 = vector.broadcast %cst_43 : f32 to vector<8x128xf32>
    %41 = arith.divf %39, %40 : vector<8x128xf32>
    %42 = arith.addf %35, %41 : vector<8x128xf32>
    %43 = arith.truncf %42 : vector<8x128xf32> to vector<8x128xbf16>
    %c0_44 = arith.constant 0 : index
    %c0_45 = arith.constant 0 : index
    %c0_46 = arith.constant 0 : index
    %44 = vector.load %arg5[%c0_44, %c0_45, %c0_46] : memref<1x8x128xbf16, #tpu.memory_space<vmem>>, vector<1x8x128xbf16>
    %45 = vector.shape_cast %44 : vector<1x8x128xbf16> to vector<8x128xbf16>
    %46 = vector.shape_cast %43 : vector<8x128xbf16> to vector<1x8x128xbf16>
    tpu.vector_store %arg5[%c0_44, %c0_45, %c0_46], %46 {strides = array<i32>} : memref<1x8x128xbf16, #tpu.memory_space<vmem>>, vector<1x8x128xbf16>,
    return
  }
  func.func @transform_0(%arg0: i32) -> (i32, i32, i32, i32) {
    %c0_i32 = arith.constant 0 : i32
    %c0_i32_0 = arith.constant 0 : i32
    %c0_i32_1 = arith.constant 0 : i32
    %c0_i32_2 = arith.constant 0 : i32
    return %arg0, %c0_i32, %c0_i32_0, %c0_i32_1 : i32, i32, i32, i32
  }
  func.func @transform_1(%arg0: i32) -> (i32, i32, i32) {
    %c0_i32 = arith.constant 0 : i32
    %c0_i32_0 = arith.constant 0 : i32
    %c0_i32_1 = arith.constant 0 : i32
    %c0_i32_2 = arith.constant 0 : i32
    return %c0_i32, %c0_i32_0, %c0_i32_1 : i32, i32, i32
  }
  func.func @transform_2(%arg0: i32) -> (i32, i32) {
    %c0_i32 = arith.constant 0 : i32
    %c0_i32_0 = arith.constant 0 : i32
    %c0_i32_1 = arith.constant 0 : i32
    return %c0_i32, %c0_i32_0 : i32, i32
  }
  func.func @transform_3(%arg0: i32) -> (i32, i32, i32, i32) {
    %c0_i32 = arith.constant 0 : i32
    %c0_i32_0 = arith.constant 0 : i32
    %c0_i32_1 = arith.constant 0 : i32
    %c0_i32_2 = arith.constant 0 : i32
    return %arg0, %c0_i32, %c0_i32_0, %c0_i32_1 : i32, i32, i32, i32
  }
  func.func @transform_4(%arg0: i32) -> (i32, i32, i32) {
    %c0_i32 = arith.constant 0 : i32
    %c0_i32_0 = arith.constant 0 : i32
    %c0_i32_1 = arith.constant 0 : i32
    return %arg0, %c0_i32, %c0_i32_0 : i32, i32, i32
  }
}

module attributes {stable_mosaic.version = 11 : i64} {
  func.func @_conv_kernel(%arg0: i32, %arg1: memref<1x1x12x128xbf16, #tpu.memory_space<vmem>>, %arg2: memref<5x128x128xbf16, #tpu.memory_space<vmem>>, %arg3: memref<1x128xf32, #tpu.memory_space<vmem>>, %arg4: memref<1x8x128xbf16, #tpu.memory_space<vmem>>) attributes {dimension_semantics = [#tpu.dimension_semantics<parallel>], iteration_bounds = array<i64: 2>, scalar_prefetch = 0 : i64, scratch_operands = 0 : i64, tpu.core_type = #tpu.core_type<tc>, window_params = [{transform_indices = @transform_0, window_bounds = array<i64: 1, 1, 12, 128>}, {pipeline_mode = #tpu.pipeline_mode<synchronous>, transform_indices = @transform_1, window_bounds = array<i64: 5, 128, 128>}, {pipeline_mode = #tpu.pipeline_mode<synchronous>, transform_indices = @transform_2, window_bounds = array<i64: 1, 128>}, {transform_indices = @transform_3, window_bounds = array<i64: 1, 8, 128>}]} {
    %cst = arith.constant 0.000000e+00 : f32
    %0 = vector.broadcast %cst : f32 to vector<8x128xf32>
    %c0 = arith.constant 0 : index
    %c0_0 = arith.constant 0 : index
    %c0_1 = arith.constant 0 : index
    %c0_2 = arith.constant 0 : index
    %1 = vector.load %arg1[%c0, %c0_0, %c0_1, %c0_2] : memref<1x1x12x128xbf16, #tpu.memory_space<vmem>>, vector<1x1x8x128xbf16>
    %2 = vector.shape_cast %1 : vector<1x1x8x128xbf16> to vector<8x128xbf16>
    %c0_3 = arith.constant 0 : index
    %c0_4 = arith.constant 0 : index
    %c0_5 = arith.constant 0 : index
    %3 = vector.load %arg2[%c0_3, %c0_4, %c0_5] : memref<5x128x128xbf16, #tpu.memory_space<vmem>>, vector<1x128x128xbf16>
    %4 = vector.shape_cast %3 : vector<1x128x128xbf16> to vector<128x128xbf16>
    %cst_6 = arith.constant dense<0.000000e+00> : vector<8x128xf32>
    %5 = tpu.matmul %2, %4, %cst_6 {dimension_numbers = #tpu.dot_dimension_numbers<[1], [0], [0], [1], [0, 0, 1, 1], [], []>} : vector<8x128xbf16>, vector<128x128xbf16>, vector<8x128xf32> -> vector<8x128xf32>
    %6 = arith.addf %0, %5 : vector<8x128xf32>
    %c0_7 = arith.constant 0 : index
    %c0_8 = arith.constant 0 : index
    %c1 = arith.constant 1 : index
    %c0_9 = arith.constant 0 : index
    %7 = vector.load %arg1[%c0_7, %c0_8, %c1, %c0_9] : memref<1x1x12x128xbf16, #tpu.memory_space<vmem>>, vector<1x1x8x128xbf16>
    %8 = vector.shape_cast %7 : vector<1x1x8x128xbf16> to vector<8x128xbf16>
    %c1_10 = arith.constant 1 : index
    %c0_11 = arith.constant 0 : index
    %c0_12 = arith.constant 0 : index
    %9 = vector.load %arg2[%c1_10, %c0_11, %c0_12] : memref<5x128x128xbf16, #tpu.memory_space<vmem>>, vector<1x128x128xbf16>
    %10 = vector.shape_cast %9 : vector<1x128x128xbf16> to vector<128x128xbf16>
    %cst_13 = arith.constant dense<0.000000e+00> : vector<8x128xf32>
    %11 = tpu.matmul %8, %10, %cst_13 {dimension_numbers = #tpu.dot_dimension_numbers<[1], [0], [0], [1], [0, 0, 1, 1], [], []>} : vector<8x128xbf16>, vector<128x128xbf16>, vector<8x128xf32> -> vector<8x128xf32>
    %12 = arith.addf %6, %11 : vector<8x128xf32>
    %c0_14 = arith.constant 0 : index
    %c0_15 = arith.constant 0 : index
    %c2 = arith.constant 2 : index
    %c0_16 = arith.constant 0 : index
    %13 = vector.load %arg1[%c0_14, %c0_15, %c2, %c0_16] : memref<1x1x12x128xbf16, #tpu.memory_space<vmem>>, vector<1x1x8x128xbf16>
    %14 = vector.shape_cast %13 : vector<1x1x8x128xbf16> to vector<8x128xbf16>
    %c2_17 = arith.constant 2 : index
    %c0_18 = arith.constant 0 : index
    %c0_19 = arith.constant 0 : index
    %15 = vector.load %arg2[%c2_17, %c0_18, %c0_19] : memref<5x128x128xbf16, #tpu.memory_space<vmem>>, vector<1x128x128xbf16>
    %16 = vector.shape_cast %15 : vector<1x128x128xbf16> to vector<128x128xbf16>
    %cst_20 = arith.constant dense<0.000000e+00> : vector<8x128xf32>
    %17 = tpu.matmul %14, %16, %cst_20 {dimension_numbers = #tpu.dot_dimension_numbers<[1], [0], [0], [1], [0, 0, 1, 1], [], []>} : vector<8x128xbf16>, vector<128x128xbf16>, vector<8x128xf32> -> vector<8x128xf32>
    %18 = arith.addf %12, %17 : vector<8x128xf32>
    %c0_21 = arith.constant 0 : index
    %c0_22 = arith.constant 0 : index
    %c3 = arith.constant 3 : index
    %c0_23 = arith.constant 0 : index
    %19 = vector.load %arg1[%c0_21, %c0_22, %c3, %c0_23] : memref<1x1x12x128xbf16, #tpu.memory_space<vmem>>, vector<1x1x8x128xbf16>
    %20 = vector.shape_cast %19 : vector<1x1x8x128xbf16> to vector<8x128xbf16>
    %c3_24 = arith.constant 3 : index
    %c0_25 = arith.constant 0 : index
    %c0_26 = arith.constant 0 : index
    %21 = vector.load %arg2[%c3_24, %c0_25, %c0_26] : memref<5x128x128xbf16, #tpu.memory_space<vmem>>, vector<1x128x128xbf16>
    %22 = vector.shape_cast %21 : vector<1x128x128xbf16> to vector<128x128xbf16>
    %cst_27 = arith.constant dense<0.000000e+00> : vector<8x128xf32>
    %23 = tpu.matmul %20, %22, %cst_27 {dimension_numbers = #tpu.dot_dimension_numbers<[1], [0], [0], [1], [0, 0, 1, 1], [], []>} : vector<8x128xbf16>, vector<128x128xbf16>, vector<8x128xf32> -> vector<8x128xf32>
    %24 = arith.addf %18, %23 : vector<8x128xf32>
    %c0_28 = arith.constant 0 : index
    %c0_29 = arith.constant 0 : index
    %c4 = arith.constant 4 : index
    %c0_30 = arith.constant 0 : index
    %25 = vector.load %arg1[%c0_28, %c0_29, %c4, %c0_30] : memref<1x1x12x128xbf16, #tpu.memory_space<vmem>>, vector<1x1x8x128xbf16>
    %26 = vector.shape_cast %25 : vector<1x1x8x128xbf16> to vector<8x128xbf16>
    %c4_31 = arith.constant 4 : index
    %c0_32 = arith.constant 0 : index
    %c0_33 = arith.constant 0 : index
    %27 = vector.load %arg2[%c4_31, %c0_32, %c0_33] : memref<5x128x128xbf16, #tpu.memory_space<vmem>>, vector<1x128x128xbf16>
    %28 = vector.shape_cast %27 : vector<1x128x128xbf16> to vector<128x128xbf16>
    %cst_34 = arith.constant dense<0.000000e+00> : vector<8x128xf32>
    %29 = tpu.matmul %26, %28, %cst_34 {dimension_numbers = #tpu.dot_dimension_numbers<[1], [0], [0], [1], [0, 0, 1, 1], [], []>} : vector<8x128xbf16>, vector<128x128xbf16>, vector<8x128xf32> -> vector<8x128xf32>
    %30 = arith.addf %24, %29 : vector<8x128xf32>
    %c0_35 = arith.constant 0 : index
    %c0_36 = arith.constant 0 : index
    %31 = vector.load %arg3[%c0_35, %c0_36] : memref<1x128xf32, #tpu.memory_space<vmem>>, vector<1x128xf32>
    %32 = vector.broadcast %31 : vector<1x128xf32> to vector<8x128xf32>
    %33 = arith.addf %30, %32 : vector<8x128xf32>
    %cst_37 = arith.constant 0.000000e+00 : f32
    %34 = vector.broadcast %cst_37 : f32 to vector<8x128xf32>
    %35 = arith.maximumf %33, %34 : vector<8x128xf32>
    %36 = arith.truncf %35 : vector<8x128xf32> to vector<8x128xbf16>
    %c0_38 = arith.constant 0 : index
    %c0_39 = arith.constant 0 : index
    %c0_40 = arith.constant 0 : index
    %37 = vector.load %arg4[%c0_38, %c0_39, %c0_40] : memref<1x8x128xbf16, #tpu.memory_space<vmem>>, vector<1x8x128xbf16>
    %38 = vector.shape_cast %37 : vector<1x8x128xbf16> to vector<8x128xbf16>
    %39 = vector.shape_cast %36 : vector<8x128xbf16> to vector<1x8x128xbf16>
    tpu.vector_store %arg4[%c0_38, %c0_39, %c0_40], %39 {strides = array<i32>} : memref<1x8x128xbf16, #tpu.memory_space<vmem>>, vector<1x8x128xbf16>,
    return
  }
  func.func @transform_0(%arg0: i32) -> (i32, i32, i32, i32) {
    %c0_i32 = arith.constant 0 : i32
    %c0_i32_0 = arith.constant 0 : i32
    %c0_i32_1 = arith.constant 0 : i32
    %c0_i32_2 = arith.constant 0 : i32
    return %arg0, %c0_i32, %c0_i32_0, %c0_i32_1 : i32, i32, i32, i32
  }
  func.func @transform_1(%arg0: i32) -> (i32, i32, i32) {
    %c0_i32 = arith.constant 0 : i32
    %c0_i32_0 = arith.constant 0 : i32
    %c0_i32_1 = arith.constant 0 : i32
    %c0_i32_2 = arith.constant 0 : i32
    return %c0_i32, %c0_i32_0, %c0_i32_1 : i32, i32, i32
  }
  func.func @transform_2(%arg0: i32) -> (i32, i32) {
    %c0_i32 = arith.constant 0 : i32
    %c0_i32_0 = arith.constant 0 : i32
    %c0_i32_1 = arith.constant 0 : i32
    return %c0_i32, %c0_i32_0 : i32, i32
  }
  func.func @transform_3(%arg0: i32) -> (i32, i32, i32) {
    %c0_i32 = arith.constant 0 : i32
    %c0_i32_0 = arith.constant 0 : i32
    %c0_i32_1 = arith.constant 0 : i32
    return %arg0, %c0_i32, %c0_i32_0 : i32, i32, i32
  }
}

module attributes {stable_mosaic.version = 11 : i64} {
  func.func @_conv_kernel(%arg0: i32, %arg1: memref<1x2x6x128xbf16, #tpu.memory_space<vmem>>, %arg2: memref<5x128x128xbf16, #tpu.memory_space<vmem>>, %arg3: memref<1x128xf32, #tpu.memory_space<vmem>>, %arg4: memref<1x4x2x128xbf16, #tpu.memory_space<vmem>>, %arg5: memref<1x4x128xbf16, #tpu.memory_space<vmem>>) attributes {dimension_semantics = [#tpu.dimension_semantics<parallel>], iteration_bounds = array<i64: 2>, scalar_prefetch = 0 : i64, scratch_operands = 0 : i64, tpu.core_type = #tpu.core_type<tc>, window_params = [{transform_indices = @transform_0, window_bounds = array<i64: 1, 2, 6, 128>}, {pipeline_mode = #tpu.pipeline_mode<synchronous>, transform_indices = @transform_1, window_bounds = array<i64: 5, 128, 128>}, {pipeline_mode = #tpu.pipeline_mode<synchronous>, transform_indices = @transform_2, window_bounds = array<i64: 1, 128>}, {transform_indices = @transform_3, window_bounds = array<i64: 1, 4, 2, 128>}, {transform_indices = @transform_4, window_bounds = array<i64: 1, 4, 128>}]} {
    %cst = arith.constant 0.000000e+00 : f32
    %0 = vector.broadcast %cst : f32 to vector<4x128xf32>
    %c0 = arith.constant 0 : index
    %c0_0 = arith.constant 0 : index
    %c0_1 = arith.constant 0 : index
    %c0_2 = arith.constant 0 : index
    %1 = vector.load %arg1[%c0, %c0_0, %c0_1, %c0_2] : memref<1x2x6x128xbf16, #tpu.memory_space<vmem>>, vector<1x1x4x128xbf16>
    %2 = vector.shape_cast %1 : vector<1x1x4x128xbf16> to vector<4x128xbf16>
    %c0_3 = arith.constant 0 : index
    %c0_4 = arith.constant 0 : index
    %c0_5 = arith.constant 0 : index
    %3 = vector.load %arg2[%c0_3, %c0_4, %c0_5] : memref<5x128x128xbf16, #tpu.memory_space<vmem>>, vector<1x128x128xbf16>
    %4 = vector.shape_cast %3 : vector<1x128x128xbf16> to vector<128x128xbf16>
    %cst_6 = arith.constant dense<0.000000e+00> : vector<4x128xf32>
    %5 = tpu.matmul %2, %4, %cst_6 {dimension_numbers = #tpu.dot_dimension_numbers<[1], [0], [0], [1], [0, 0, 1, 1], [], []>} : vector<4x128xbf16>, vector<128x128xbf16>, vector<4x128xf32> -> vector<4x128xf32>
    %6 = arith.addf %0, %5 : vector<4x128xf32>
    %c0_7 = arith.constant 0 : index
    %c1 = arith.constant 1 : index
    %c0_8 = arith.constant 0 : index
    %c0_9 = arith.constant 0 : index
    %7 = vector.load %arg1[%c0_7, %c1, %c0_8, %c0_9] : memref<1x2x6x128xbf16, #tpu.memory_space<vmem>>, vector<1x1x4x128xbf16>
    %8 = vector.shape_cast %7 : vector<1x1x4x128xbf16> to vector<4x128xbf16>
    %c1_10 = arith.constant 1 : index
    %c0_11 = arith.constant 0 : index
    %c0_12 = arith.constant 0 : index
    %9 = vector.load %arg2[%c1_10, %c0_11, %c0_12] : memref<5x128x128xbf16, #tpu.memory_space<vmem>>, vector<1x128x128xbf16>
    %10 = vector.shape_cast %9 : vector<1x128x128xbf16> to vector<128x128xbf16>
    %cst_13 = arith.constant dense<0.000000e+00> : vector<4x128xf32>
    %11 = tpu.matmul %8, %10, %cst_13 {dimension_numbers = #tpu.dot_dimension_numbers<[1], [0], [0], [1], [0, 0, 1, 1], [], []>} : vector<4x128xbf16>, vector<128x128xbf16>, vector<4x128xf32> -> vector<4x128xf32>
    %12 = arith.addf %6, %11 : vector<4x128xf32>
    %c0_14 = arith.constant 0 : index
    %c0_15 = arith.constant 0 : index
    %c1_16 = arith.constant 1 : index
    %c0_17 = arith.constant 0 : index
    %13 = vector.load %arg1[%c0_14, %c0_15, %c1_16, %c0_17] : memref<1x2x6x128xbf16, #tpu.memory_space<vmem>>, vector<1x1x4x128xbf16>
    %14 = vector.shape_cast %13 : vector<1x1x4x128xbf16> to vector<4x128xbf16>
    %c2 = arith.constant 2 : index
    %c0_18 = arith.constant 0 : index
    %c0_19 = arith.constant 0 : index
    %15 = vector.load %arg2[%c2, %c0_18, %c0_19] : memref<5x128x128xbf16, #tpu.memory_space<vmem>>, vector<1x128x128xbf16>
    %16 = vector.shape_cast %15 : vector<1x128x128xbf16> to vector<128x128xbf16>
    %cst_20 = arith.constant dense<0.000000e+00> : vector<4x128xf32>
    %17 = tpu.matmul %14, %16, %cst_20 {dimension_numbers = #tpu.dot_dimension_numbers<[1], [0], [0], [1], [0, 0, 1, 1], [], []>} : vector<4x128xbf16>, vector<128x128xbf16>, vector<4x128xf32> -> vector<4x128xf32>
    %18 = arith.addf %12, %17 : vector<4x128xf32>
    %c0_21 = arith.constant 0 : index
    %c1_22 = arith.constant 1 : index
    %c1_23 = arith.constant 1 : index
    %c0_24 = arith.constant 0 : index
    %19 = vector.load %arg1[%c0_21, %c1_22, %c1_23, %c0_24] : memref<1x2x6x128xbf16, #tpu.memory_space<vmem>>, vector<1x1x4x128xbf16>
    %20 = vector.shape_cast %19 : vector<1x1x4x128xbf16> to vector<4x128xbf16>
    %c3 = arith.constant 3 : index
    %c0_25 = arith.constant 0 : index
    %c0_26 = arith.constant 0 : index
    %21 = vector.load %arg2[%c3, %c0_25, %c0_26] : memref<5x128x128xbf16, #tpu.memory_space<vmem>>, vector<1x128x128xbf16>
    %22 = vector.shape_cast %21 : vector<1x128x128xbf16> to vector<128x128xbf16>
    %cst_27 = arith.constant dense<0.000000e+00> : vector<4x128xf32>
    %23 = tpu.matmul %20, %22, %cst_27 {dimension_numbers = #tpu.dot_dimension_numbers<[1], [0], [0], [1], [0, 0, 1, 1], [], []>} : vector<4x128xbf16>, vector<128x128xbf16>, vector<4x128xf32> -> vector<4x128xf32>
    %24 = arith.addf %18, %23 : vector<4x128xf32>
    %c0_28 = arith.constant 0 : index
    %c0_29 = arith.constant 0 : index
    %c2_30 = arith.constant 2 : index
    %c0_31 = arith.constant 0 : index
    %25 = vector.load %arg1[%c0_28, %c0_29, %c2_30, %c0_31] : memref<1x2x6x128xbf16, #tpu.memory_space<vmem>>, vector<1x1x4x128xbf16>
    %26 = vector.shape_cast %25 : vector<1x1x4x128xbf16> to vector<4x128xbf16>
    %c4 = arith.constant 4 : index
    %c0_32 = arith.constant 0 : index
    %c0_33 = arith.constant 0 : index
    %27 = vector.load %arg2[%c4, %c0_32, %c0_33] : memref<5x128x128xbf16, #tpu.memory_space<vmem>>, vector<1x128x128xbf16>
    %28 = vector.shape_cast %27 : vector<1x128x128xbf16> to vector<128x128xbf16>
    %cst_34 = arith.constant dense<0.000000e+00> : vector<4x128xf32>
    %29 = tpu.matmul %26, %28, %cst_34 {dimension_numbers = #tpu.dot_dimension_numbers<[1], [0], [0], [1], [0, 0, 1, 1], [], []>} : vector<4x128xbf16>, vector<128x128xbf16>, vector<4x128xf32> -> vector<4x128xf32>
    %30 = arith.addf %24, %29 : vector<4x128xf32>
    %c0_35 = arith.constant 0 : index
    %c0_36 = arith.constant 0 : index
    %31 = vector.load %arg3[%c0_35, %c0_36] : memref<1x128xf32, #tpu.memory_space<vmem>>, vector<1x128xf32>
    %32 = vector.broadcast %31 : vector<1x128xf32> to vector<4x128xf32>
    %33 = arith.addf %30, %32 : vector<4x128xf32>
    %cst_37 = arith.constant 0.000000e+00 : f32
    %34 = vector.broadcast %cst_37 : f32 to vector<4x128xf32>
    %35 = arith.maximumf %33, %34 : vector<4x128xf32>
    %c0_38 = arith.constant 0 : index
    %c0_39 = arith.constant 0 : index
    %c0_40 = arith.constant 0 : index
    %c0_41 = arith.constant 0 : index
    %36 = vector.load %arg4[%c0_38, %c0_39, %c0_40, %c0_41] : memref<1x4x2x128xbf16, #tpu.memory_space<vmem>>, vector<1x4x2x128xbf16>
    %37 = vector.shape_cast %36 : vector<1x4x2x128xbf16> to vector<4x2x128xbf16>
    %38 = arith.extf %37 : vector<4x2x128xbf16> to vector<4x2x128xf32>
    %cst_42 = arith.constant dense<0.000000e+00> : vector<4x128xf32>
    %39 = vector.multi_reduction <add>, %38, %cst_42 [1] : vector<4x2x128xf32> to vector<4x128xf32>
    %cst_43 = arith.constant 2.000000e+00 : f32
    %40 = vector.broadcast %cst_43 : f32 to vector<4x128xf32>
    %41 = arith.divf %39, %40 : vector<4x128xf32>
    %42 = arith.addf %35, %41 : vector<4x128xf32>
    %43 = arith.truncf %42 : vector<4x128xf32> to vector<4x128xbf16>
    %c0_44 = arith.constant 0 : index
    %c0_45 = arith.constant 0 : index
    %c0_46 = arith.constant 0 : index
    %44 = vector.load %arg5[%c0_44, %c0_45, %c0_46] : memref<1x4x128xbf16, #tpu.memory_space<vmem>>, vector<1x4x128xbf16>
    %45 = vector.shape_cast %44 : vector<1x4x128xbf16> to vector<4x128xbf16>
    %46 = vector.shape_cast %43 : vector<4x128xbf16> to vector<1x4x128xbf16>
    tpu.vector_store %arg5[%c0_44, %c0_45, %c0_46], %46 {strides = array<i32>} : memref<1x4x128xbf16, #tpu.memory_space<vmem>>, vector<1x4x128xbf16>,
    return
  }
  func.func @transform_0(%arg0: i32) -> (i32, i32, i32, i32) {
    %c0_i32 = arith.constant 0 : i32
    %c0_i32_0 = arith.constant 0 : i32
    %c0_i32_1 = arith.constant 0 : i32
    %c0_i32_2 = arith.constant 0 : i32
    return %arg0, %c0_i32, %c0_i32_0, %c0_i32_1 : i32, i32, i32, i32
  }
  func.func @transform_1(%arg0: i32) -> (i32, i32, i32) {
    %c0_i32 = arith.constant 0 : i32
    %c0_i32_0 = arith.constant 0 : i32
    %c0_i32_1 = arith.constant 0 : i32
    %c0_i32_2 = arith.constant 0 : i32
    return %c0_i32, %c0_i32_0, %c0_i32_1 : i32, i32, i32
  }
  func.func @transform_2(%arg0: i32) -> (i32, i32) {
    %c0_i32 = arith.constant 0 : i32
    %c0_i32_0 = arith.constant 0 : i32
    %c0_i32_1 = arith.constant 0 : i32
    return %c0_i32, %c0_i32_0 : i32, i32
  }
  func.func @transform_3(%arg0: i32) -> (i32, i32, i32, i32) {
    %c0_i32 = arith.constant 0 : i32
    %c0_i32_0 = arith.constant 0 : i32
    %c0_i32_1 = arith.constant 0 : i32
    %c0_i32_2 = arith.constant 0 : i32
    return %arg0, %c0_i32, %c0_i32_0, %c0_i32_1 : i32, i32, i32, i32
  }
  func.func @transform_4(%arg0: i32) -> (i32, i32, i32) {
    %c0_i32 = arith.constant 0 : i32
    %c0_i32_0 = arith.constant 0 : i32
    %c0_i32_1 = arith.constant 0 : i32
    return %arg0, %c0_i32, %c0_i32_0 : i32, i32, i32
  }
}

module attributes {stable_mosaic.version = 11 : i64} {
  func.func @_tail_kernel(%arg0: i32, %arg1: memref<8x4x128xbf16, #tpu.memory_space<vmem>>, %arg2: memref<3x128x128xbf16, #tpu.memory_space<vmem>>, %arg3: memref<3x1x128xf32, #tpu.memory_space<vmem>>, %arg4: memref<3x128x128xbf16, #tpu.memory_space<vmem>>, %arg5: memref<3x1x128xf32, #tpu.memory_space<vmem>>, %arg6: memref<128x128xbf16, #tpu.memory_space<vmem>>, %arg7: memref<1x128xf32, #tpu.memory_space<vmem>>, %arg8: memref<8x128xf32, #tpu.memory_space<vmem>>) attributes {dimension_semantics = [#tpu.dimension_semantics<arbitrary>], iteration_bounds = array<i64: 1>, scalar_prefetch = 0 : i64, scratch_operands = 0 : i64, tpu.core_type = #tpu.core_type<tc>, window_params = [{pipeline_mode = #tpu.pipeline_mode<synchronous>, transform_indices = @transform_0, window_bounds = array<i64: 8, 4, 128>}, {pipeline_mode = #tpu.pipeline_mode<synchronous>, transform_indices = @transform_1, window_bounds = array<i64: 3, 128, 128>}, {pipeline_mode = #tpu.pipeline_mode<synchronous>, transform_indices = @transform_2, window_bounds = array<i64: 3, 1, 128>}, {pipeline_mode = #tpu.pipeline_mode<synchronous>, transform_indices = @transform_3, window_bounds = array<i64: 3, 128, 128>}, {pipeline_mode = #tpu.pipeline_mode<synchronous>, transform_indices = @transform_4, window_bounds = array<i64: 3, 1, 128>}, {pipeline_mode = #tpu.pipeline_mode<synchronous>, transform_indices = @transform_5, window_bounds = array<i64: 128, 128>}, {pipeline_mode = #tpu.pipeline_mode<synchronous>, transform_indices = @transform_6, window_bounds = array<i64: 1, 128>}, {pipeline_mode = #tpu.pipeline_mode<synchronous>, transform_indices = @transform_7, window_bounds = array<i64: 8, 128>}]} {
    %c0 = arith.constant 0 : index
    %c0_0 = arith.constant 0 : index
    %c0_1 = arith.constant 0 : index
    %0 = vector.load %arg1[%c0, %c0_0, %c0_1] : memref<8x4x128xbf16, #tpu.memory_space<vmem>>, vector<8x4x128xbf16>
    %1 = arith.extf %0 : vector<8x4x128xbf16> to vector<8x4x128xf32>
    %cst = arith.constant dense<0.000000e+00> : vector<8x128xf32>
    %2 = vector.multi_reduction <add>, %1, %cst [1] : vector<8x4x128xf32> to vector<8x128xf32>
    %cst_2 = arith.constant 4.000000e+00 : f32
    %3 = vector.broadcast %cst_2 : f32 to vector<8x128xf32>
    %4 = arith.divf %2, %3 : vector<8x128xf32>
    %5 = arith.truncf %4 : vector<8x128xf32> to vector<8x128xbf16>
    %c0_3 = arith.constant 0 : index
    %c0_4 = arith.constant 0 : index
    %c0_5 = arith.constant 0 : index
    %6 = vector.load %arg2[%c0_3, %c0_4, %c0_5] : memref<3x128x128xbf16, #tpu.memory_space<vmem>>, vector<1x128x128xbf16>
    %7 = vector.shape_cast %6 : vector<1x128x128xbf16> to vector<128x128xbf16>
    %cst_6 = arith.constant dense<0.000000e+00> : vector<8x128xf32>
    %8 = tpu.matmul %5, %7, %cst_6 {dimension_numbers = #tpu.dot_dimension_numbers<[1], [0], [0], [1], [0, 0, 1, 1], [], []>} : vector<8x128xbf16>, vector<128x128xbf16>, vector<8x128xf32> -> vector<8x128xf32>
    %c0_7 = arith.constant 0 : index
    %c0_8 = arith.constant 0 : index
    %c0_9 = arith.constant 0 : index
    %9 = vector.load %arg3[%c0_7, %c0_8, %c0_9] : memref<3x1x128xf32, #tpu.memory_space<vmem>>, vector<1x1x128xf32>
    %10 = vector.shape_cast %9 : vector<1x1x128xf32> to vector<1x128xf32>
    %11 = vector.broadcast %10 : vector<1x128xf32> to vector<8x128xf32>
    %12 = arith.addf %8, %11 : vector<8x128xf32>
    %cst_10 = arith.constant 0.000000e+00 : f32
    %13 = vector.broadcast %cst_10 : f32 to vector<8x128xf32>
    %14 = arith.maximumf %12, %13 : vector<8x128xf32>
    %15 = arith.truncf %14 : vector<8x128xf32> to vector<8x128xbf16>
    %c0_11 = arith.constant 0 : index
    %c0_12 = arith.constant 0 : index
    %c0_13 = arith.constant 0 : index
    %16 = vector.load %arg4[%c0_11, %c0_12, %c0_13] : memref<3x128x128xbf16, #tpu.memory_space<vmem>>, vector<1x128x128xbf16>
    %17 = vector.shape_cast %16 : vector<1x128x128xbf16> to vector<128x128xbf16>
    %cst_14 = arith.constant dense<0.000000e+00> : vector<8x128xf32>
    %18 = tpu.matmul %15, %17, %cst_14 {dimension_numbers = #tpu.dot_dimension_numbers<[1], [0], [0], [1], [0, 0, 1, 1], [], []>} : vector<8x128xbf16>, vector<128x128xbf16>, vector<8x128xf32> -> vector<8x128xf32>
    %c0_15 = arith.constant 0 : index
    %c0_16 = arith.constant 0 : index
    %c0_17 = arith.constant 0 : index
    %19 = vector.load %arg5[%c0_15, %c0_16, %c0_17] : memref<3x1x128xf32, #tpu.memory_space<vmem>>, vector<1x1x128xf32>
    %20 = vector.shape_cast %19 : vector<1x1x128xf32> to vector<1x128xf32>
    %21 = vector.broadcast %20 : vector<1x128xf32> to vector<8x128xf32>
    %22 = arith.addf %18, %21 : vector<8x128xf32>
    %cst_18 = arith.constant 0.000000e+00 : f32
    %23 = vector.broadcast %cst_18 : f32 to vector<8x128xf32>
    %24 = arith.maximumf %22, %23 : vector<8x128xf32>
    %25 = arith.addf %24, %4 : vector<8x128xf32>
    %26 = arith.truncf %25 : vector<8x128xf32> to vector<8x128xbf16>
    %c1 = arith.constant 1 : index
    %c0_19 = arith.constant 0 : index
    %c0_20 = arith.constant 0 : index
    %27 = vector.load %arg2[%c1, %c0_19, %c0_20] : memref<3x128x128xbf16, #tpu.memory_space<vmem>>, vector<1x128x128xbf16>
    %28 = vector.shape_cast %27 : vector<1x128x128xbf16> to vector<128x128xbf16>
    %cst_21 = arith.constant dense<0.000000e+00> : vector<8x128xf32>
    %29 = tpu.matmul %26, %28, %cst_21 {dimension_numbers = #tpu.dot_dimension_numbers<[1], [0], [0], [1], [0, 0, 1, 1], [], []>} : vector<8x128xbf16>, vector<128x128xbf16>, vector<8x128xf32> -> vector<8x128xf32>
    %c1_22 = arith.constant 1 : index
    %c0_23 = arith.constant 0 : index
    %c0_24 = arith.constant 0 : index
    %30 = vector.load %arg3[%c1_22, %c0_23, %c0_24] : memref<3x1x128xf32, #tpu.memory_space<vmem>>, vector<1x1x128xf32>
    %31 = vector.shape_cast %30 : vector<1x1x128xf32> to vector<1x128xf32>
    %32 = vector.broadcast %31 : vector<1x128xf32> to vector<8x128xf32>
    %33 = arith.addf %29, %32 : vector<8x128xf32>
    %cst_25 = arith.constant 0.000000e+00 : f32
    %34 = vector.broadcast %cst_25 : f32 to vector<8x128xf32>
    %35 = arith.maximumf %33, %34 : vector<8x128xf32>
    %36 = arith.truncf %35 : vector<8x128xf32> to vector<8x128xbf16>
    %c1_26 = arith.constant 1 : index
    %c0_27 = arith.constant 0 : index
    %c0_28 = arith.constant 0 : index
    %37 = vector.load %arg4[%c1_26, %c0_27, %c0_28] : memref<3x128x128xbf16, #tpu.memory_space<vmem>>, vector<1x128x128xbf16>
    %38 = vector.shape_cast %37 : vector<1x128x128xbf16> to vector<128x128xbf16>
    %cst_29 = arith.constant dense<0.000000e+00> : vector<8x128xf32>
    %39 = tpu.matmul %36, %38, %cst_29 {dimension_numbers = #tpu.dot_dimension_numbers<[1], [0], [0], [1], [0, 0, 1, 1], [], []>} : vector<8x128xbf16>, vector<128x128xbf16>, vector<8x128xf32> -> vector<8x128xf32>
    %c1_30 = arith.constant 1 : index
    %c0_31 = arith.constant 0 : index
    %c0_32 = arith.constant 0 : index
    %40 = vector.load %arg5[%c1_30, %c0_31, %c0_32] : memref<3x1x128xf32, #tpu.memory_space<vmem>>, vector<1x1x128xf32>
    %41 = vector.shape_cast %40 : vector<1x1x128xf32> to vector<1x128xf32>
    %42 = vector.broadcast %41 : vector<1x128xf32> to vector<8x128xf32>
    %43 = arith.addf %39, %42 : vector<8x128xf32>
    %cst_33 = arith.constant 0.000000e+00 : f32
    %44 = vector.broadcast %cst_33 : f32 to vector<8x128xf32>
    %45 = arith.maximumf %43, %44 : vector<8x128xf32>
    %46 = arith.addf %45, %25 : vector<8x128xf32>
    %47 = arith.truncf %46 : vector<8x128xf32> to vector<8x128xbf16>
    %c2 = arith.constant 2 : index
    %c0_34 = arith.constant 0 : index
    %c0_35 = arith.constant 0 : index
    %48 = vector.load %arg2[%c2, %c0_34, %c0_35] : memref<3x128x128xbf16, #tpu.memory_space<vmem>>, vector<1x128x128xbf16>
    %49 = vector.shape_cast %48 : vector<1x128x128xbf16> to vector<128x128xbf16>
    %cst_36 = arith.constant dense<0.000000e+00> : vector<8x128xf32>
    %50 = tpu.matmul %47, %49, %cst_36 {dimension_numbers = #tpu.dot_dimension_numbers<[1], [0], [0], [1], [0, 0, 1, 1], [], []>} : vector<8x128xbf16>, vector<128x128xbf16>, vector<8x128xf32> -> vector<8x128xf32>
    %c2_37 = arith.constant 2 : index
    %c0_38 = arith.constant 0 : index
    %c0_39 = arith.constant 0 : index
    %51 = vector.load %arg3[%c2_37, %c0_38, %c0_39] : memref<3x1x128xf32, #tpu.memory_space<vmem>>, vector<1x1x128xf32>
    %52 = vector.shape_cast %51 : vector<1x1x128xf32> to vector<1x128xf32>
    %53 = vector.broadcast %52 : vector<1x128xf32> to vector<8x128xf32>
    %54 = arith.addf %50, %53 : vector<8x128xf32>
    %cst_40 = arith.constant 0.000000e+00 : f32
    %55 = vector.broadcast %cst_40 : f32 to vector<8x128xf32>
    %56 = arith.maximumf %54, %55 : vector<8x128xf32>
    %57 = arith.truncf %56 : vector<8x128xf32> to vector<8x128xbf16>
    %c2_41 = arith.constant 2 : index
    %c0_42 = arith.constant 0 : index
    %c0_43 = arith.constant 0 : index
    %58 = vector.load %arg4[%c2_41, %c0_42, %c0_43] : memref<3x128x128xbf16, #tpu.memory_space<vmem>>, vector<1x128x128xbf16>
    %59 = vector.shape_cast %58 : vector<1x128x128xbf16> to vector<128x128xbf16>
    %cst_44 = arith.constant dense<0.000000e+00> : vector<8x128xf32>
    %60 = tpu.matmul %57, %59, %cst_44 {dimension_numbers = #tpu.dot_dimension_numbers<[1], [0], [0], [1], [0, 0, 1, 1], [], []>} : vector<8x128xbf16>, vector<128x128xbf16>, vector<8x128xf32> -> vector<8x128xf32>
    %c2_45 = arith.constant 2 : index
    %c0_46 = arith.constant 0 : index
    %c0_47 = arith.constant 0 : index
    %61 = vector.load %arg5[%c2_45, %c0_46, %c0_47] : memref<3x1x128xf32, #tpu.memory_space<vmem>>, vector<1x1x128xf32>
    %62 = vector.shape_cast %61 : vector<1x1x128xf32> to vector<1x128xf32>
    %63 = vector.broadcast %62 : vector<1x128xf32> to vector<8x128xf32>
    %64 = arith.addf %60, %63 : vector<8x128xf32>
    %cst_48 = arith.constant 0.000000e+00 : f32
    %65 = vector.broadcast %cst_48 : f32 to vector<8x128xf32>
    %66 = arith.maximumf %64, %65 : vector<8x128xf32>
    %67 = arith.addf %66, %46 : vector<8x128xf32>
    %68 = arith.truncf %67 : vector<8x128xf32> to vector<8x128xbf16>
    %c0_49 = arith.constant 0 : index
    %c0_50 = arith.constant 0 : index
    %69 = vector.load %arg6[%c0_49, %c0_50] : memref<128x128xbf16, #tpu.memory_space<vmem>>, vector<128x128xbf16>
    %cst_51 = arith.constant dense<0.000000e+00> : vector<8x128xf32>
    %70 = tpu.matmul %68, %69, %cst_51 {dimension_numbers = #tpu.dot_dimension_numbers<[1], [0], [0], [1], [0, 0, 1, 1], [], []>} : vector<8x128xbf16>, vector<128x128xbf16>, vector<8x128xf32> -> vector<8x128xf32>
    %c0_52 = arith.constant 0 : index
    %c0_53 = arith.constant 0 : index
    %71 = vector.load %arg7[%c0_52, %c0_53] : memref<1x128xf32, #tpu.memory_space<vmem>>, vector<1x128xf32>
    %72 = vector.broadcast %71 : vector<1x128xf32> to vector<8x128xf32>
    %73 = arith.addf %70, %72 : vector<8x128xf32>
    %c0_54 = arith.constant 0 : index
    %c0_55 = arith.constant 0 : index
    %74 = vector.load %arg8[%c0_54, %c0_55] : memref<8x128xf32, #tpu.memory_space<vmem>>, vector<8x128xf32>
    tpu.vector_store %arg8[%c0_54, %c0_55], %73 {strides = array<i32>} : memref<8x128xf32, #tpu.memory_space<vmem>>, vector<8x128xf32>,
    return
  }
  func.func @transform_0(%arg0: i32) -> (i32, i32, i32) {
    %c0_i32 = arith.constant 0 : i32
    %c0_i32_0 = arith.constant 0 : i32
    %c0_i32_1 = arith.constant 0 : i32
    %c0_i32_2 = arith.constant 0 : i32
    return %c0_i32, %c0_i32_0, %c0_i32_1 : i32, i32, i32
  }
  func.func @transform_1(%arg0: i32) -> (i32, i32, i32) {
    %c0_i32 = arith.constant 0 : i32
    %c0_i32_0 = arith.constant 0 : i32
    %c0_i32_1 = arith.constant 0 : i32
    %c0_i32_2 = arith.constant 0 : i32
    return %c0_i32, %c0_i32_0, %c0_i32_1 : i32, i32, i32
  }
  func.func @transform_2(%arg0: i32) -> (i32, i32, i32) {
    %c0_i32 = arith.constant 0 : i32
    %c0_i32_0 = arith.constant 0 : i32
    %c0_i32_1 = arith.constant 0 : i32
    %c0_i32_2 = arith.constant 0 : i32
    return %c0_i32, %c0_i32_0, %c0_i32_1 : i32, i32, i32
  }
  func.func @transform_3(%arg0: i32) -> (i32, i32, i32) {
    %c0_i32 = arith.constant 0 : i32
    %c0_i32_0 = arith.constant 0 : i32
    %c0_i32_1 = arith.constant 0 : i32
    %c0_i32_2 = arith.constant 0 : i32
    return %c0_i32, %c0_i32_0, %c0_i32_1 : i32, i32, i32
  }
  func.func @transform_4(%arg0: i32) -> (i32, i32, i32) {
    %c0_i32 = arith.constant 0 : i32
    %c0_i32_0 = arith.constant 0 : i32
    %c0_i32_1 = arith.constant 0 : i32
    %c0_i32_2 = arith.constant 0 : i32
    return %c0_i32, %c0_i32_0, %c0_i32_1 : i32, i32, i32
  }
  func.func @transform_5(%arg0: i32) -> (i32, i32) {
    %c0_i32 = arith.constant 0 : i32
    %c0_i32_0 = arith.constant 0 : i32
    %c0_i32_1 = arith.constant 0 : i32
    return %c0_i32, %c0_i32_0 : i32, i32
  }
  func.func @transform_6(%arg0: i32) -> (i32, i32) {
    %c0_i32 = arith.constant 0 : i32
    %c0_i32_0 = arith.constant 0 : i32
    %c0_i32_1 = arith.constant 0 : i32
    return %c0_i32, %c0_i32_0 : i32, i32
  }
  func.func @transform_7(%arg0: i32) -> (i32, i32) {
    %c0_i32 = arith.constant 0 : i32
    %c0_i32_0 = arith.constant 0 : i32
    %c0_i32_1 = arith.constant 0 : i32
    return %c0_i32, %c0_i32_0 : i32, i32
  }
}

</mosaic_0001>

<bundles_post_ra>
// kernel: speaker_encoder_forward.10
= control target key start
LH: loop header
LB: loop body
LE: loop exit
PB: predicated region body
PF: predicated region fallthrough
CT: control target
= control target key end

     0   :  { %s1426_s15 = smov 0   ;;  %s1694_s0 = inlined_call_operand.vmem [shape: bf16[2,1,20,128], index: 0, kind: input, shape index: {}]   ;;  %s1695_s1 = inlined_call_operand.vmem [shape: bf16[5,128,128], index: 1, kind: input, shape index: {}]   ;;  %s1696_s2 = inlined_call_operand.vmem [shape: f32[1,128], index: 2, kind: input, shape index: {}]   ;;  %s1697_s3 = inlined_call_operand.vmem [shape: bf16[2,16,1,128], index: 3, kind: input, shape index: {}]   ;;  %s1698_s4 = inlined_call_operand.vmem [shape: bf16[2,16,128], index: 4, kind: output, shape index: {}]  }
   0x1 LB: > { %s1059_s16 = sadd.s32 4294967295, %s1397_s15   ;;  %p1063_p0 = scmp.ge.s32.totalorder %s1397_s15, 1  ;;  %s1397_s15 = sphi %s1426_s15, %s14_s15  }
   0x2   : > { %p171_p1 = scmp.lt.s32.totalorder %s1397_s15, 3 }
   0x4   : > { %p172_p2 = pnand %p1063_p0, %p171_p1 }
   0x5   : > { %v1346_v0 = vld [vmem:[%s1695_s1 + $0x40] sm:$0xff] (!%p172_p2)   ;;  %v1399_v1 = vmov (!%p172_p2), 0.0   ;;  %v1348_v3 = vld [vmem:[%s1695_s1 + $0x48] sm:$0xff] (!%p172_p2)   ;;  %vm1400_vm0 = vmmov (!%p172_p2), 0   ;;  %p201_p3 = scmp.lt.s32.totalorder (!%p172_p2), %s1059_s16, 1  ;;  %v1350_v5 = vld [vmem:[%s1695_s1 + $0x50] sm:$0xff] (!%p172_p2)  }
   0x6   : > { %175 = sbr.rel (%p172_p2) target bundleno = 327 (0x147), region = 36  ;;  %1235 = vmatprep.subr.bf16.mxu0 (!%p172_p2), %v1399_v1  ;;  %1255 = vmatprep.subr.bf16.mxu1 (!%p172_p2), %v1399_v1  ;;  %v1347_v2 = vld [vmem:[%s1695_s1] sm:$0xff] (!%p172_p2)   ;;  %v1349_v4 = vld [vmem:[%s1695_s1 + $0x8] sm:$0xff] (!%p172_p2)   ;;  %v1351_v6 = vld [vmem:[%s1695_s1 + $0x10] sm:$0xff] (!%p172_p2)   ;;  %vm260_vm1 = vsmask.f32 (!%p172_p2), 7424 }
   0x7   : > { %1236 = vmatpush3.bf16.msra.mxu0 (!%p172_p2), %v1346_v0  ;;  %1251 = vmatprep.mubr.msk.bf16.mxu0 (!%p172_p2), %vm1400_vm0, %v1399_v1  ;;  %v1352_v7 = vld [vmem:[%s1695_s1 + $0x58] sm:$0xff] (!%p172_p2)   ;;  %v1354_v9 = vld [vmem:[%s1695_s1 + $0x60] sm:$0xff] (!%p172_p2)   ;;  %v1356_v13 = vld [vmem:[%s1695_s1 + $0x68] sm:$0xff] (!%p172_p2)   ;;  %vm474_vm2 = vcmask (!%p172_p2), 1046528   ;;  %vm591_vm3 = vsmask.f32 (!%p172_p2), 6400 }
   0x8   : > { %1256 = vmatpush3.bf16.msra.mxu1 (!%p172_p2), %v1347_v2  ;;  %1237 = vmatprep.subr.bf16.mxu0 (!%p172_p2), %v1399_v1  ;;  %v1353_v8 = vld [vmem:[%s1695_s1 + $0x18] sm:$0xff] (!%p172_p2)   ;;  %v1355_v10 = vld [vmem:[%s1695_s1 + $0x20] sm:$0xff] (!%p172_p2)   ;;  %v1357_v16 = vld [vmem:[%s1695_s1 + $0x28] sm:$0xff] (!%p172_p2)   ;;  %vm722_vm4 = vcmask (!%p172_p2), 1045504   ;;  %vm957_vm5 = vcmask (!%p172_p2), 1041409   ;;  %vm959_vm6 = vcmask (!%p172_p2), 1042434  }
   0x9   : > { %1257 = vmatprep.subr.bf16.mxu1 (!%p172_p2), %v1399_v1  ;;  %1271 = vmatprep.mubr.msk.bf16.mxu1 (!%p172_p2), %vm1400_vm0, %v1399_v1  ;;  %v1358_v18 = vld [vmem:[%s1695_s1 + $0x70] sm:$0xff] (!%p172_p2)   ;;  %v1360_v23 = vld [vmem:[%s1695_s1 + $0x78] sm:$0xff] (!%p172_p2)   ;;  %v1364_v28 = vld [vmem:[%s1695_s1 + $0x80] sm:$0xff] (!%p172_p2)   ;;  %vm961_vm7 = vcmask (!%p172_p2), 1043459   ;;  %vm963_vm8 = vcmask (!%p172_p2), 1044484   ;;  %vm965_vm9 = vcmask (!%p172_p2), 1045509  }
   0xa   : > { %v1359_v22 = vld [vmem:[%s1695_s1 + $0x30] sm:$0xff] (!%p172_p2)   ;;  %v1361_v24 = vld [vmem:[%s1695_s1 + $0x38] sm:$0xff] (!%p172_p2)   ;;  %v1365_v29 = vld [vmem:[%s1695_s1 + $0xc0] sm:$0xff] (!%p172_p2)   ;;  %vm967_vm10 = vcmask (!%p172_p2), 1046534   ;;  %vm969_vm11 = vcmask (!%p172_p2), 1047559  }
   0xb   : > { %1238 = vmatpush3.bf16.msra.mxu0 (!%p172_p2), %v1348_v3  ;;  %v1366_v30 = vld [vmem:[%s1695_s1 + $0x88] sm:$0xff] (!%p172_p2)   ;;  %v1368_v32 = vld [vmem:[%s1695_s1 + $0x90] sm:$0xff] (!%p172_p2)   ;;  %v1370_v34 = vld [vmem:[%s1695_s1 + $0x98] sm:$0xff] (!%p172_p2)  }
   0xc   : > { %1258 = vmatpush3.bf16.msra.mxu1 (!%p172_p2), %v1349_v4  ;;  %1239 = vmatprep.subr.bf16.mxu0 (!%p172_p2), %v1399_v1  ;;  %v1367_v31 = vld [vmem:[%s1695_s1 + $0xc8] sm:$0xff] (!%p172_p2)   ;;  %v1369_v33 = vld [vmem:[%s1695_s1 + $0xd0] sm:$0xff] (!%p172_p2)   ;;  %v1371_v35 = vld [vmem:[%s1695_s1 + $0xd8] sm:$0xff] (!%p172_p2)  }
   0xd   : > { %s1700_s16 = smov (!%p201_p3, %s1059_s16), 1  ;;  %1259 = vmatprep.subr.bf16.mxu1 %v1399_v1  ;;  %v1372_v39 = vld [vmem:[%s1695_s1 + $0xa0] sm:$0xff]   ;;  %v1374_v43 = vld [vmem:[%s1695_s1 + $0xa8] sm:$0xff]   ;;  %v1376_v49 = vld [vmem:[%s1695_s1 + $0xb0] sm:$0xff]  }
   0xe   : > { %s1335_s29 = smul.u32 12, %s1700_s16  ;;  %v1373_v40 = vld [vmem:[%s1695_s1 + $0xe0] sm:$0xff]   ;;  %v1375_v44 = vld [vmem:[%s1695_s1 + $0xe8] sm:$0xff]   ;;  %v1377_v50 = vld [vmem:[%s1695_s1 + $0xf0] sm:$0xff]   ;;  %s1182_s9 = sshll.u32 %s1700_s16, 3 }
   0xf   : > { %1240 = vmatpush3.bf16.msra.mxu0 %v1350_v5  ;;  %v1378_v55 = vld [vmem:[%s1695_s1 + $0xb8] sm:$0xff]   ;;  %v1381_v62 = vld [vmem:[%s1695_s1 + $0x100] sm:$0xff]   ;;  %v1383_v0 = vld [vmem:[%s1695_s1 + $0x108] sm:$0xff]   ;;  %s214_s13 = scalar_lea.vmem %s1698_s4, %s1182_s9 }
  0x10   : > { %1260 = vmatpush3.bf16.msra.mxu1 %v1351_v6  ;;  %1241 = vmatprep.subr.bf16.mxu0 %v1399_v1  ;;  %s1476_s10 = scalar_lea.vmem %s1694_s0, %s1335_s29  ;;  %v1379_v58 = vld [vmem:[%s1695_s1 + $0xf8] sm:$0xff]   ;;  %v1384_v2 = vld [vmem:[%s1695_s1 + $0x110] sm:$0xff]   ;;  %v1386_v4 = vld [vmem:[%s1695_s1 + $0x120] sm:$0xff]  }
  0x11   : > { %1261 = vmatprep.subr.bf16.mxu1 %v1399_v1  ;;  %v216_v11 = vld [vmem:[%s1476_s10] sm:$0xf]  ;;  %v1488_v12 = vld [vmem:[%s1476_s10 + $0x4] sm:$0xf]  ;;  %v1385_v3 = vld [vmem:[%s1695_s1 + $0x118] sm:$0xff]  }
  0x12   : > { %v1084_v14 = vcombine.low %v216_v11, %v1488_v12  ;;  %v1495_v15 = vld [vmem:[%s1476_s10 + $0x8] ss:$0 sps:$4 sm:$0x11]   ;;  %v453_v36 = vld [vmem:[%s1476_s10] sm:$0xe]  ;;  %v1388_v6 = vld [vmem:[%s1695_s1 + $0x130] sm:$0xff]  }
  0x13   : > { %1242 = vmatpush3.bf16.msra.mxu0 %v1352_v7  ;;  %v269_v21 = vshll.u32 %v1495_v15, 16  ;;  %v1557_v37 = vld [vmem:[%s1476_s10] sm:$0xc]  ;;  %v1118_v41 = vcombine.low %v453_v36, %v1488_v12  ;;  %v1570_v42 = vld [vmem:[%s1476_s10 + $0x8] ss:$0 sps:$4 sm:$0x33]  }
  0x14   : > { %1262 = vmatpush3.bf16.msra.mxu1 %v1353_v8  ;;  %1243 = vmatprep.subr.bf16.mxu0 %v1399_v1  ;;  %v264_v17 = vshll.u32 %v1084_v14, 16  ;;  %v262_v19 = vshrl.u32 %v1084_v14, 16  ;;  %v1168_v38 = vcombine.low %v1557_v37, %v1488_v12  ;;  %v601_v47 = vshrl.u32 %v1570_v42, 16  ;;  %v1387_v5 = vld [vmem:[%s1695_s1 + $0x128] sm:$0xff]   ;;  %v1389_v7 = vld [vmem:[%s1695_s1 + $0x138] sm:$0xff]   ;;  %s1065_s10 = sshll.u32 %s1700_s16, 4 }
  0x15   : > { %1263 = vmatprep.subr.bf16.mxu1 %v1399_v1  ;;  %v271_v26 = vrot.slane %v269_v21, 1  ;;  %v593_v45 = vshrl.u32 %v1118_v41, 16  ;;  %v596_v46 = vshll.u32 %v1118_v41, 16  ;;  %v604_v48 = vshll.u32 %v1570_v42, 16  ;;  %s1644_s6 = scalar_lea.vmem %s1697_s3, %s1065_s10 }
  0x16   : > { %v266_v20 = vrot.slane %v264_v17, 1  ;;  %v603_v53 = vrot.slane %v601_v47, 1  ;;  %v475_v56 = vrot.slane %v1118_v41, 1  ;;  %v476_v57 = vrot.slane %v1495_v15, 1  ;;  %v837_v36 = vld [vmem:[%s1644_s6 + $0x8] sm:$0x1] }
  0x17   : > { %1244 = vmatpush3.bf16.msra.mxu0 %v1354_v9  ;;  %v595_v51 = vrot.slane %v593_v45, 1  ;;  %v598_v52 = vrot.slane %v596_v46, 2  ;;  %v606_v54 = vrot.slane %v604_v48, 2  ;;  %v723_v8 = vrot.slane %v1168_v38, 2  ;;  %v838_v37 = vld [vmem:[%s1644_s6 + $0x9] sm:$0x1] }
  0x18   : > { %1264 = vmatpush3.bf16.msra.mxu1 %v1355_v10  ;;  %1245 = vmatprep.subr.bf16.mxu0 %v1399_v1  ;;  %v267_v25 = vor.u32 %v266_v20, %v262_v19  ;;  %v477_v61 = vsel %vm474_vm2, %v475_v56, %v476_v57  ;;  %v724_v9 = vrot.slane %v1570_v42, 2  ;;  %v839_v42 = vld [vmem:[%s1644_s6 + $0xa] sm:$0x1]  ;;  %v832_v45 = vld [vmem:[%s1644_s6 + $0x3] sm:$0x1] }
  0x19   : > { %1265 = vmatprep.subr.bf16.mxu1 %v1399_v1  ;;  %v599_v59 = vor.u32 %v598_v52, %v595_v51  ;;  %v607_v60 = vor.u32 %v606_v54, %v603_v53  ;;  %v840_v47 = vld [vmem:[%s1644_s6 + $0xb] sm:$0x1]  ;;  %v855_v48 = vunpack.c.l.bf16 %v839_v42  ;;  %v833_v53 = vld [vmem:[%s1644_s6 + $0x4] sm:$0x1]  ;;  %v848_v54 = vunpack.c.l.bf16 %v832_v45 }
  0x1a   : > { %v272_v27 = vsel %vm260_vm1, %v267_v25, %v271_v26  ;;  %v725_v10 = vsel %vm722_vm4, %v723_v8, %v724_v9  ;;  %v856_v56 = vunpack.c.l.bf16 %v840_v47  ;;  %v843_v8 = vld [vmem:[%s1644_s6 + $0xe] sm:$0x1] }
  0x1b   : > { %1246 = vmatpush3.bf16.msra.mxu0 %v1356_v13  ;;  %v608_v63 = vsel %vm591_vm3, %v599_v59, %v607_v60 }
  0x1c   : > { %1266 = vmatpush3.bf16.msra.mxu1 %v1357_v16  ;;  %1247 = vmatprep.subr.bf16.mxu0 %v1399_v1 }
  0x1d   : > { %1267 = vmatprep.subr.bf16.mxu1 %v1399_v1 }
  0x1f   : > { %1248 = vmatpush3.bf16.msra.mxu0 %v1358_v18 }
  0x20   : > { %1268 = vmatpush3.bf16.msra.mxu1 %v1359_v22  ;;  %1249 = vmatprep.subr.bf16.mxu0 %v1399_v1 }
  0x21   : > { %1269 = vmatprep.subr.bf16.mxu1 %v1399_v1 }
  0x23   : > { %1250 = vmatpush3.bf16.msra.mxu0 %v1360_v23 }
  0x24   : > { %1270 = vmatpush3.bf16.msra.mxu1 %v1361_v24  ;;  %1275 = vmatprep.subr.bf16.mxu0 %v1399_v1 }
  0x25   : > { %1295 = vmatprep.subr.bf16.mxu1 %v1399_v1 }
  0x26   : > { %1252 = vmatmul.mubr.bf16.vlgmr.msra.gmra.mrb[0].mxu0 %v272_v27 }
  0x27   : > { %1272 = vmatmul.mubr.bf16.vlgmr.msra.gmra.mrb[0].mxu1 %v1084_v14  ;;  %1276 = vmatpush3.bf16.msra.mxu0 %v1364_v28 }
  0x28   : > { %1296 = vmatpush3.bf16.msra.mxu1 %v1365_v29  ;;  %1277 = vmatprep.subr.bf16.mxu0 %v1399_v1 }
  0x29   : > { %1297 = vmatprep.subr.bf16.mxu1 %v1399_v1  ;;  %1291 = vmatprep.mubr.msk.bf16.mxu0 %vm1400_vm0, %v1399_v1 }
  0x2a   : > { %1311 = vmatprep.mubr.msk.bf16.mxu1 %vm1400_vm0, %v1399_v1 }
  0x2b   : > { %1278 = vmatpush3.bf16.msra.mxu0 %v1366_v30 }
  0x2c   : > { %1298 = vmatpush3.bf16.msra.mxu1 %v1367_v31  ;;  %1279 = vmatprep.subr.bf16.mxu0 %v1399_v1  ;;  %v893_v31 = vlaneseq }
  0x2d   : > { %1299 = vmatprep.subr.bf16.mxu1 %v1399_v1 }
  0x2f   : > { %1280 = vmatpush3.bf16.msra.mxu0 %v1368_v32 }
  0x30   : > { %1300 = vmatpush3.bf16.msra.mxu1 %v1369_v33  ;;  %1281 = vmatprep.subr.bf16.mxu0 %v1399_v1  ;;  %v829_v33 = vld [vmem:[%s1644_s6] sm:$0x1] }
  0x31   : > { %1301 = vmatprep.subr.bf16.mxu1 %v1399_v1  ;;  %v845_v38 = vunpack.c.l.bf16 %v829_v33 }
  0x33   : > { %1282 = vmatpush3.bf16.msra.mxu0 %v1370_v34  ;;  %v894_v34 = vshrl.u32 %v893_v31, 7 }
  0x34   : > { %1302 = vmatpush3.bf16.msra.mxu1 %v1371_v35  ;;  %1283 = vmatprep.subr.bf16.mxu0 %v1399_v1  ;;  %v830_v35 = vld [vmem:[%s1644_s6 + $0x1] sm:$0x1] }
  0x35   : > { %1303 = vmatprep.subr.bf16.mxu1 %v1399_v1  ;;  %v1653_v41 = vsub.s32 0, %v894_v34 }
  0x37   : > { %1284 = vmatpush3.bf16.msra.mxu0 %v1372_v39  ;;  %v831_v39 = vld [vmem:[%s1644_s6 + $0x2] sm:$0x1] }
  0x38   : > { %1304 = vmatpush3.bf16.msra.mxu1 %v1373_v40  ;;  %1285 = vmatprep.subr.bf16.mxu0 %v1399_v1  ;;  %v846_v40 = vunpack.c.l.bf16 %v830_v35  ;;  %v847_v46 = vunpack.c.l.bf16 %v831_v39 }
  0x39   : > { %1305 = vmatprep.subr.bf16.mxu1 %v1399_v1 }
  0x3a   : > { %v904_v57 = vrot.slane %v847_v46, %v1653_v41 }
  0x3b   : > { %1286 = vmatpush3.bf16.msra.mxu0 %v1374_v43  ;;  %v853_v43 = vunpack.c.l.bf16 %v837_v36 }
  0x3c   : > { %1306 = vmatpush3.bf16.msra.mxu1 %v1375_v44  ;;  %1287 = vmatprep.subr.bf16.mxu0 %v1399_v1  ;;  %v854_v44 = vunpack.c.l.bf16 %v838_v37 }
  0x3d   : > { %1307 = vmatprep.subr.bf16.mxu1 %v1399_v1  ;;  %v928_v51 = vrot.slane %v853_v43, %v1653_v41 }
  0x3e   : > { %v932_v52 = vrot.slane %v854_v44, %v1653_v41 }
  0x3f   : > { %1288 = vmatpush3.bf16.msra.mxu0 %v1376_v49  ;;  %v896_v49 = vrot.slane %v845_v38, %v1653_v41 }
  0x40   : > { %1308 = vmatpush3.bf16.msra.mxu1 %v1377_v50  ;;  %1289 = vmatprep.subr.bf16.mxu0 %v1399_v1  ;;  %v900_v50 = vrot.slane %v846_v40, %v1653_v41  ;;  %v971_v60 = vsel %vm957_vm5, %v932_v52, %v928_v51 }
  0x41   : > { %1309 = vmatprep.subr.bf16.mxu1 %v1399_v1 }
  0x42   : > { %v958_v59 = vsel %vm957_vm5, %v900_v50, %v896_v49 }
  0x43   : > { %1290 = vmatpush3.bf16.msra.mxu0 %v1378_v55  ;;  %v841_v55 = vld [vmem:[%s1644_s6 + $0xc] sm:$0x1] }
  0x44   : > { %1310 = vmatpush3.bf16.msra.mxu1 %v1379_v58  ;;  %1315 = vmatprep.subr.bf16.mxu0 %v1399_v1  ;;  %v936_v58 = vrot.slane %v855_v48, %v1653_v41 }
  0x46   : > { %1292 = vmatmul.mubr.bf16.vlgmr.msra.gmra.mrb[4].mxu0 %v477_v61  ;;  %v834_v61 = vld [vmem:[%s1644_s6 + $0x5] sm:$0x1] }
  0x47   : > { %1316 = vmatpush3.bf16.msra.mxu0 %v1381_v62  ;;  %1312 = vmatmul.mubr.bf16.vlgmr.msra.gmra.mrb[4].mxu1 %v608_v63  ;;  %v849_v62 = vunpack.c.l.bf16 %v833_v53  ;;  %v842_v63 = vld [vmem:[%s1644_s6 + $0xd] sm:$0x1] }
  0x48   : > { %1317 = vmatprep.subr.bf16.mxu0 %v1399_v1  ;;  %1331 = vmatprep.mubr.msk.bf16.mxu0 %vm1400_vm0, %v1399_v1  ;;  %v858_v9 = vunpack.c.l.bf16 %v842_v63 }
  0x4b   : > { %1318 = vmatpush3.bf16.msra.mxu0 %v1383_v0  ;;  %v857_v0 = vunpack.c.l.bf16 %v841_v55 }
  0x4c   : > { %1319 = vmatprep.subr.bf16.mxu0 %v1399_v1 }
  0x4f   : > { %1320 = vmatpush3.bf16.msra.mxu0 %v1384_v2  ;;  %v908_v2 = vrot.slane %v848_v54, %v1653_v41 }
  0x50   : > { %1321 = vmatprep.subr.bf16.mxu0 %v1399_v1 }
  0x53   : > { %1322 = vmatpush3.bf16.msra.mxu0 %v1385_v3  ;;  %v940_v3 = vrot.slane %v856_v56, %v1653_v41 }
  0x54   : > { %1323 = vmatprep.subr.bf16.mxu0 %v1399_v1 }
  0x57   : > { %1324 = vmatpush3.bf16.msra.mxu0 %v1386_v4  ;;  %v960_v4 = vsel %vm959_vm6, %v904_v57, %v958_v59 }
  0x58   : > { %1325 = vmatprep.subr.bf16.mxu0 %v1399_v1 }
  0x5b   : > { %1326 = vmatpush3.bf16.msra.mxu0 %v1387_v5  ;;  %v972_v5 = vsel %vm959_vm6, %v936_v58, %v971_v60 }
  0x5c   : > { %1327 = vmatprep.subr.bf16.mxu0 %v1399_v1 }
  0x5f   : > { %1328 = vmatpush3.bf16.msra.mxu0 %v1388_v6  ;;  %v835_v6 = vld [vmem:[%s1644_s6 + $0x6] sm:$0x1] }
  0x60   : > { %1329 = vmatprep.subr.bf16.mxu0 %v1399_v1 }
  0x63   : > { %1330 = vmatpush3.bf16.msra.mxu0 %v1389_v7  ;;  %v850_v7 = vunpack.c.l.bf16 %v834_v61 }
  0x66   : > { %1332 = vmatmul.mubr.bf16.vlgmr.msra.gmra.mrb[8].mxu0 %v725_v10  ;;  %v912_v10 = vrot.slane %v849_v62, %v1653_v41 }
  0xf9   : > { %v356_v11 = vpop.f32.mrb[0].mxu0 }
  0xfa   : > { %v446_v13 = vpop.f32.mrb[0].mxu1  ;;  %v1253_v14 = vpop.f32.mrb[1].mxu0 }
  0xfb   : > { %v447_v15 = vadd.f32 %v446_v13, %v356_v11  ;;  %v1273_v16 = vpop.f32.mrb[1].mxu1  ;;  %v359_v17 = vpop.f32.mrb[2].mxu0  ;;  %v944_v11 = vrot.slane %v857_v0, %v1653_v41  ;;  %v962_v13 = vsel %vm961_vm7, %v908_v2, %v960_v4  ;;  %v973_v14 = vsel %vm961_vm7, %v940_v3, %v972_v5 }
  0xfc   : > { %v449_v18 = vpop.f32.mrb[2].mxu1  ;;  %v1254_v19 = vpop.f32.mrb[3].mxu0  ;;  %v851_v16 = vunpack.c.l.bf16 %v835_v6 }
  0xfd   : > { %v450_v20 = vadd.f32 %v449_v18, %v359_v17  ;;  %v1274_v12 = vpop.f32.mrb[3].mxu1  ;;  %v844_v17 = vld [vmem:[%s1644_s6 + $0xf] sm:$0x1]  ;;  %v859_v18 = vunpack.c.l.bf16 %v843_v8  ;;  %v916_v19 = vrot.slane %v850_v7, %v1653_v41 }
  0xfe   : > { %v964_v12 = vsel %vm963_vm8, %v912_v10, %v962_v13 }
 0x119   : > { %v561_v21 = vpop.f32.mrb[4].mxu0 }
 0x11a   : > { %v568_v22 = vadd.f32 %v561_v21, %v447_v15  ;;  %v1293_v23 = vpop.f32.mrb[5].mxu0  ;;  %v692_v24 = vpop.f32.mrb[4].mxu1  ;;  %v836_v15 = vld [vmem:[%s1644_s6 + $0x7] sm:$0x1]  ;;  %v974_v21 = vsel %vm963_vm8, %v944_v11, %v973_v14 }
 0x11b   : > { %v564_v1 = vpop.f32.mrb[6].mxu0  ;;  %v1313_v25 = vpop.f32.mrb[5].mxu1  ;;  %v860_v23 = vunpack.c.l.bf16 %v844_v17 }
 0x11c   : > { %v569_v26 = vadd.f32 %v564_v1, %v450_v20  ;;  %v1639_v27 = vadd.f32 %v692_v24, %v568_v22  ;;  %v1294_v28 = vpop.f32.mrb[7].mxu0  ;;  %v695_v29 = vpop.f32.mrb[6].mxu1  ;;  %v948_v20 = vrot.slane %v858_v9, %v1653_v41  ;;  %v852_v22 = vunpack.c.l.bf16 %v836_v15 }
 0x11d   : > { %v1314_v30 = vpop.f32.mrb[7].mxu1  ;;  %v920_v24 = vrot.slane %v851_v16, %v1653_v41  ;;  %v952_v1 = vrot.slane %v859_v18, %v1653_v41  ;;  %v966_v28 = vsel %vm965_vm9, %v916_v19, %v964_v12  ;;  %v956_v35 = vrot.slane %v860_v23, %v1653_v41 }
 0x11e   : > { %v1646_v32 = vadd.f32 %v695_v29, %v569_v26  ;;  %v1177_v26 = vld [vmem:[%s1696_s2] ss:$0 sm:$0xff]  ;;  %v975_v29 = vsel %vm965_vm9, %v948_v20, %v974_v21  ;;  %v924_v33 = vrot.slane %v852_v22, %v1653_v41 }
 0x11f   : > { %v968_v37 = vsel %vm967_vm10, %v920_v24, %v966_v28  ;;  %v976_v39 = vsel %vm967_vm10, %v952_v1, %v975_v29 }
 0x120   : > { %v970_v44 = vsel %vm969_vm11, %v924_v33, %v968_v37  ;;  %v977_v45 = vsel %vm969_vm11, %v956_v35, %v976_v39 }
 0x139   : > { %v809_v25 = vpop.f32.mrb[8].mxu0 }
 0x13a   : > { %v816_v30 = vadd.f32 %v809_v25, %v1639_v27  ;;  %v1333_v31 = vpop.f32.mrb[9].mxu0 }
 0x13b   : > { %v812_v34 = vpop.f32.mrb[10].mxu0 }
 0x13c   : > { %v825_v36 = vadd.f32 %v1177_v26, %v816_v30  ;;  %v817_v38 = vadd.f32 %v812_v34, %v1646_v32  ;;  %v1334_v40 = vpop.f32.mrb[11].mxu0 }
 0x13e   : > { %v827_v42 = vmax.f32 %v825_v36, 0.0  ;;  %v826_v43 = vadd.f32 %v1177_v26, %v817_v38 }
 0x140   : > { %v828_v46 = vmax.f32 %v826_v43, 0.0  ;;  %v980_v27 = vadd.f32 %v970_v44, %v827_v42 }
 0x142   : > { %v981_v47 = vadd.f32 %v977_v45, %v828_v46 }
 0x144   : > { %v1188_v48 = vpack.c.bf16 %v981_v47, %v980_v27 }
 0x146   : > { %1189 = vst [vmem:[%s214_s13] sm:$0xff] %v1188_v48  }
 0x147 PF: > { %s14_s15 = sadd.s32 1, %s1397_s15  }
 0x148   : > { %p11_p4 = scmp.ge.s32.totalorder %s14_s15, 4  }
 0x14a   :  { %13 = sbr.rel (!%p11_p4) target bundleno = 1 (0x1), region = 73 }

// kernel: speaker_encoder_forward.9
= control target key start
LH: loop header
LB: loop body
LE: loop exit
PB: predicated region body
PF: predicated region fallthrough
CT: control target
= control target key end

     0   :  { %s1211_s12 = smov 0   ;;  %s1433_s0 = inlined_call_operand.vmem [shape: bf16[2,1,20,128], index: 0, kind: input, shape index: {}]   ;;  %s1434_s1 = inlined_call_operand.vmem [shape: bf16[5,128,128], index: 1, kind: input, shape index: {}]   ;;  %s1435_s2 = inlined_call_operand.vmem [shape: f32[1,128], index: 2, kind: input, shape index: {}]   ;;  %s1436_s3 = inlined_call_operand.vmem [shape: bf16[2,16,128], index: 3, kind: output, shape index: {}]  }
   0x1 LB: > { %s850_s13 = sadd.s32 4294967295, %s1187_s12   ;;  %p854_p0 = scmp.ge.s32.totalorder %s1187_s12, 1  ;;  %s1187_s12 = sphi %s1211_s12, %s13_s12  }
   0x2   : > { %p137_p1 = scmp.lt.s32.totalorder %s1187_s12, 3 }
   0x4   : > { %p138_p2 = pnand %p854_p0, %p137_p1 }
   0x5   : > { %v1136_v0 = vld [vmem:[%s1434_s1 + $0x40] sm:$0xff] (!%p138_p2)   ;;  %v1189_v1 = vmov (!%p138_p2), 0.0   ;;  %v1138_v3 = vld [vmem:[%s1434_s1 + $0x48] sm:$0xff] (!%p138_p2)   ;;  %vm1190_vm0 = vmmov (!%p138_p2), 0   ;;  %p161_p3 = scmp.lt.s32.totalorder (!%p138_p2), %s850_s13, 1  ;;  %v1140_v5 = vld [vmem:[%s1434_s1 + $0x50] sm:$0xff] (!%p138_p2)  }
   0x6   : > { %141 = sbr.rel (%p138_p2) target bundleno = 325 (0x145), region = 32  ;;  %1025 = vmatprep.subr.bf16.mxu0 (!%p138_p2), %v1189_v1  ;;  %1045 = vmatprep.subr.bf16.mxu1 (!%p138_p2), %v1189_v1  ;;  %v1137_v2 = vld [vmem:[%s1434_s1] sm:$0xff] (!%p138_p2)   ;;  %v1139_v4 = vld [vmem:[%s1434_s1 + $0x8] sm:$0xff] (!%p138_p2)   ;;  %v1141_v6 = vld [vmem:[%s1434_s1 + $0x10] sm:$0xff] (!%p138_p2)   ;;  %vm216_vm1 = vsmask.f32 (!%p138_p2), 7424 }
   0x7   : > { %1026 = vmatpush3.bf16.msra.mxu0 (!%p138_p2), %v1136_v0  ;;  %1041 = vmatprep.mubr.msk.bf16.mxu0 (!%p138_p2), %vm1190_vm0, %v1189_v1  ;;  %v1142_v7 = vld [vmem:[%s1434_s1 + $0x58] sm:$0xff] (!%p138_p2)   ;;  %v1144_v9 = vld [vmem:[%s1434_s1 + $0x60] sm:$0xff] (!%p138_p2)   ;;  %v1146_v13 = vld [vmem:[%s1434_s1 + $0x68] sm:$0xff] (!%p138_p2)   ;;  %vm430_vm2 = vcmask (!%p138_p2), 1046528   ;;  %vm547_vm3 = vsmask.f32 (!%p138_p2), 6400 }
   0x8   : > { %1046 = vmatpush3.bf16.msra.mxu1 (!%p138_p2), %v1137_v2  ;;  %1027 = vmatprep.subr.bf16.mxu0 (!%p138_p2), %v1189_v1  ;;  %v1143_v8 = vld [vmem:[%s1434_s1 + $0x18] sm:$0xff] (!%p138_p2)   ;;  %v1145_v10 = vld [vmem:[%s1434_s1 + $0x20] sm:$0xff] (!%p138_p2)   ;;  %v1147_v16 = vld [vmem:[%s1434_s1 + $0x28] sm:$0xff] (!%p138_p2)   ;;  %vm678_vm4 = vcmask (!%p138_p2), 1045504  }
   0x9   : > { %1047 = vmatprep.subr.bf16.mxu1 (!%p138_p2), %v1189_v1  ;;  %1061 = vmatprep.mubr.msk.bf16.mxu1 (!%p138_p2), %vm1190_vm0, %v1189_v1  ;;  %v1148_v18 = vld [vmem:[%s1434_s1 + $0x70] sm:$0xff] (!%p138_p2)   ;;  %v1150_v23 = vld [vmem:[%s1434_s1 + $0x78] sm:$0xff] (!%p138_p2)   ;;  %v1154_v28 = vld [vmem:[%s1434_s1 + $0x80] sm:$0xff] (!%p138_p2)  }
   0xa   : > { %v1149_v22 = vld [vmem:[%s1434_s1 + $0x30] sm:$0xff] (!%p138_p2)   ;;  %v1151_v24 = vld [vmem:[%s1434_s1 + $0x38] sm:$0xff] (!%p138_p2)   ;;  %v1155_v29 = vld [vmem:[%s1434_s1 + $0xc0] sm:$0xff] (!%p138_p2)  }
   0xb   : > { %1028 = vmatpush3.bf16.msra.mxu0 (!%p138_p2), %v1138_v3  ;;  %v1156_v30 = vld [vmem:[%s1434_s1 + $0x88] sm:$0xff] (!%p138_p2)   ;;  %v1158_v32 = vld [vmem:[%s1434_s1 + $0x90] sm:$0xff] (!%p138_p2)   ;;  %v1160_v34 = vld [vmem:[%s1434_s1 + $0x98] sm:$0xff] (!%p138_p2)  }
   0xc   : > { %1048 = vmatpush3.bf16.msra.mxu1 (!%p138_p2), %v1139_v4  ;;  %1029 = vmatprep.subr.bf16.mxu0 (!%p138_p2), %v1189_v1  ;;  %v1157_v31 = vld [vmem:[%s1434_s1 + $0xc8] sm:$0xff] (!%p138_p2)   ;;  %v1159_v33 = vld [vmem:[%s1434_s1 + $0xd0] sm:$0xff] (!%p138_p2)   ;;  %v1161_v35 = vld [vmem:[%s1434_s1 + $0xd8] sm:$0xff] (!%p138_p2)  }
   0xd   : > { %s1438_s13 = smov (!%p161_p3, %s850_s13), 1  ;;  %1049 = vmatprep.subr.bf16.mxu1 %v1189_v1  ;;  %v1162_v39 = vld [vmem:[%s1434_s1 + $0xa0] sm:$0xff]   ;;  %v1164_v43 = vld [vmem:[%s1434_s1 + $0xa8] sm:$0xff]   ;;  %v1166_v49 = vld [vmem:[%s1434_s1 + $0xb0] sm:$0xff]  }
   0xe   : > { %s1125_s26 = smul.u32 12, %s1438_s13  ;;  %v1163_v40 = vld [vmem:[%s1434_s1 + $0xe0] sm:$0xff]   ;;  %v1165_v44 = vld [vmem:[%s1434_s1 + $0xe8] sm:$0xff]   ;;  %v1167_v50 = vld [vmem:[%s1434_s1 + $0xf0] sm:$0xff]   ;;  %s972_s25 = sshll.u32 %s1438_s13, 3 }
   0xf   : > { %1030 = vmatpush3.bf16.msra.mxu0 %v1140_v5  ;;  %v1168_v55 = vld [vmem:[%s1434_s1 + $0xb8] sm:$0xff]   ;;  %v1171_v62 = vld [vmem:[%s1434_s1 + $0x100] sm:$0xff]   ;;  %v1173_v0 = vld [vmem:[%s1434_s1 + $0x108] sm:$0xff]   ;;  %s170_s28 = scalar_lea.vmem %s1436_s3, %s972_s25 }
  0x10   : > { %1050 = vmatpush3.bf16.msra.mxu1 %v1141_v6  ;;  %1031 = vmatprep.subr.bf16.mxu0 %v1189_v1  ;;  %s1261_s6 = scalar_lea.vmem %s1433_s0, %s1125_s26  ;;  %v1169_v58 = vld [vmem:[%s1434_s1 + $0xf8] sm:$0xff]   ;;  %v1174_v2 = vld [vmem:[%s1434_s1 + $0x110] sm:$0xff]   ;;  %v1176_v4 = vld [vmem:[%s1434_s1 + $0x120] sm:$0xff]  }
  0x11   : > { %1051 = vmatprep.subr.bf16.mxu1 %v1189_v1  ;;  %v172_v11 = vld [vmem:[%s1261_s6] sm:$0xf]  ;;  %v1273_v12 = vld [vmem:[%s1261_s6 + $0x4] sm:$0xf]  ;;  %v1175_v3 = vld [vmem:[%s1434_s1 + $0x118] sm:$0xff]  }
  0x12   : > { %v874_v14 = vcombine.low %v172_v11, %v1273_v12  ;;  %v1280_v15 = vld [vmem:[%s1261_s6 + $0x8] ss:$0 sps:$4 sm:$0x11]   ;;  %v409_v36 = vld [vmem:[%s1261_s6] sm:$0xe]  ;;  %v1178_v6 = vld [vmem:[%s1434_s1 + $0x130] sm:$0xff]  }
  0x13   : > { %1032 = vmatpush3.bf16.msra.mxu0 %v1142_v7  ;;  %v225_v21 = vshll.u32 %v1280_v15, 16  ;;  %v1342_v37 = vld [vmem:[%s1261_s6] sm:$0xc]  ;;  %v908_v41 = vcombine.low %v409_v36, %v1273_v12  ;;  %v1355_v42 = vld [vmem:[%s1261_s6 + $0x8] ss:$0 sps:$4 sm:$0x33]  }
  0x14   : > { %1052 = vmatpush3.bf16.msra.mxu1 %v1143_v8  ;;  %1033 = vmatprep.subr.bf16.mxu0 %v1189_v1  ;;  %v220_v17 = vshll.u32 %v874_v14, 16  ;;  %v218_v19 = vshrl.u32 %v874_v14, 16  ;;  %v958_v38 = vcombine.low %v1342_v37, %v1273_v12  ;;  %v557_v47 = vshrl.u32 %v1355_v42, 16  ;;  %v1177_v5 = vld [vmem:[%s1434_s1 + $0x128] sm:$0xff]   ;;  %v1179_v7 = vld [vmem:[%s1434_s1 + $0x138] sm:$0xff]  }
  0x15   : > { %1053 = vmatprep.subr.bf16.mxu1 %v1189_v1  ;;  %v227_v26 = vrot.slane %v225_v21, 1  ;;  %v549_v45 = vshrl.u32 %v908_v41, 16  ;;  %v552_v46 = vshll.u32 %v908_v41, 16  ;;  %v560_v48 = vshll.u32 %v1355_v42, 16 }
  0x16   : > { %v222_v20 = vrot.slane %v220_v17, 1  ;;  %v559_v53 = vrot.slane %v557_v47, 1  ;;  %v431_v56 = vrot.slane %v908_v41, 1  ;;  %v432_v57 = vrot.slane %v1280_v15, 1 }
  0x17   : > { %1034 = vmatpush3.bf16.msra.mxu0 %v1144_v9  ;;  %v551_v51 = vrot.slane %v549_v45, 1  ;;  %v554_v52 = vrot.slane %v552_v46, 2  ;;  %v562_v54 = vrot.slane %v560_v48, 2  ;;  %v679_v8 = vrot.slane %v958_v38, 2 }
  0x18   : > { %1054 = vmatpush3.bf16.msra.mxu1 %v1145_v10  ;;  %1035 = vmatprep.subr.bf16.mxu0 %v1189_v1  ;;  %v223_v25 = vor.u32 %v222_v20, %v218_v19  ;;  %v433_v61 = vsel %vm430_vm2, %v431_v56, %v432_v57  ;;  %v680_v9 = vrot.slane %v1355_v42, 2 }
  0x19   : > { %1055 = vmatprep.subr.bf16.mxu1 %v1189_v1  ;;  %v555_v59 = vor.u32 %v554_v52, %v551_v51  ;;  %v563_v60 = vor.u32 %v562_v54, %v559_v53 }
  0x1a   : > { %v228_v27 = vsel %vm216_vm1, %v223_v25, %v227_v26  ;;  %v681_v10 = vsel %vm678_vm4, %v679_v8, %v680_v9 }
  0x1b   : > { %1036 = vmatpush3.bf16.msra.mxu0 %v1146_v13  ;;  %v564_v63 = vsel %vm547_vm3, %v555_v59, %v563_v60 }
  0x1c   : > { %1056 = vmatpush3.bf16.msra.mxu1 %v1147_v16  ;;  %1037 = vmatprep.subr.bf16.mxu0 %v1189_v1 }
  0x1d   : > { %1057 = vmatprep.subr.bf16.mxu1 %v1189_v1 }
  0x1f   : > { %1038 = vmatpush3.bf16.msra.mxu0 %v1148_v18 }
  0x20   : > { %1058 = vmatpush3.bf16.msra.mxu1 %v1149_v22  ;;  %1039 = vmatprep.subr.bf16.mxu0 %v1189_v1 }
  0x21   : > { %1059 = vmatprep.subr.bf16.mxu1 %v1189_v1 }
  0x23   : > { %1040 = vmatpush3.bf16.msra.mxu0 %v1150_v23 }
  0x24   : > { %1060 = vmatpush3.bf16.msra.mxu1 %v1151_v24  ;;  %1065 = vmatprep.subr.bf16.mxu0 %v1189_v1 }
  0x25   : > { %1085 = vmatprep.subr.bf16.mxu1 %v1189_v1 }
  0x26   : > { %1042 = vmatmul.mubr.bf16.vlgmr.msra.gmra.mrb[0].mxu0 %v228_v27 }
  0x27   : > { %1062 = vmatmul.mubr.bf16.vlgmr.msra.gmra.mrb[0].mxu1 %v874_v14  ;;  %1066 = vmatpush3.bf16.msra.mxu0 %v1154_v28 }
  0x28   : > { %1086 = vmatpush3.bf16.msra.mxu1 %v1155_v29  ;;  %1067 = vmatprep.subr.bf16.mxu0 %v1189_v1 }
  0x29   : > { %1087 = vmatprep.subr.bf16.mxu1 %v1189_v1  ;;  %1081 = vmatprep.mubr.msk.bf16.mxu0 %vm1190_vm0, %v1189_v1 }
  0x2a   : > { %1101 = vmatprep.mubr.msk.bf16.mxu1 %vm1190_vm0, %v1189_v1 }
  0x2b   : > { %1068 = vmatpush3.bf16.msra.mxu0 %v1156_v30 }
  0x2c   : > { %1088 = vmatpush3.bf16.msra.mxu1 %v1157_v31  ;;  %1069 = vmatprep.subr.bf16.mxu0 %v1189_v1 }
  0x2d   : > { %1089 = vmatprep.subr.bf16.mxu1 %v1189_v1 }
  0x2f   : > { %1070 = vmatpush3.bf16.msra.mxu0 %v1158_v32 }
  0x30   : > { %1090 = vmatpush3.bf16.msra.mxu1 %v1159_v33  ;;  %1071 = vmatprep.subr.bf16.mxu0 %v1189_v1  ;;  %v967_v33 = vld [vmem:[%s1435_s2] ss:$0 sm:$0xff] }
  0x31   : > { %1091 = vmatprep.subr.bf16.mxu1 %v1189_v1 }
  0x33   : > { %1072 = vmatpush3.bf16.msra.mxu0 %v1160_v34 }
  0x34   : > { %1092 = vmatpush3.bf16.msra.mxu1 %v1161_v35  ;;  %1073 = vmatprep.subr.bf16.mxu0 %v1189_v1 }
  0x35   : > { %1093 = vmatprep.subr.bf16.mxu1 %v1189_v1 }
  0x37   : > { %1074 = vmatpush3.bf16.msra.mxu0 %v1162_v39 }
  0x38   : > { %1094 = vmatpush3.bf16.msra.mxu1 %v1163_v40  ;;  %1075 = vmatprep.subr.bf16.mxu0 %v1189_v1 }
  0x39   : > { %1095 = vmatprep.subr.bf16.mxu1 %v1189_v1 }
  0x3b   : > { %1076 = vmatpush3.bf16.msra.mxu0 %v1164_v43 }
  0x3c   : > { %1096 = vmatpush3.bf16.msra.mxu1 %v1165_v44  ;;  %1077 = vmatprep.subr.bf16.mxu0 %v1189_v1 }
  0x3d   : > { %1097 = vmatprep.subr.bf16.mxu1 %v1189_v1 }
  0x3f   : > { %1078 = vmatpush3.bf16.msra.mxu0 %v1166_v49 }
  0x40   : > { %1098 = vmatpush3.bf16.msra.mxu1 %v1167_v50  ;;  %1079 = vmatprep.subr.bf16.mxu0 %v1189_v1 }
  0x41   : > { %1099 = vmatprep.subr.bf16.mxu1 %v1189_v1 }
  0x43   : > { %1080 = vmatpush3.bf16.msra.mxu0 %v1168_v55 }
  0x44   : > { %1100 = vmatpush3.bf16.msra.mxu1 %v1169_v58  ;;  %1105 = vmatprep.subr.bf16.mxu0 %v1189_v1 }
  0x46   : > { %1082 = vmatmul.mubr.bf16.vlgmr.msra.gmra.mrb[4].mxu0 %v433_v61 }
  0x47   : > { %1106 = vmatpush3.bf16.msra.mxu0 %v1171_v62  ;;  %1102 = vmatmul.mubr.bf16.vlgmr.msra.gmra.mrb[4].mxu1 %v564_v63 }
  0x48   : > { %1107 = vmatprep.subr.bf16.mxu0 %v1189_v1  ;;  %1121 = vmatprep.mubr.msk.bf16.mxu0 %vm1190_vm0, %v1189_v1 }
  0x4b   : > { %1108 = vmatpush3.bf16.msra.mxu0 %v1173_v0 }
  0x4c   : > { %1109 = vmatprep.subr.bf16.mxu0 %v1189_v1 }
  0x4f   : > { %1110 = vmatpush3.bf16.msra.mxu0 %v1174_v2 }
  0x50   : > { %1111 = vmatprep.subr.bf16.mxu0 %v1189_v1 }
  0x53   : > { %1112 = vmatpush3.bf16.msra.mxu0 %v1175_v3 }
  0x54   : > { %1113 = vmatprep.subr.bf16.mxu0 %v1189_v1 }
  0x57   : > { %1114 = vmatpush3.bf16.msra.mxu0 %v1176_v4 }
  0x58   : > { %1115 = vmatprep.subr.bf16.mxu0 %v1189_v1 }
  0x5b   : > { %1116 = vmatpush3.bf16.msra.mxu0 %v1177_v5 }
  0x5c   : > { %1117 = vmatprep.subr.bf16.mxu0 %v1189_v1 }
  0x5f   : > { %1118 = vmatpush3.bf16.msra.mxu0 %v1178_v6 }
  0x60   : > { %1119 = vmatprep.subr.bf16.mxu0 %v1189_v1 }
  0x63   : > { %1120 = vmatpush3.bf16.msra.mxu0 %v1179_v7 }
  0x66   : > { %1122 = vmatmul.mubr.bf16.vlgmr.msra.gmra.mrb[8].mxu0 %v681_v10 }
  0xf9   : > { %v312_v11 = vpop.f32.mrb[0].mxu0 }
  0xfa   : > { %v402_v13 = vpop.f32.mrb[0].mxu1  ;;  %v1043_v14 = vpop.f32.mrb[1].mxu0 }
  0xfb   : > { %v403_v15 = vadd.f32 %v402_v13, %v312_v11  ;;  %v1063_v16 = vpop.f32.mrb[1].mxu1  ;;  %v315_v17 = vpop.f32.mrb[2].mxu0 }
  0xfc   : > { %v405_v18 = vpop.f32.mrb[2].mxu1  ;;  %v1044_v19 = vpop.f32.mrb[3].mxu0 }
  0xfd   : > { %v406_v20 = vadd.f32 %v405_v18, %v315_v17  ;;  %v1064_v21 = vpop.f32.mrb[3].mxu1 }
 0x119   : > { %v517_v12 = vpop.f32.mrb[4].mxu0 }
 0x11a   : > { %v524_v22 = vadd.f32 %v517_v12, %v403_v15  ;;  %v1083_v23 = vpop.f32.mrb[5].mxu0  ;;  %v648_v24 = vpop.f32.mrb[4].mxu1 }
 0x11b   : > { %v520_v25 = vpop.f32.mrb[6].mxu0  ;;  %v1103_v1 = vpop.f32.mrb[5].mxu1 }
 0x11c   : > { %v525_v26 = vadd.f32 %v520_v25, %v406_v20  ;;  %v655_v27 = vadd.f32 %v648_v24, %v524_v22  ;;  %v1084_v28 = vpop.f32.mrb[7].mxu0  ;;  %v651_v29 = vpop.f32.mrb[6].mxu1 }
 0x11d   : > { %v1104_v30 = vpop.f32.mrb[7].mxu1 }
 0x11e   : > { %v656_v31 = vadd.f32 %v651_v29, %v525_v26 }
 0x139   : > { %v765_v32 = vpop.f32.mrb[8].mxu0 }
 0x13a   : > { %v772_v34 = vadd.f32 %v765_v32, %v655_v27  ;;  %v1123_v35 = vpop.f32.mrb[9].mxu0 }
 0x13b   : > { %v768_v36 = vpop.f32.mrb[10].mxu0 }
 0x13c   : > { %v781_v37 = vadd.f32 %v967_v33, %v772_v34  ;;  %v773_v38 = vadd.f32 %v768_v36, %v656_v31  ;;  %v1124_v39 = vpop.f32.mrb[11].mxu0 }
 0x13e   : > { %v782_v40 = vadd.f32 %v967_v33, %v773_v38  ;;  %v783_v41 = vmax.f32 %v781_v37, 0.0 }
 0x140   : > { %v784_v42 = vmax.f32 %v782_v40, 0.0 }
 0x142   : > { %v978_v43 = vpack.c.bf16 %v784_v42, %v783_v41 }
 0x144   : > { %979 = vst [vmem:[%s170_s28] sm:$0xff] %v978_v43  }
 0x145 PF: > { %s13_s12 = sadd.s32 1, %s1187_s12  }
 0x146   : > { %p10_p4 = scmp.ge.s32.totalorder %s13_s12, 4  }
 0x148   :  { %12 = sbr.rel (!%p10_p4) target bundleno = 1 (0x1), region = 66 }

// kernel: speaker_encoder_forward.8
= control target key start
LH: loop header
LB: loop body
LE: loop exit
PB: predicated region body
PF: predicated region fallthrough
CT: control target
= control target key end

     0   :  { %11 = vsyncpa [#allocation3], 0  ;;  %s1469_s21 = smov 0   ;;  %s1658_s0 = inlined_call_operand.vmem [shape: bf16[2,19,128], index: 0, kind: input, shape index: {}]   ;;  %s1659_s1 = inlined_call_operand.hbm [shape: bf16[4,128,128], index: 1, kind: input, shape index: {}]   ;;  %s1660_s2 = inlined_call_operand.vmem [shape: f32[1,128], index: 2, kind: input, shape index: {}]   ;;  %s1661_s3 = inlined_call_operand.vmem [shape: bf16[128,128], index: 3, kind: input, shape index: {}]   ;;  %s1662_s4 = inlined_call_operand.vmem [shape: bf16[128,128], index: 4, kind: input, shape index: {}]   ;;  %s1663_s5 = inlined_call_operand.vmem [shape: f32[1,128], index: 5, kind: input, shape index: {}]   ;;  %s1664_s6 = inlined_call_operand.vmem [shape: bf16[2,16,128], index: 6, kind: output, shape index: {}]  }
   0x1 LB: > { %s1475_s22 = sadd.s32 4294967295, %s1427_s21   ;;  %p1065_p0 = scmp.ge.s32.totalorder %s1427_s21, 1  ;;  %s1427_s21 = sphi %s1469_s21, %s17_s21  }
   0x2   : > { %p179_p1 = scmp.lt.s32.totalorder %s1427_s21, 3  ;;  %s1429_s23 = smov [#allocation2]  }
   0x3   : > { %s191_s24 = sshll.u32 %s1429_s23, 4  ;;  %p1665_p3 = scmp.eq.s32.totalorder %s1475_s22, 0  ;;  %s192_s24 = int_to_ptr.vmem [resolvable:$true] %s191_s24 }
   0x4   : > { %p1479_p2 = pnand %p1065_p0, %p179_p1  ;;  %s1389_s29 = scalar_lea.hbm %s1659_s1, 4096 }
   0x5   : > { %p1390_p6 = scmp.ne.s32.totalorder %s1659_s1, %s1389_s29  ;;  %p1396_p10 = scmp.lt.u32.totalorder %s1389_s29, %s1659_s1 }
   0x6   : > { %s1667_s25 = scalar_select %p1479_p2, 1, 0 }
   0x7   : > { %p1318_p4 = pneg %p1479_p2 }
   0x9   : > { %p1488_p5 = pnand %p1665_p3, %p1318_p4 }
   0xb   : > { %p1391_p7 = pneg %p1488_p5 }
   0xd   : > { %p1392_p8 = pnand %p1391_p7, %p1390_p6 }
   0xf   : > { %p1393_p9 = pneg %p1392_p8 }
  0x11   : > { %p1398_p11 = pnand %p1396_p10, %p1393_p9 }
  0x13   : > { %1401 = shalt.err (!%p1398_p11)
}
  0x14   : > { %s1402_s10 = scalar_lea.vmem %s192_s24, 4096  ;;  %p1410_p1 = scmp.lt.s32.totalorder %s192_s24, %s192_s24 }
  0x15   : > { %p1403_p12 = scmp.ne.s32.totalorder %s192_s24, %s1402_s10  ;;  %p1411_p4 = scmp.lt.s32.totalorder %s1402_s10, %s1402_s10 }
  0x17   : > { %p1405_p13 = pnand %p1403_p12, %p1391_p7  ;;  %p1412_p3 = por %p1411_p4, %p1410_p1 }
  0x19   : > { %p1406_p0 = pneg %p1405_p13 }
  0x1b   : > { %p1413_p2 = pnand %p1412_p3, %p1406_p0 }
  0x1d   : > { %1416 = shalt.err (!%p1413_p2)
}
  0x1e   : > { %s1430_s11 = smov 64   ;;  %s1431_s12 = smov 4  }
  0x1f   : > { %1321 = dma.hbm_to_vmem [thread:$0]  (!%p1488_p5), %s1659_s1, 4096, %s192_s24, [#allocation3], %s1430_s11, %s1430_s11, %s1431_s12  }
  0x20   : > { %p1669_p6 = scmp.ne.s32.totalorder %s1667_s25, 0 }
  0x21   : > { %p1670_p8 = scmp.eq.s32.totalorder (!%p1669_p6), %s1475_s22, 0 }
  0x22   : > { %227 = sbr.rel (%p1669_p6) target bundleno = 555 (0x22b), region = 44 }
  0x29   : > { %1422 = dma.done.wait (%p1670_p8), [#allocation3], 4096   ;;  %p1671_p7 = pmov %p1670_p8 }
  0x2a   : > { %v1432_v0 = vmov 0.0   ;;  %vm1433_vm0 = vmmov 0   ;;  %v1337_v1 = vld [vmem:[#allocation2 + $0x40] sm:$0xff]   ;;  %p257_p2 = scmp.lt.s32.totalorder %s1475_s22, 1  ;;  %v1339_v3 = vld [vmem:[#allocation2 + $0x48] sm:$0xff]   ;;  %v1341_v5 = vld [vmem:[#allocation2 + $0x50] sm:$0xff]  }
  0x2b   : > { %1424 = vsyncadd (%p1671_p7), [#allocation3], 4294963200  ;;  %1193 = vmatprep.subr.bf16.mxu0 %v1432_v0  ;;  %1213 = vmatprep.subr.bf16.mxu1 %v1432_v0  ;;  %v1338_v2 = vld [vmem:[#allocation2] sm:$0xff]   ;;  %v1340_v4 = vld [vmem:[#allocation2 + $0x8] sm:$0xff]   ;;  %vm312_vm1 = vsmask.f32 7424 }
  0x2c   : > { %1209 = vmatprep.mubr.msk.bf16.mxu0 %vm1433_vm0, %v1432_v0  ;;  %1229 = vmatprep.mubr.msk.bf16.mxu1 %vm1433_vm0, %v1432_v0  ;;  %s1673_s22 = smov (!%p257_p2, %s1475_s22), 1  ;;  %v1342_v6 = vld [vmem:[#allocation2 + $0x10] sm:$0xff]   ;;  %v1343_v7 = vld [vmem:[#allocation2 + $0x58] sm:$0xff]   ;;  %v1345_v9 = vld [vmem:[#allocation2 + $0x60] sm:$0xff]   ;;  %vm526_vm2 = vcmask 1046528  }
  0x2d   : > { %1194 = vmatpush3.bf16.msra.mxu0 %v1337_v1  ;;  %1214 = vmatpush3.bf16.msra.mxu1 %v1338_v2  ;;  %s1313_s15 = smul.u32 12, %s1673_s22  ;;  %v1344_v8 = vld [vmem:[#allocation2 + $0x18] sm:$0xff]   ;;  %v1346_v10 = vld [vmem:[#allocation2 + $0x20] sm:$0xff]   ;;  %v1347_v13 = vld [vmem:[#allocation2 + $0x68] sm:$0xff]   ;;  %vm643_vm3 = vsmask.f32 6400 }
  0x2e   : > { %1195 = vmatprep.subr.bf16.mxu0 %v1432_v0  ;;  %1215 = vmatprep.subr.bf16.mxu1 %v1432_v0  ;;  %v1348_v16 = vld [vmem:[#allocation2 + $0x28] sm:$0xff]   ;;  %v1349_v18 = vld [vmem:[#allocation2 + $0x70] sm:$0xff]   ;;  %v1351_v23 = vld [vmem:[#allocation2 + $0x78] sm:$0xff]   ;;  %s1131_s11 = sshll.u32 %s1673_s22, 3 }
  0x2f   : > { %s1534_s18 = scalar_lea.vmem %s1658_s0, %s1313_s15  ;;  %v1350_v22 = vld [vmem:[#allocation2 + $0x30] sm:$0xff]   ;;  %v1352_v26 = vld [vmem:[#allocation2 + $0x38] sm:$0xff]   ;;  %v1355_v28 = vld [vmem:[#allocation2 + $0x80] sm:$0xff]   ;;  %s266_s14 = scalar_lea.vmem %s1664_s6, %s1131_s11 }
  0x30   : > { %v268_v11 = vld [vmem:[%s1534_s18] sm:$0xf]  ;;  %v1540_v12 = vld [vmem:[%s1534_s18 + $0x4] sm:$0xf]  ;;  %v1357_v30 = vld [vmem:[#allocation2 + $0x88] sm:$0xff]  }
  0x31   : > { %1196 = vmatpush3.bf16.msra.mxu0 %v1339_v3  ;;  %1216 = vmatpush3.bf16.msra.mxu1 %v1340_v4  ;;  %v1073_v14 = vcombine.low %v268_v11, %v1540_v12  ;;  %v1544_v15 = vld [vmem:[%s1534_s18 + $0x8] ss:$0 sps:$4 sm:$0x11]   ;;  %v1356_v29 = vld [vmem:[#allocation2 + $0xc0] sm:$0xff]   ;;  %v1359_v32 = vld [vmem:[#allocation2 + $0x90] sm:$0xff]  }
  0x32   : > { %1197 = vmatprep.subr.bf16.mxu0 %v1432_v0  ;;  %1217 = vmatprep.subr.bf16.mxu1 %v1432_v0  ;;  %v321_v21 = vshll.u32 %v1544_v15, 16  ;;  %v1358_v31 = vld [vmem:[#allocation2 + $0xc8] sm:$0xff]   ;;  %v1360_v33 = vld [vmem:[#allocation2 + $0xd0] sm:$0xff]   ;;  %v1361_v34 = vld [vmem:[#allocation2 + $0x98] sm:$0xff]   ;;  %v528_v55 = vrot.slane %v1544_v15, 1 }
  0x33   : > { %v316_v17 = vshll.u32 %v1073_v14, 16  ;;  %v314_v19 = vshrl.u32 %v1073_v14, 16  ;;  %v1362_v35 = vld [vmem:[#allocation2 + $0xd8] sm:$0xff]   ;;  %v505_v36 = vld [vmem:[%s1534_s18] sm:$0xe]  ;;  %v1365_v41 = vld [vmem:[#allocation2 + $0xa8] sm:$0xff]  }
  0x34   : > { %v323_v25 = vrot.slane %v321_v21, 1  ;;  %v1363_v37 = vld [vmem:[#allocation2 + $0xa0] sm:$0xff]   ;;  %v1372_v38 = vld [vmem:[%s1534_s18 + $0x8] ss:$0 sps:$4 sm:$0x33]   ;;  %v1091_v40 = vcombine.low %v505_v36, %v1540_v12  ;;  %v1367_v47 = vld [vmem:[#allocation2 + $0xb0] sm:$0xff]  }
  0x35   : > { %1198 = vmatpush3.bf16.msra.mxu0 %v1341_v5  ;;  %1218 = vmatpush3.bf16.msra.mxu1 %v1342_v6  ;;  %v318_v20 = vrot.slane %v316_v17, 1  ;;  %v1364_v39 = vld [vmem:[#allocation2 + $0xe0] sm:$0xff]   ;;  %v1366_v42 = vld [vmem:[#allocation2 + $0xe8] sm:$0xff]   ;;  %v653_v45 = vshrl.u32 %v1372_v38, 16  ;;  %v656_v46 = vshll.u32 %v1372_v38, 16  ;;  %v1368_v48 = vld [vmem:[#allocation2 + $0xf0] sm:$0xff]  }
  0x36   : > { %1199 = vmatprep.subr.bf16.mxu0 %v1432_v0  ;;  %1219 = vmatprep.subr.bf16.mxu1 %v1432_v0  ;;  %v645_v43 = vshrl.u32 %v1091_v40, 16  ;;  %v648_v44 = vshll.u32 %v1091_v40, 16  ;;  %v1369_v53 = vld [vmem:[#allocation2 + $0xb8] sm:$0xff]   ;;  %v527_v54 = vrot.slane %v1091_v40, 1  ;;  %v1373_v61 = vld [vmem:[%s1662_s4] sm:$0xff]   ;;  %v1375_v63 = vld [vmem:[%s1662_s4 + $0x8] sm:$0xff]  }
  0x37   : > { %v319_v24 = vor.u32 %v318_v20, %v314_v19  ;;  %v655_v51 = vrot.slane %v653_v45, 1  ;;  %v658_v52 = vrot.slane %v656_v46, 2  ;;  %v1370_v56 = vld [vmem:[#allocation2 + $0xf8] sm:$0xff]   ;;  %v1374_v62 = vld [vmem:[%s1661_s3] sm:$0xff]   ;;  %v1376_v1 = vld [vmem:[%s1661_s3 + $0x8] sm:$0xff]  }
  0x38   : > { %v647_v49 = vrot.slane %v645_v43, 1  ;;  %v650_v50 = vrot.slane %v648_v44, 2  ;;  %v529_v59 = vsel %vm526_vm2, %v527_v54, %v528_v55  ;;  %v1377_v2 = vld [vmem:[%s1662_s4 + $0x10] sm:$0xff]   ;;  %v1379_v4 = vld [vmem:[%s1662_s4 + $0x18] sm:$0xff]   ;;  %v1381_v6 = vld [vmem:[%s1662_s4 + $0x20] sm:$0xff]  }
  0x39   : > { %1200 = vmatpush3.bf16.msra.mxu0 %v1343_v7  ;;  %1220 = vmatpush3.bf16.msra.mxu1 %v1344_v8  ;;  %v324_v27 = vsel %vm312_vm1, %v319_v24, %v323_v25  ;;  %v659_v58 = vor.u32 %v658_v52, %v655_v51  ;;  %v1378_v3 = vld [vmem:[%s1661_s3 + $0x10] sm:$0xff]   ;;  %v1380_v5 = vld [vmem:[%s1661_s3 + $0x18] sm:$0xff]   ;;  %v1382_v7 = vld [vmem:[%s1661_s3 + $0x20] sm:$0xff]  }
  0x3a   : > { %1201 = vmatprep.subr.bf16.mxu0 %v1432_v0  ;;  %1221 = vmatprep.subr.bf16.mxu1 %v1432_v0  ;;  %v651_v57 = vor.u32 %v650_v50, %v647_v49  ;;  %v1383_v8 = vld [vmem:[%s1662_s4 + $0x28] sm:$0xff]   ;;  %v1386_v11 = vld [vmem:[%s1661_s3 + $0x30] sm:$0xff]   ;;  %v1387_v12 = vld [vmem:[%s1662_s4 + $0x38] sm:$0xff]  }
  0x3b   : > { %v1126_v46 = vld [vmem:[%s1663_s5] ss:$0 sm:$0xff] }
  0x3c   : > { %v660_v60 = vsel %vm643_vm3, %v651_v57, %v659_v58 }
  0x3d   : > { %1202 = vmatpush3.bf16.msra.mxu0 %v1345_v9  ;;  %1222 = vmatpush3.bf16.msra.mxu1 %v1346_v10  ;;  %v1384_v9 = vld [vmem:[%s1661_s3 + $0x28] sm:$0xff]   ;;  %v1385_v10 = vld [vmem:[%s1662_s4 + $0x30] sm:$0xff]  }
  0x3e   : > { %1203 = vmatprep.subr.bf16.mxu0 %v1432_v0  ;;  %1223 = vmatprep.subr.bf16.mxu1 %v1432_v0 }
  0x41   : > { %1204 = vmatpush3.bf16.msra.mxu0 %v1347_v13  ;;  %1224 = vmatpush3.bf16.msra.mxu1 %v1348_v16  ;;  %v1388_v13 = vld [vmem:[%s1661_s3 + $0x38] sm:$0xff]  }
  0x42   : > { %1205 = vmatprep.subr.bf16.mxu0 %v1432_v0  ;;  %1225 = vmatprep.subr.bf16.mxu1 %v1432_v0 }
  0x45   : > { %1206 = vmatpush3.bf16.msra.mxu0 %v1349_v18  ;;  %1226 = vmatpush3.bf16.msra.mxu1 %v1350_v22 }
  0x46   : > { %1207 = vmatprep.subr.bf16.mxu0 %v1432_v0  ;;  %1227 = vmatprep.subr.bf16.mxu1 %v1432_v0 }
  0x49   : > { %1208 = vmatpush3.bf16.msra.mxu0 %v1351_v23  ;;  %1228 = vmatpush3.bf16.msra.mxu1 %v1352_v26 }
  0x4a   : > { %1233 = vmatprep.subr.bf16.mxu0 %v1432_v0  ;;  %1253 = vmatprep.subr.bf16.mxu1 %v1432_v0 }
  0x4c   : > { %1210 = vmatmul.mubr.bf16.vlgmr.msra.gmra.mrb[0].mxu0 %v324_v27  ;;  %1230 = vmatmul.mubr.bf16.vlgmr.msra.gmra.mrb[0].mxu1 %v1073_v14  ;;  %v1109_v27 = vld [vmem:[%s1660_s2] ss:$0 sm:$0xff] }
  0x4d   : > { %1234 = vmatpush3.bf16.msra.mxu0 %v1355_v28  ;;  %1254 = vmatpush3.bf16.msra.mxu1 %v1356_v29 }
  0x4e   : > { %1235 = vmatprep.subr.bf16.mxu0 %v1432_v0  ;;  %1255 = vmatprep.subr.bf16.mxu1 %v1432_v0 }
  0x4f   : > { %1249 = vmatprep.mubr.msk.bf16.mxu0 %vm1433_vm0, %v1432_v0  ;;  %1269 = vmatprep.mubr.msk.bf16.mxu1 %vm1433_vm0, %v1432_v0 }
  0x51   : > { %1236 = vmatpush3.bf16.msra.mxu0 %v1357_v30  ;;  %1256 = vmatpush3.bf16.msra.mxu1 %v1358_v31 }
  0x52   : > { %1237 = vmatprep.subr.bf16.mxu0 %v1432_v0  ;;  %1257 = vmatprep.subr.bf16.mxu1 %v1432_v0 }
  0x55   : > { %1238 = vmatpush3.bf16.msra.mxu0 %v1359_v32  ;;  %1258 = vmatpush3.bf16.msra.mxu1 %v1360_v33 }
  0x56   : > { %1239 = vmatprep.subr.bf16.mxu0 %v1432_v0  ;;  %1259 = vmatprep.subr.bf16.mxu1 %v1432_v0 }
  0x59   : > { %1240 = vmatpush3.bf16.msra.mxu0 %v1361_v34  ;;  %1260 = vmatpush3.bf16.msra.mxu1 %v1362_v35 }
  0x5a   : > { %1241 = vmatprep.subr.bf16.mxu0 %v1432_v0  ;;  %1261 = vmatprep.subr.bf16.mxu1 %v1432_v0 }
  0x5d   : > { %1242 = vmatpush3.bf16.msra.mxu0 %v1363_v37  ;;  %1262 = vmatpush3.bf16.msra.mxu1 %v1364_v39 }
  0x5e   : > { %1243 = vmatprep.subr.bf16.mxu0 %v1432_v0  ;;  %1263 = vmatprep.subr.bf16.mxu1 %v1432_v0 }
  0x61   : > { %1244 = vmatpush3.bf16.msra.mxu0 %v1365_v41  ;;  %1264 = vmatpush3.bf16.msra.mxu1 %v1366_v42 }
  0x62   : > { %1245 = vmatprep.subr.bf16.mxu0 %v1432_v0  ;;  %1265 = vmatprep.subr.bf16.mxu1 %v1432_v0 }
  0x65   : > { %1246 = vmatpush3.bf16.msra.mxu0 %v1367_v47  ;;  %1266 = vmatpush3.bf16.msra.mxu1 %v1368_v48 }
  0x66   : > { %1247 = vmatprep.subr.bf16.mxu0 %v1432_v0  ;;  %1267 = vmatprep.subr.bf16.mxu1 %v1432_v0 }
  0x69   : > { %1248 = vmatpush3.bf16.msra.mxu0 %v1369_v53  ;;  %1268 = vmatpush3.bf16.msra.mxu1 %v1370_v56 }
  0x6a   : > { %1273 = vmatprep.subr.bf16.mxu0 %v1432_v0  ;;  %1293 = vmatprep.subr.bf16.mxu1 %v1432_v0 }
  0x6c   : > { %1250 = vmatmul.mubr.bf16.vlgmr.msra.gmra.mrb[4].mxu0 %v529_v59  ;;  %1270 = vmatmul.mubr.bf16.vlgmr.msra.gmra.mrb[4].mxu1 %v660_v60 }
  0x6d   : > { %1289 = vmatprep.mubr.msk.bf16.mxu0 %vm1433_vm0, %v1432_v0  ;;  %1309 = vmatprep.mubr.msk.bf16.mxu1 %vm1433_vm0, %v1432_v0 }
  0x6e   : > { %1274 = vmatpush3.bf16.msra.mxu0 %v1373_v61  ;;  %1294 = vmatpush3.bf16.msra.mxu1 %v1374_v62 }
  0x6f   : > { %1275 = vmatprep.subr.bf16.mxu0 %v1432_v0  ;;  %1295 = vmatprep.subr.bf16.mxu1 %v1432_v0 }
  0x72   : > { %1276 = vmatpush3.bf16.msra.mxu0 %v1375_v63  ;;  %1296 = vmatpush3.bf16.msra.mxu1 %v1376_v1 }
  0x73   : > { %1277 = vmatprep.subr.bf16.mxu0 %v1432_v0  ;;  %1297 = vmatprep.subr.bf16.mxu1 %v1432_v0 }
  0x76   : > { %1278 = vmatpush3.bf16.msra.mxu0 %v1377_v2  ;;  %1298 = vmatpush3.bf16.msra.mxu1 %v1378_v3 }
  0x77   : > { %1279 = vmatprep.subr.bf16.mxu0 %v1432_v0  ;;  %1299 = vmatprep.subr.bf16.mxu1 %v1432_v0 }
  0x7a   : > { %1280 = vmatpush3.bf16.msra.mxu0 %v1379_v4  ;;  %1300 = vmatpush3.bf16.msra.mxu1 %v1380_v5 }
  0x7b   : > { %1281 = vmatprep.subr.bf16.mxu0 %v1432_v0  ;;  %1301 = vmatprep.subr.bf16.mxu1 %v1432_v0 }
  0x7e   : > { %1282 = vmatpush3.bf16.msra.mxu0 %v1381_v6  ;;  %1302 = vmatpush3.bf16.msra.mxu1 %v1382_v7 }
  0x7f   : > { %1283 = vmatprep.subr.bf16.mxu0 %v1432_v0  ;;  %1303 = vmatprep.subr.bf16.mxu1 %v1432_v0 }
  0x82   : > { %1284 = vmatpush3.bf16.msra.mxu0 %v1383_v8  ;;  %1304 = vmatpush3.bf16.msra.mxu1 %v1384_v9 }
  0x83   : > { %1285 = vmatprep.subr.bf16.mxu0 %v1432_v0  ;;  %1305 = vmatprep.subr.bf16.mxu1 %v1432_v0 }
  0x86   : > { %1286 = vmatpush3.bf16.msra.mxu0 %v1385_v10  ;;  %1306 = vmatpush3.bf16.msra.mxu1 %v1386_v11 }
  0x87   : > { %1287 = vmatprep.subr.bf16.mxu0 %v1432_v0  ;;  %1307 = vmatprep.subr.bf16.mxu1 %v1432_v0 }
  0x8a   : > { %1288 = vmatpush3.bf16.msra.mxu0 %v1387_v12  ;;  %1308 = vmatpush3.bf16.msra.mxu1 %v1388_v13 }
  0x8d   : > { %1290 = vmatmul.mubr.bf16.vlgmr.msra.gmra.mrb[8].mxu0 %v529_v59 }
 0x11f   : > { %v408_v14 = vpop.f32.mrb[0].mxu0  ;;  %v498_v15 = vpop.f32.mrb[0].mxu1 }
 0x120   : > { %v1211_v16 = vpop.f32.mrb[1].mxu0  ;;  %v499_v17 = vadd.f32 %v498_v15, %v408_v14  ;;  %v1231_v18 = vpop.f32.mrb[1].mxu1 }
 0x121   : > { %v411_v19 = vpop.f32.mrb[2].mxu0  ;;  %v501_v20 = vpop.f32.mrb[2].mxu1 }
 0x122   : > { %v1212_v21 = vpop.f32.mrb[3].mxu0  ;;  %v502_v22 = vadd.f32 %v501_v20, %v411_v19  ;;  %v1232_v23 = vpop.f32.mrb[3].mxu1 }
 0x13f   : > { %v613_v24 = vpop.f32.mrb[4].mxu0  ;;  %v744_v26 = vpop.f32.mrb[4].mxu1 }
 0x140   : > { %v620_v25 = vadd.f32 %v613_v24, %v499_v17  ;;  %v1251_v0 = vpop.f32.mrb[5].mxu0  ;;  %v1271_v28 = vpop.f32.mrb[5].mxu1 }
 0x141   : > { %v616_v29 = vpop.f32.mrb[6].mxu0  ;;  %v747_v32 = vpop.f32.mrb[6].mxu1 }
 0x142   : > { %v751_v30 = vadd.f32 %v744_v26, %v620_v25  ;;  %v621_v31 = vadd.f32 %v616_v29, %v502_v22  ;;  %v1252_v33 = vpop.f32.mrb[7].mxu0  ;;  %v1272_v34 = vpop.f32.mrb[7].mxu1 }
 0x144   : > { %v760_v35 = vadd.f32 %v1109_v27, %v751_v30  ;;  %v752_v36 = vadd.f32 %v747_v32, %v621_v31 }
 0x146   : > { %v761_v37 = vadd.f32 %v1109_v27, %v752_v36  ;;  %v762_v38 = vmax.f32 %v760_v35, 0.0 }
 0x148   : > { %v763_v39 = vmax.f32 %v761_v37, 0.0 }
 0x14a   : > { %v764_v40 = vpack.c.bf16 %v763_v39, %v762_v38 }
 0x14c   : > { %1310 = vmatmul.mubr.bf16.vlgmr.msra.gmra.mrb[8].mxu1 %v764_v40 }
 0x160   : > { %v879_v41 = vpop.f32.mrb[8].mxu0 }
 0x161   : > { %v1291_v42 = vpop.f32.mrb[9].mxu0 }
 0x162   : > { %v882_v43 = vpop.f32.mrb[10].mxu0 }
 0x163   : > { %v1292_v44 = vpop.f32.mrb[11].mxu0 }
 0x21f   : > { %v968_v45 = vpop.f32.mrb[8].mxu1 }
 0x220   : > { %v969_v47 = vadd.f32 %v968_v45, %v879_v41  ;;  %v1311_v48 = vpop.f32.mrb[9].mxu1 }
 0x221   : > { %v971_v49 = vpop.f32.mrb[10].mxu1 }
 0x222   : > { %v982_v50 = vadd.f32 %v1126_v46, %v969_v47  ;;  %v972_v51 = vadd.f32 %v971_v49, %v882_v43  ;;  %v1312_v52 = vpop.f32.mrb[11].mxu1 }
 0x224   : > { %v983_v53 = vadd.f32 %v1126_v46, %v972_v51  ;;  %v984_v54 = vmax.f32 %v982_v50, 0.0 }
 0x226   : > { %v985_v55 = vmax.f32 %v983_v53, 0.0 }
 0x228   : > { %v1137_v56 = vpack.c.bf16 %v985_v55, %v984_v54 }
 0x22a   : > { %1138 = vst [vmem:[%s266_s14] sm:$0xff] %v1137_v56  }
 0x22b PF: > { %s17_s21 = sadd.s32 1, %s1427_s21  }
 0x22c   : > { %p14_p3 = scmp.ge.s32.totalorder %s17_s21, 4  }
 0x22e   :  { %16 = sbr.rel (!%p14_p3) target bundleno = 1 (0x1), region = 82 }
 0x235   :  { %1017 = vsyncpa [#allocation3], 1 }
 0x236   :  { %1019 = vsyncpa [#allocation3 + $0x1], 1 }

// kernel: speaker_encoder_forward.12
= control target key start
LH: loop header
LB: loop body
LE: loop exit
PB: predicated region body
PF: predicated region fallthrough
CT: control target
= control target key end

     0   :  { %s1318_s15 = smov 0   ;;  %s1540_s0 = inlined_call_operand.vmem [shape: bf16[2,2,10,128], index: 0, kind: input, shape index: {}]   ;;  %s1541_s1 = inlined_call_operand.vmem [shape: bf16[5,128,128], index: 1, kind: input, shape index: {}]   ;;  %s1542_s2 = inlined_call_operand.vmem [shape: f32[1,128], index: 2, kind: input, shape index: {}]   ;;  %s1543_s3 = inlined_call_operand.vmem [shape: bf16[2,8,2,128], index: 3, kind: input, shape index: {}]   ;;  %s1544_s4 = inlined_call_operand.vmem [shape: bf16[2,8,128], index: 4, kind: output, shape index: {}]  }
   0x1 LB: > { %s962_s16 = sadd.s32 4294967295, %s1289_s15   ;;  %p966_p0 = scmp.ge.s32.totalorder %s1289_s15, 1  ;;  %s1289_s15 = sphi %s1318_s15, %s14_s15  }
   0x2   : > { %p171_p1 = scmp.lt.s32.totalorder %s1289_s15, 3 }
   0x4   : > { %p172_p2 = pnand %p966_p0, %p171_p1 }
   0x5   : > { %v1240_v0 = vld [vmem:[%s1541_s1 + $0x40] sm:$0xff] (!%p172_p2)   ;;  %v1291_v1 = vmov (!%p172_p2), 0.0   ;;  %v1242_v3 = vld [vmem:[%s1541_s1 + $0x48] sm:$0xff] (!%p172_p2)   ;;  %vm1292_vm0 = vmmov (!%p172_p2), 0   ;;  %v1244_v5 = vld [vmem:[%s1541_s1 + $0x50] sm:$0xff] (!%p172_p2)   ;;  %p200_p3 = scmp.lt.s32.totalorder (!%p172_p2), %s962_s16, 1 }
   0x6   : > { %175 = sbr.rel (%p172_p2) target bundleno = 325 (0x145), region = 36  ;;  %1130 = vmatprep.subr.bf16.mxu0 (!%p172_p2), %v1291_v1  ;;  %1150 = vmatprep.subr.bf16.mxu1 (!%p172_p2), %v1291_v1  ;;  %v1241_v2 = vld [vmem:[%s1541_s1] sm:$0xff] (!%p172_p2)   ;;  %v1243_v4 = vld [vmem:[%s1541_s1 + $0x8] sm:$0xff] (!%p172_p2)   ;;  %v1245_v6 = vld [vmem:[%s1541_s1 + $0x10] sm:$0xff] (!%p172_p2)   ;;  %vm805_vm1 = vcmask (!%p172_p2), 1041408   ;;  %vm879_vm2 = vcmask (!%p172_p2), 1041409  }
   0x7   : > { %1131 = vmatpush3.bf16.msra.mxu0 (!%p172_p2), %v1240_v0  ;;  %1146 = vmatprep.mubr.msk.bf16.mxu0 (!%p172_p2), %vm1292_vm0, %v1291_v1  ;;  %v1246_v7 = vld [vmem:[%s1541_s1 + $0x58] sm:$0xff] (!%p172_p2)   ;;  %v1248_v9 = vld [vmem:[%s1541_s1 + $0x60] sm:$0xff] (!%p172_p2)   ;;  %v1250_v11 = vld [vmem:[%s1541_s1 + $0x68] sm:$0xff] (!%p172_p2)   ;;  %vm881_vm3 = vcmask (!%p172_p2), 1042434   ;;  %vm883_vm4 = vcmask (!%p172_p2), 1043459   ;;  %vm885_vm5 = vcmask (!%p172_p2), 1044484  }
   0x8   : > { %1151 = vmatpush3.bf16.msra.mxu1 (!%p172_p2), %v1241_v2  ;;  %1132 = vmatprep.subr.bf16.mxu0 (!%p172_p2), %v1291_v1  ;;  %v1247_v8 = vld [vmem:[%s1541_s1 + $0x18] sm:$0xff] (!%p172_p2)   ;;  %v1249_v10 = vld [vmem:[%s1541_s1 + $0x20] sm:$0xff] (!%p172_p2)   ;;  %v1251_v12 = vld [vmem:[%s1541_s1 + $0x28] sm:$0xff] (!%p172_p2)   ;;  %vm887_vm6 = vcmask (!%p172_p2), 1045509   ;;  %vm889_vm7 = vcmask (!%p172_p2), 1046534   ;;  %vm891_vm8 = vcmask (!%p172_p2), 1047559  }
   0x9   : > { %1152 = vmatprep.subr.bf16.mxu1 (!%p172_p2), %v1291_v1  ;;  %1166 = vmatprep.mubr.msk.bf16.mxu1 (!%p172_p2), %vm1292_vm0, %v1291_v1  ;;  %v1252_v13 = vld [vmem:[%s1541_s1 + $0x70] sm:$0xff] (!%p172_p2)   ;;  %v1254_v15 = vld [vmem:[%s1541_s1 + $0x78] sm:$0xff] (!%p172_p2)   ;;  %v1256_v19 = vld [vmem:[%s1541_s1 + $0x80] sm:$0xff] (!%p172_p2)  }
   0xa   : > { %v1253_v14 = vld [vmem:[%s1541_s1 + $0x30] sm:$0xff] (!%p172_p2)   ;;  %v1255_v16 = vld [vmem:[%s1541_s1 + $0x38] sm:$0xff] (!%p172_p2)   ;;  %v1257_v20 = vld [vmem:[%s1541_s1 + $0xc0] sm:$0xff] (!%p172_p2)  }
   0xb   : > { %1133 = vmatpush3.bf16.msra.mxu0 (!%p172_p2), %v1242_v3  ;;  %v1258_v21 = vld [vmem:[%s1541_s1 + $0x88] sm:$0xff] (!%p172_p2)   ;;  %v1260_v23 = vld [vmem:[%s1541_s1 + $0x90] sm:$0xff] (!%p172_p2)   ;;  %v1262_v25 = vld [vmem:[%s1541_s1 + $0x98] sm:$0xff] (!%p172_p2)  }
   0xc   : > { %1153 = vmatpush3.bf16.msra.mxu1 (!%p172_p2), %v1243_v4  ;;  %1134 = vmatprep.subr.bf16.mxu0 (!%p172_p2), %v1291_v1  ;;  %v1259_v22 = vld [vmem:[%s1541_s1 + $0xc8] sm:$0xff] (!%p172_p2)   ;;  %v1261_v24 = vld [vmem:[%s1541_s1 + $0xd0] sm:$0xff] (!%p172_p2)   ;;  %v1263_v26 = vld [vmem:[%s1541_s1 + $0xd8] sm:$0xff] (!%p172_p2)  }
   0xd   : > { %1154 = vmatprep.subr.bf16.mxu1 %v1291_v1  ;;  %s1546_s16 = smov (!%p200_p3, %s962_s16), 1  ;;  %v1264_v27 = vld [vmem:[%s1541_s1 + $0xa0] sm:$0xff]   ;;  %v1266_v32 = vld [vmem:[%s1541_s1 + $0xa8] sm:$0xff]   ;;  %v1268_v36 = vld [vmem:[%s1541_s1 + $0xb0] sm:$0xff]  }
   0xe   : > { %s1084_s19 = sshll.u32 %s1546_s16, 4  ;;  %v1265_v30 = vld [vmem:[%s1541_s1 + $0xe0] sm:$0xff]   ;;  %v1267_v34 = vld [vmem:[%s1541_s1 + $0xe8] sm:$0xff]   ;;  %v1269_v38 = vld [vmem:[%s1541_s1 + $0xf0] sm:$0xff]   ;;  %s970_s10 = sshll.u32 %s1546_s16, 2 }
   0xf   : > { %1135 = vmatpush3.bf16.msra.mxu0 %v1244_v5  ;;  %s1396_s24 = scalar_lea.vmem %s1540_s0, %s1084_s19  ;;  %v1270_v41 = vld [vmem:[%s1541_s1 + $0xb8] sm:$0xff]   ;;  %v1273_v46 = vld [vmem:[%s1541_s1 + $0x100] sm:$0xff]   ;;  %v1275_v48 = vld [vmem:[%s1541_s1 + $0x108] sm:$0xff]   ;;  %s212_s13 = scalar_lea.vmem %s1544_s4, %s970_s10 }
  0x10   : > { %1155 = vmatpush3.bf16.msra.mxu1 %v1245_v6  ;;  %1136 = vmatprep.subr.bf16.mxu0 %v1291_v1  ;;  %v971_v17 = vld [vmem:[%s1396_s24 + $0x8] sm:$0xf]  ;;  %v214_v18 = vld [vmem:[%s1396_s24] sm:$0xf]  ;;  %v1449_v29 = vld [vmem:[%s1396_s24 + $0x4] sm:$0x1] }
  0x11   : > { %1156 = vmatprep.subr.bf16.mxu1 %v1291_v1  ;;  %v426_v28 = vld [vmem:[%s1396_s24] sm:$0xf]  ;;  %v1274_v33 = vld [vmem:[%s1396_s24 + $0x8] sm:$0x1f]   ;;  %v1271_v44 = vld [vmem:[%s1541_s1 + $0xf8] sm:$0xff]  }
  0x12   : > { %v1020_v31 = vcombine.low %v426_v28, %v1449_v29  ;;  %v574_v37 = vshll.u32 %v1274_v33, 16  ;;  %v572_v42 = vshrl.u32 %v1274_v33, 16  ;;  %v1276_v49 = vld [vmem:[%s1541_s1 + $0x110] sm:$0xff]   ;;  %v1277_v50 = vld [vmem:[%s1541_s1 + $0x118] sm:$0xff]   ;;  %v1278_v51 = vld [vmem:[%s1541_s1 + $0x120] sm:$0xff]  }
  0x13   : > { %1137 = vmatpush3.bf16.msra.mxu0 %v1246_v7  ;;  %v1279_v52 = vld [vmem:[%s1541_s1 + $0x128] sm:$0xff]   ;;  %v1280_v53 = vld [vmem:[%s1541_s1 + $0x130] sm:$0xff]   ;;  %v668_v54 = vld [vmem:[%s1396_s24] sm:$0xe]  ;;  %s969_s24 = sshll.u32 %s1546_s16, 3 }
  0x14   : > { %1157 = vmatpush3.bf16.msra.mxu1 %v1247_v8  ;;  %1138 = vmatprep.subr.bf16.mxu0 %v1291_v1  ;;  %v453_v35 = vshll.u32 %v1020_v31, 16  ;;  %v451_v39 = vshrl.u32 %v1020_v31, 16  ;;  %v576_v43 = vrot.slane %v574_v37, 1  ;;  %v1072_v55 = vcombine.low %v668_v54, %v1449_v29  ;;  %v1281_v56 = vld [vmem:[%s1541_s1 + $0x138] sm:$0xff]   ;;  %s208_s7 = scalar_lea.vmem %s1543_s3, %s969_s24 }
  0x15   : > { %1158 = vmatprep.subr.bf16.mxu1 %v1291_v1  ;;  %v789_v4 = vld [vmem:[%s208_s7] sm:$0x1]  ;;  %v790_v5 = vld [vmem:[%s208_s7 + $0x1] sm:$0x1]  ;;  %v792_v8 = vld [vmem:[%s208_s7 + $0x3] sm:$0x1] }
  0x16   : > { %v455_v40 = vrot.slane %v453_v35, 1  ;;  %v577_v47 = vor.u32 %v576_v43, %v572_v42  ;;  %v689_v57 = vrot.slane %v1072_v55, 1  ;;  %v797_v6 = vunpack.c.l.bf16 %v789_v4  ;;  %v796_v28 = vld [vmem:[%s208_s7 + $0x7] sm:$0x1] }
  0x17   : > { %1139 = vmatpush3.bf16.msra.mxu0 %v1248_v9  ;;  %v798_v7 = vunpack.c.l.bf16 %v790_v5 }
  0x18   : > { %1159 = vmatpush3.bf16.msra.mxu1 %v1249_v10  ;;  %1140 = vmatprep.subr.bf16.mxu0 %v1291_v1  ;;  %v456_v45 = vor.u32 %v455_v40, %v451_v39  ;;  %v806_v10 = vsel %vm805_vm1, %v797_v6, 0.0  ;;  %v804_v39 = vunpack.c.l.bf16 %v796_v28 }
  0x19   : > { %1160 = vmatprep.subr.bf16.mxu1 %v1291_v1 }
  0x1a   : > { %v855_v55 = vsel %vm805_vm1, %v804_v39, 0.0 }
  0x1b   : > { %1141 = vmatpush3.bf16.msra.mxu0 %v1250_v11  ;;  %v813_v11 = vsel %vm805_vm1, %v798_v7, 0.0 }
  0x1c   : > { %1161 = vmatpush3.bf16.msra.mxu1 %v1251_v12  ;;  %1142 = vmatprep.subr.bf16.mxu0 %v1291_v1  ;;  %v793_v12 = vld [vmem:[%s208_s7 + $0x4] sm:$0x1] }
  0x1d   : > { %1162 = vmatprep.subr.bf16.mxu1 %v1291_v1 }
  0x1f   : > { %1143 = vmatpush3.bf16.msra.mxu0 %v1252_v13  ;;  %v800_v13 = vunpack.c.l.bf16 %v792_v8 }
  0x20   : > { %1163 = vmatpush3.bf16.msra.mxu1 %v1253_v14  ;;  %1144 = vmatprep.subr.bf16.mxu0 %v1291_v1  ;;  %v807_v14 = vrot.slane %v806_v10, 4 }
  0x21   : > { %1164 = vmatprep.subr.bf16.mxu1 %v1291_v1 }
  0x23   : > { %1145 = vmatpush3.bf16.msra.mxu0 %v1254_v15  ;;  %v814_v15 = vrot.slane %v813_v11, 4 }
  0x24   : > { %1165 = vmatpush3.bf16.msra.mxu1 %v1255_v16  ;;  %1170 = vmatprep.subr.bf16.mxu0 %v1291_v1 }
  0x25   : > { %1190 = vmatprep.subr.bf16.mxu1 %v1291_v1 }
  0x26   : > { %1147 = vmatmul.mubr.bf16.vlgmr.msra.gmra.mrb[0].mxu0 %v971_v17  ;;  %v794_v17 = vld [vmem:[%s208_s7 + $0x5] sm:$0x1] }
  0x27   : > { %1167 = vmatmul.mubr.bf16.vlgmr.msra.gmra.mrb[0].mxu1 %v214_v18  ;;  %1171 = vmatpush3.bf16.msra.mxu0 %v1256_v19  ;;  %v801_v18 = vunpack.c.l.bf16 %v793_v12 }
  0x28   : > { %1191 = vmatpush3.bf16.msra.mxu1 %v1257_v20  ;;  %1172 = vmatprep.subr.bf16.mxu0 %v1291_v1  ;;  %v827_v20 = vsel %vm805_vm1, %v800_v13, 0.0 }
  0x29   : > { %1192 = vmatprep.subr.bf16.mxu1 %v1291_v1  ;;  %1186 = vmatprep.mubr.msk.bf16.mxu0 %vm1292_vm0, %v1291_v1 }
  0x2a   : > { %1206 = vmatprep.mubr.msk.bf16.mxu1 %vm1292_vm0, %v1291_v1 }
  0x2b   : > { %1173 = vmatpush3.bf16.msra.mxu0 %v1258_v21  ;;  %v808_v21 = vadd.f32 %v807_v14, %v806_v10 }
  0x2c   : > { %1193 = vmatpush3.bf16.msra.mxu1 %v1259_v22  ;;  %1174 = vmatprep.subr.bf16.mxu0 %v1291_v1  ;;  %v815_v22 = vadd.f32 %v814_v15, %v813_v11 }
  0x2d   : > { %1194 = vmatprep.subr.bf16.mxu1 %v1291_v1 }
  0x2e   : > { %v816_v31 = vrot.slane %v815_v22, 2 }
  0x2f   : > { %1175 = vmatpush3.bf16.msra.mxu0 %v1260_v23  ;;  %v795_v23 = vld [vmem:[%s208_s7 + $0x6] sm:$0x1] }
  0x30   : > { %1195 = vmatpush3.bf16.msra.mxu1 %v1261_v24  ;;  %1176 = vmatprep.subr.bf16.mxu0 %v1291_v1  ;;  %v802_v24 = vunpack.c.l.bf16 %v794_v17  ;;  %v803_v29 = vunpack.c.l.bf16 %v795_v23 }
  0x31   : > { %1196 = vmatprep.subr.bf16.mxu1 %v1291_v1 }
  0x32   : > { %v841_v33 = vsel %vm805_vm1, %v802_v24, 0.0 }
  0x33   : > { %1177 = vmatpush3.bf16.msra.mxu0 %v1262_v25  ;;  %v828_v25 = vrot.slane %v827_v20, 4 }
  0x34   : > { %1197 = vmatpush3.bf16.msra.mxu1 %v1263_v26  ;;  %1178 = vmatprep.subr.bf16.mxu0 %v1291_v1  ;;  %v834_v26 = vsel %vm805_vm1, %v801_v18, 0.0 }
  0x35   : > { %1198 = vmatprep.subr.bf16.mxu1 %v1291_v1  ;;  %v829_v35 = vadd.f32 %v828_v25, %v827_v20 }
  0x37   : > { %1179 = vmatpush3.bf16.msra.mxu0 %v1264_v27 }
  0x38   : > { %1199 = vmatpush3.bf16.msra.mxu1 %v1265_v30  ;;  %1180 = vmatprep.subr.bf16.mxu0 %v1291_v1  ;;  %v809_v30 = vrot.slane %v808_v21, 2 }
  0x39   : > { %1200 = vmatprep.subr.bf16.mxu1 %v1291_v1 }
  0x3a   : > { %v810_v43 = vadd.f32 %v809_v30, %v808_v21 }
  0x3b   : > { %1181 = vmatpush3.bf16.msra.mxu0 %v1266_v32  ;;  %v835_v32 = vrot.slane %v834_v26, 4 }
  0x3c   : > { %1201 = vmatpush3.bf16.msra.mxu1 %v1267_v34  ;;  %1182 = vmatprep.subr.bf16.mxu0 %v1291_v1 }
  0x3d   : > { %1202 = vmatprep.subr.bf16.mxu1 %v1291_v1 }
  0x3f   : > { %1183 = vmatpush3.bf16.msra.mxu0 %v1268_v36 }
  0x40   : > { %1203 = vmatpush3.bf16.msra.mxu1 %v1269_v38  ;;  %1184 = vmatprep.subr.bf16.mxu0 %v1291_v1 }
  0x41   : > { %1204 = vmatprep.subr.bf16.mxu1 %v1291_v1 }
  0x43   : > { %1185 = vmatpush3.bf16.msra.mxu0 %v1270_v41 }
  0x44   : > { %1205 = vmatpush3.bf16.msra.mxu1 %v1271_v44  ;;  %1210 = vmatprep.subr.bf16.mxu0 %v1291_v1  ;;  %v817_v44 = vadd.f32 %v816_v31, %v815_v22 }
  0x46   : > { %1187 = vmatmul.mubr.bf16.vlgmr.msra.gmra.mrb[4].mxu0 %v456_v45  ;;  %v842_v45 = vrot.slane %v841_v33, 4 }
  0x47   : > { %1211 = vmatpush3.bf16.msra.mxu0 %v1273_v46  ;;  %1207 = vmatmul.mubr.bf16.vlgmr.msra.gmra.mrb[4].mxu1 %v577_v47  ;;  %v848_v46 = vsel %vm805_vm1, %v803_v29, 0.0 }
  0x48   : > { %1212 = vmatprep.subr.bf16.mxu0 %v1291_v1  ;;  %1226 = vmatprep.mubr.msk.bf16.mxu0 %vm1292_vm0, %v1291_v1  ;;  %v849_v54 = vrot.slane %v848_v46, 4 }
  0x4b   : > { %1213 = vmatpush3.bf16.msra.mxu0 %v1275_v48 }
  0x4c   : > { %1214 = vmatprep.subr.bf16.mxu0 %v1291_v1 }
  0x4f   : > { %1215 = vmatpush3.bf16.msra.mxu0 %v1276_v49 }
  0x50   : > { %1216 = vmatprep.subr.bf16.mxu0 %v1291_v1 }
  0x53   : > { %1217 = vmatpush3.bf16.msra.mxu0 %v1277_v50  ;;  %v836_v50 = vadd.f32 %v835_v32, %v834_v26 }
  0x54   : > { %1218 = vmatprep.subr.bf16.mxu0 %v1291_v1 }
  0x57   : > { %1219 = vmatpush3.bf16.msra.mxu0 %v1278_v51 }
  0x58   : > { %1220 = vmatprep.subr.bf16.mxu0 %v1291_v1 }
  0x5b   : > { %1221 = vmatpush3.bf16.msra.mxu0 %v1279_v52  ;;  %v830_v52 = vrot.slane %v829_v35, 2 }
  0x5c   : > { %1222 = vmatprep.subr.bf16.mxu0 %v1291_v1 }
  0x5f   : > { %1223 = vmatpush3.bf16.msra.mxu0 %v1280_v53 }
  0x60   : > { %1224 = vmatprep.subr.bf16.mxu0 %v1291_v1  ;;  %v791_v1 = vld [vmem:[%s208_s7 + $0x2] sm:$0x1] }
  0x61   : > { %v799_v9 = vunpack.c.l.bf16 %v791_v1 }
  0x63   : > { %1225 = vmatpush3.bf16.msra.mxu0 %v1281_v56  ;;  %v820_v16 = vsel %vm805_vm1, %v799_v9, 0.0  ;;  %v811_v56 = vrot.slane %v810_v43, 1 }
  0x64   : > { %v821_v19 = vrot.slane %v820_v16, 4 }
  0x66   : > { %1227 = vmatmul.mubr.bf16.vlgmr.msra.gmra.mrb[8].mxu0 %v689_v57  ;;  %v822_v27 = vadd.f32 %v821_v19, %v820_v16  ;;  %v818_v57 = vrot.slane %v817_v44, 1 }
  0x68   : > { %v823_v40 = vrot.slane %v822_v27, 2 }
  0x6a   : > { %v824_v53 = vadd.f32 %v823_v40, %v822_v27 }
  0xf9   : > { %v332_v58 = vpop.f32.mrb[0].mxu0 }
  0xfa   : > { %v1148_v59 = vpop.f32.mrb[1].mxu0  ;;  %v420_v60 = vpop.f32.mrb[0].mxu1 }
  0xfb   : > { %v421_v61 = vadd.f32 %v420_v60, %v332_v58  ;;  %v335_v62 = vpop.f32.mrb[2].mxu0  ;;  %v1168_v63 = vpop.f32.mrb[1].mxu1  ;;  %v843_v58 = vadd.f32 %v842_v45, %v841_v33  ;;  %v837_v59 = vrot.slane %v836_v50, 2  ;;  %v831_v60 = vadd.f32 %v830_v52, %v829_v35 }
  0xfc   : > { %v1149_v0 = vpop.f32.mrb[3].mxu0  ;;  %v423_v2 = vpop.f32.mrb[2].mxu1  ;;  %v825_v62 = vrot.slane %v824_v53, 1  ;;  %v850_v63 = vadd.f32 %v849_v54, %v848_v46 }
  0xfd   : > { %v1169_v3 = vpop.f32.mrb[3].mxu1  ;;  %v812_v0 = vadd.f32 %v811_v56, %v810_v43  ;;  %v819_v2 = vadd.f32 %v818_v57, %v817_v44  ;;  %v838_v4 = vadd.f32 %v837_v59, %v836_v50  ;;  %v832_v5 = vrot.slane %v831_v60, 1 }
  0xfe   : > { %v844_v3 = vrot.slane %v843_v58, 2  ;;  %v826_v6 = vadd.f32 %v825_v62, %v824_v53  ;;  %v851_v7 = vrot.slane %v850_v63, 2 }
  0xff   : > { %v863_v9 = vmul.f32 0.5, %v812_v0  ;;  %v864_v10 = vmul.f32 0.5, %v819_v2  ;;  %v839_v11 = vrot.slane %v838_v4, 1  ;;  %v833_v12 = vadd.f32 %v832_v5, %v831_v60 }
 0x100   : > { %v845_v8 = vadd.f32 %v844_v3, %v843_v58  ;;  %v852_v14 = vadd.f32 %v851_v7, %v850_v63  ;;  %v865_v15 = vmul.f32 0.5, %v826_v6 }
 0x101   : > { %v880_v17 = vsel %vm879_vm2, %v864_v10, %v863_v9  ;;  %v840_v18 = vadd.f32 %v839_v11, %v838_v4  ;;  %v866_v20 = vmul.f32 0.5, %v833_v12 }
 0x102   : > { %v846_v16 = vrot.slane %v845_v8, 1  ;;  %v853_v21 = vrot.slane %v852_v14, 1  ;;  %v882_v22 = vsel %vm881_vm3, %v865_v15, %v880_v17 }
 0x103   : > { %v867_v24 = vmul.f32 0.5, %v840_v18  ;;  %v884_v26 = vsel %vm883_vm4, %v866_v20, %v882_v22 }
 0x104   : > { %v847_v23 = vadd.f32 %v846_v16, %v845_v8  ;;  %v854_v27 = vadd.f32 %v853_v21, %v852_v14 }
 0x105   : > { %v886_v29 = vsel %vm885_vm5, %v867_v24, %v884_v26 }
 0x106   : > { %v868_v28 = vmul.f32 0.5, %v847_v23  ;;  %v869_v31 = vmul.f32 0.5, %v854_v27 }
 0x108   : > { %v888_v32 = vsel %vm887_vm6, %v868_v28, %v886_v29 }
 0x119   : > { %v540_v34 = vpop.f32.mrb[4].mxu0 }
 0x11a   : > { %v546_v36 = vadd.f32 %v540_v34, %v421_v61  ;;  %v1188_v37 = vpop.f32.mrb[5].mxu0  ;;  %v661_v38 = vpop.f32.mrb[4].mxu1  ;;  %v856_v61 = vrot.slane %v855_v55, 4  ;;  %v1081_v34 = vld [vmem:[%s1542_s2] ss:$0 sm:$0xff] }
 0x11b   : > { %v543_v41 = vpop.f32.mrb[6].mxu0  ;;  %v1208_v42 = vpop.f32.mrb[5].mxu1  ;;  %v890_v37 = vsel %vm889_vm7, %v869_v31, %v888_v32 }
 0x11c   : > { %v667_v47 = vadd.f32 %v661_v38, %v546_v36  ;;  %v1189_v48 = vpop.f32.mrb[7].mxu0  ;;  %v664_v49 = vpop.f32.mrb[6].mxu1  ;;  %v857_v1 = vadd.f32 %v856_v61, %v855_v55 }
 0x11d   : > { %v1209_v51 = vpop.f32.mrb[7].mxu1 }
 0x11e   : > { %v858_v13 = vrot.slane %v857_v1, 2 }
 0x120   : > { %v859_v19 = vadd.f32 %v858_v13, %v857_v1 }
 0x122   : > { %v860_v25 = vrot.slane %v859_v19, 1 }
 0x124   : > { %v861_v30 = vadd.f32 %v860_v25, %v859_v19 }
 0x126   : > { %v870_v35 = vmul.f32 0.5, %v861_v30 }
 0x128   : > { %v892_v42 = vsel %vm891_vm8, %v870_v35, %v890_v37 }
 0x139   : > { %v773_v33 = vpop.f32.mrb[8].mxu0 }
 0x13a   : > { %v779_v36 = vadd.f32 %v773_v33, %v667_v47  ;;  %v1228_v38 = vpop.f32.mrb[9].mxu0 }
 0x13b   : > { %v776_v39 = vpop.f32.mrb[10].mxu0 }
 0x13c   : > { %v787_v40 = vadd.f32 %v1081_v34, %v779_v36  ;;  %v1229_v41 = vpop.f32.mrb[11].mxu0 }
 0x13e   : > { %v788_v43 = vmax.f32 %v787_v40, 0.0 }
 0x140   : > { %v894_v44 = vadd.f32 %v892_v42, %v788_v43 }
 0x142   : > { %v895_v45 = vpack.c.bf16 %v894_v44, %v894_v44 }
 0x144   : > { %896 = vst [vmem:[%s212_s13] sm:$0xf] %v895_v45 }
 0x145 PF: > { %s14_s15 = sadd.s32 1, %s1289_s15  }
 0x146   : > { %p11_p4 = scmp.ge.s32.totalorder %s14_s15, 4  }
 0x148   :  { %13 = sbr.rel (!%p11_p4) target bundleno = 1 (0x1), region = 74 }

// kernel: speaker_encoder_forward.13
= control target key start
LH: loop header
LB: loop body
LE: loop exit
PB: predicated region body
PF: predicated region fallthrough
CT: control target
= control target key end

     0   :  { %s1150_s12 = smov 0   ;;  %s1355_s0 = inlined_call_operand.vmem [shape: bf16[2,1,12,128], index: 0, kind: input, shape index: {}]   ;;  %s1356_s1 = inlined_call_operand.vmem [shape: bf16[5,128,128], index: 1, kind: input, shape index: {}]   ;;  %s1357_s2 = inlined_call_operand.vmem [shape: f32[1,128], index: 2, kind: input, shape index: {}]   ;;  %s1358_s3 = inlined_call_operand.vmem [shape: bf16[2,8,128], index: 3, kind: output, shape index: {}]  }
   0x1 LB: > { %s801_s13 = sadd.s32 4294967295, %s1126_s12   ;;  %p805_p0 = scmp.ge.s32.totalorder %s1126_s12, 1  ;;  %s1126_s12 = sphi %s1150_s12, %s13_s12  }
   0x2   : > { %p137_p1 = scmp.lt.s32.totalorder %s1126_s12, 3 }
   0x4   : > { %p138_p2 = pnand %p805_p0, %p137_p1 }
   0x5   : > { %v1076_v0 = vld [vmem:[%s1356_s1 + $0x40] sm:$0xff] (!%p138_p2)   ;;  %v1128_v1 = vmov (!%p138_p2), 0.0   ;;  %v1078_v3 = vld [vmem:[%s1356_s1 + $0x48] sm:$0xff] (!%p138_p2)   ;;  %vm1129_vm0 = vmmov (!%p138_p2), 0   ;;  %p160_p3 = scmp.lt.s32.totalorder (!%p138_p2), %s801_s13, 1  ;;  %v1080_v5 = vld [vmem:[%s1356_s1 + $0x50] sm:$0xff] (!%p138_p2)  }
   0x6   : > { %141 = sbr.rel (%p138_p2) target bundleno = 323 (0x143), region = 32  ;;  %966 = vmatprep.subr.bf16.mxu0 (!%p138_p2), %v1128_v1  ;;  %986 = vmatprep.subr.bf16.mxu1 (!%p138_p2), %v1128_v1  ;;  %v1077_v2 = vld [vmem:[%s1356_s1] sm:$0xff] (!%p138_p2)   ;;  %v1079_v4 = vld [vmem:[%s1356_s1 + $0x8] sm:$0xff] (!%p138_p2)   ;;  %v1081_v6 = vld [vmem:[%s1356_s1 + $0x10] sm:$0xff] (!%p138_p2)  }
   0x7   : > { %967 = vmatpush3.bf16.msra.mxu0 (!%p138_p2), %v1076_v0  ;;  %982 = vmatprep.mubr.msk.bf16.mxu0 (!%p138_p2), %vm1129_vm0, %v1128_v1  ;;  %v1082_v7 = vld [vmem:[%s1356_s1 + $0x58] sm:$0xff] (!%p138_p2)   ;;  %v1084_v9 = vld [vmem:[%s1356_s1 + $0x60] sm:$0xff] (!%p138_p2)   ;;  %v1086_v14 = vld [vmem:[%s1356_s1 + $0x68] sm:$0xff] (!%p138_p2)  }
   0x8   : > { %987 = vmatpush3.bf16.msra.mxu1 (!%p138_p2), %v1077_v2  ;;  %968 = vmatprep.subr.bf16.mxu0 (!%p138_p2), %v1128_v1  ;;  %v1083_v8 = vld [vmem:[%s1356_s1 + $0x18] sm:$0xff] (!%p138_p2)   ;;  %v1085_v10 = vld [vmem:[%s1356_s1 + $0x20] sm:$0xff] (!%p138_p2)   ;;  %v1087_v15 = vld [vmem:[%s1356_s1 + $0x28] sm:$0xff] (!%p138_p2)  }
   0x9   : > { %988 = vmatprep.subr.bf16.mxu1 (!%p138_p2), %v1128_v1  ;;  %1002 = vmatprep.mubr.msk.bf16.mxu1 (!%p138_p2), %vm1129_vm0, %v1128_v1  ;;  %v1088_v17 = vld [vmem:[%s1356_s1 + $0x70] sm:$0xff] (!%p138_p2)   ;;  %v1090_v21 = vld [vmem:[%s1356_s1 + $0x78] sm:$0xff] (!%p138_p2)   ;;  %v1093_v24 = vld [vmem:[%s1356_s1 + $0x80] sm:$0xff] (!%p138_p2)  }
   0xa   : > { %v1089_v18 = vld [vmem:[%s1356_s1 + $0x30] sm:$0xff] (!%p138_p2)   ;;  %v1091_v22 = vld [vmem:[%s1356_s1 + $0x38] sm:$0xff] (!%p138_p2)   ;;  %v1094_v25 = vld [vmem:[%s1356_s1 + $0xc0] sm:$0xff] (!%p138_p2)  }
   0xb   : > { %969 = vmatpush3.bf16.msra.mxu0 (!%p138_p2), %v1078_v3  ;;  %v1095_v26 = vld [vmem:[%s1356_s1 + $0x88] sm:$0xff] (!%p138_p2)   ;;  %v1097_v28 = vld [vmem:[%s1356_s1 + $0x90] sm:$0xff] (!%p138_p2)   ;;  %v1099_v30 = vld [vmem:[%s1356_s1 + $0x98] sm:$0xff] (!%p138_p2)  }
   0xc   : > { %989 = vmatpush3.bf16.msra.mxu1 (!%p138_p2), %v1079_v4  ;;  %970 = vmatprep.subr.bf16.mxu0 (!%p138_p2), %v1128_v1  ;;  %v1096_v27 = vld [vmem:[%s1356_s1 + $0xc8] sm:$0xff] (!%p138_p2)   ;;  %v1098_v29 = vld [vmem:[%s1356_s1 + $0xd0] sm:$0xff] (!%p138_p2)   ;;  %v1100_v31 = vld [vmem:[%s1356_s1 + $0xd8] sm:$0xff] (!%p138_p2)  }
   0xd   : > { %s1360_s13 = smov (!%p160_p3, %s801_s13), 1  ;;  %990 = vmatprep.subr.bf16.mxu1 %v1128_v1  ;;  %v1101_v32 = vld [vmem:[%s1356_s1 + $0xa0] sm:$0xff]   ;;  %v1103_v36 = vld [vmem:[%s1356_s1 + $0xa8] sm:$0xff]   ;;  %v1105_v39 = vld [vmem:[%s1356_s1 + $0xb0] sm:$0xff]  }
   0xe   : > { %s920_s28 = sshll.u32 %s1360_s13, 3  ;;  %v1102_v33 = vld [vmem:[%s1356_s1 + $0xe0] sm:$0xff]   ;;  %v1104_v38 = vld [vmem:[%s1356_s1 + $0xe8] sm:$0xff]   ;;  %v1106_v42 = vld [vmem:[%s1356_s1 + $0xf0] sm:$0xff]   ;;  %s808_s26 = sshll.u32 %s1360_s13, 2 }
   0xf   : > { %971 = vmatpush3.bf16.msra.mxu0 %v1080_v5  ;;  %s1200_s6 = scalar_lea.vmem %s1355_s0, %s920_s28  ;;  %v1107_v44 = vld [vmem:[%s1356_s1 + $0xb8] sm:$0xff]   ;;  %v1111_v49 = vld [vmem:[%s1356_s1 + $0x100] sm:$0xff]   ;;  %v1112_v51 = vld [vmem:[%s1356_s1 + $0x108] sm:$0xff]   ;;  %s168_s29 = scalar_lea.vmem %s1358_s3, %s808_s26 }
  0x10   : > { %991 = vmatpush3.bf16.msra.mxu1 %v1081_v6  ;;  %972 = vmatprep.subr.bf16.mxu0 %v1128_v1  ;;  %v170_v11 = vld [vmem:[%s1200_s6] sm:$0xf]  ;;  %v1212_v12 = vld [vmem:[%s1200_s6 + $0x4] sm:$0x1]  ;;  %v1108_v47 = vld [vmem:[%s1356_s1 + $0xf8] sm:$0xff]  }
  0x11   : > { %992 = vmatprep.subr.bf16.mxu1 %v1128_v1  ;;  %v825_v13 = vcombine.low %v170_v11, %v1212_v12  ;;  %v394_v34 = vld [vmem:[%s1200_s6] sm:$0xe]  ;;  %v506_v35 = vld [vmem:[%s1200_s6 + $0x4] sm:$0x3]  ;;  %v1113_v52 = vld [vmem:[%s1356_s1 + $0x110] sm:$0xff]  }
  0x12   : > { %v883_v37 = vcombine.low %v394_v34, %v506_v35  ;;  %v858_v43 = vcombine.low %v394_v34, %v1212_v12  ;;  %v1114_v53 = vld [vmem:[%s1356_s1 + $0x118] sm:$0xff]   ;;  %v1115_v54 = vld [vmem:[%s1356_s1 + $0x120] sm:$0xff]   ;;  %v1116_v55 = vld [vmem:[%s1356_s1 + $0x128] sm:$0xff]  }
  0x13   : > { %973 = vmatpush3.bf16.msra.mxu0 %v1082_v7  ;;  %v213_v16 = vshll.u32 %v825_v13, 16  ;;  %v211_v19 = vshrl.u32 %v825_v13, 16  ;;  %v1117_v56 = vld [vmem:[%s1356_s1 + $0x130] sm:$0xff]   ;;  %v625_v57 = vld [vmem:[%s1200_s6] sm:$0xc]  ;;  %v1118_v59 = vld [vmem:[%s1356_s1 + $0x138] sm:$0xff]  }
  0x14   : > { %993 = vmatpush3.bf16.msra.mxu1 %v1083_v8  ;;  %974 = vmatprep.subr.bf16.mxu0 %v1128_v1  ;;  %v528_v40 = vshrl.u32 %v883_v37, 16  ;;  %v531_v41 = vshll.u32 %v883_v37, 16  ;;  %v415_v48 = vrot.slane %v858_v43, 1  ;;  %v908_v58 = vcombine.low %v625_v57, %v506_v35 }
  0x15   : > { %994 = vmatprep.subr.bf16.mxu1 %v1128_v1  ;;  %v215_v20 = vrot.slane %v213_v16, 1 }
  0x16   : > { %v530_v45 = vrot.slane %v528_v40, 1  ;;  %v533_v46 = vrot.slane %v531_v41, 2  ;;  %v646_v60 = vrot.slane %v908_v58, 2 }
  0x17   : > { %975 = vmatpush3.bf16.msra.mxu0 %v1084_v9  ;;  %v216_v23 = vor.u32 %v215_v20, %v211_v19 }
  0x18   : > { %995 = vmatpush3.bf16.msra.mxu1 %v1085_v10  ;;  %976 = vmatprep.subr.bf16.mxu0 %v1128_v1  ;;  %v534_v50 = vor.u32 %v533_v46, %v530_v45 }
  0x19   : > { %996 = vmatprep.subr.bf16.mxu1 %v1128_v1 }
  0x1b   : > { %977 = vmatpush3.bf16.msra.mxu0 %v1086_v14 }
  0x1c   : > { %997 = vmatpush3.bf16.msra.mxu1 %v1087_v15  ;;  %978 = vmatprep.subr.bf16.mxu0 %v1128_v1 }
  0x1d   : > { %998 = vmatprep.subr.bf16.mxu1 %v1128_v1 }
  0x1f   : > { %979 = vmatpush3.bf16.msra.mxu0 %v1088_v17  ;;  %v917_v17 = vld [vmem:[%s1357_s2] ss:$0 sm:$0xff] }
  0x20   : > { %999 = vmatpush3.bf16.msra.mxu1 %v1089_v18  ;;  %980 = vmatprep.subr.bf16.mxu0 %v1128_v1 }
  0x21   : > { %1000 = vmatprep.subr.bf16.mxu1 %v1128_v1 }
  0x23   : > { %981 = vmatpush3.bf16.msra.mxu0 %v1090_v21 }
  0x24   : > { %1001 = vmatpush3.bf16.msra.mxu1 %v1091_v22  ;;  %1006 = vmatprep.subr.bf16.mxu0 %v1128_v1 }
  0x25   : > { %1026 = vmatprep.subr.bf16.mxu1 %v1128_v1 }
  0x26   : > { %983 = vmatmul.mubr.bf16.vlgmr.msra.gmra.mrb[0].mxu0 %v216_v23 }
  0x27   : > { %1003 = vmatmul.mubr.bf16.vlgmr.msra.gmra.mrb[0].mxu1 %v170_v11  ;;  %1007 = vmatpush3.bf16.msra.mxu0 %v1093_v24 }
  0x28   : > { %1027 = vmatpush3.bf16.msra.mxu1 %v1094_v25  ;;  %1008 = vmatprep.subr.bf16.mxu0 %v1128_v1 }
  0x29   : > { %1028 = vmatprep.subr.bf16.mxu1 %v1128_v1  ;;  %1022 = vmatprep.mubr.msk.bf16.mxu0 %vm1129_vm0, %v1128_v1 }
  0x2a   : > { %1042 = vmatprep.mubr.msk.bf16.mxu1 %vm1129_vm0, %v1128_v1 }
  0x2b   : > { %1009 = vmatpush3.bf16.msra.mxu0 %v1095_v26 }
  0x2c   : > { %1029 = vmatpush3.bf16.msra.mxu1 %v1096_v27  ;;  %1010 = vmatprep.subr.bf16.mxu0 %v1128_v1 }
  0x2d   : > { %1030 = vmatprep.subr.bf16.mxu1 %v1128_v1 }
  0x2f   : > { %1011 = vmatpush3.bf16.msra.mxu0 %v1097_v28 }
  0x30   : > { %1031 = vmatpush3.bf16.msra.mxu1 %v1098_v29  ;;  %1012 = vmatprep.subr.bf16.mxu0 %v1128_v1 }
  0x31   : > { %1032 = vmatprep.subr.bf16.mxu1 %v1128_v1 }
  0x33   : > { %1013 = vmatpush3.bf16.msra.mxu0 %v1099_v30 }
  0x34   : > { %1033 = vmatpush3.bf16.msra.mxu1 %v1100_v31  ;;  %1014 = vmatprep.subr.bf16.mxu0 %v1128_v1 }
  0x35   : > { %1034 = vmatprep.subr.bf16.mxu1 %v1128_v1 }
  0x37   : > { %1015 = vmatpush3.bf16.msra.mxu0 %v1101_v32 }
  0x38   : > { %1035 = vmatpush3.bf16.msra.mxu1 %v1102_v33  ;;  %1016 = vmatprep.subr.bf16.mxu0 %v1128_v1 }
  0x39   : > { %1036 = vmatprep.subr.bf16.mxu1 %v1128_v1 }
  0x3b   : > { %1017 = vmatpush3.bf16.msra.mxu0 %v1103_v36 }
  0x3c   : > { %1037 = vmatpush3.bf16.msra.mxu1 %v1104_v38  ;;  %1018 = vmatprep.subr.bf16.mxu0 %v1128_v1 }
  0x3d   : > { %1038 = vmatprep.subr.bf16.mxu1 %v1128_v1 }
  0x3f   : > { %1019 = vmatpush3.bf16.msra.mxu0 %v1105_v39 }
  0x40   : > { %1039 = vmatpush3.bf16.msra.mxu1 %v1106_v42  ;;  %1020 = vmatprep.subr.bf16.mxu0 %v1128_v1 }
  0x41   : > { %1040 = vmatprep.subr.bf16.mxu1 %v1128_v1 }
  0x43   : > { %1021 = vmatpush3.bf16.msra.mxu0 %v1107_v44 }
  0x44   : > { %1041 = vmatpush3.bf16.msra.mxu1 %v1108_v47  ;;  %1046 = vmatprep.subr.bf16.mxu0 %v1128_v1 }
  0x46   : > { %1023 = vmatmul.mubr.bf16.vlgmr.msra.gmra.mrb[4].mxu0 %v415_v48 }
  0x47   : > { %1047 = vmatpush3.bf16.msra.mxu0 %v1111_v49  ;;  %1043 = vmatmul.mubr.bf16.vlgmr.msra.gmra.mrb[4].mxu1 %v534_v50 }
  0x48   : > { %1048 = vmatprep.subr.bf16.mxu0 %v1128_v1  ;;  %1062 = vmatprep.mubr.msk.bf16.mxu0 %vm1129_vm0, %v1128_v1 }
  0x4b   : > { %1049 = vmatpush3.bf16.msra.mxu0 %v1112_v51 }
  0x4c   : > { %1050 = vmatprep.subr.bf16.mxu0 %v1128_v1 }
  0x4f   : > { %1051 = vmatpush3.bf16.msra.mxu0 %v1113_v52 }
  0x50   : > { %1052 = vmatprep.subr.bf16.mxu0 %v1128_v1 }
  0x53   : > { %1053 = vmatpush3.bf16.msra.mxu0 %v1114_v53 }
  0x54   : > { %1054 = vmatprep.subr.bf16.mxu0 %v1128_v1 }
  0x57   : > { %1055 = vmatpush3.bf16.msra.mxu0 %v1115_v54 }
  0x58   : > { %1056 = vmatprep.subr.bf16.mxu0 %v1128_v1 }
  0x5b   : > { %1057 = vmatpush3.bf16.msra.mxu0 %v1116_v55 }
  0x5c   : > { %1058 = vmatprep.subr.bf16.mxu0 %v1128_v1 }
  0x5f   : > { %1059 = vmatpush3.bf16.msra.mxu0 %v1117_v56 }
  0x60   : > { %1060 = vmatprep.subr.bf16.mxu0 %v1128_v1 }
  0x63   : > { %1061 = vmatpush3.bf16.msra.mxu0 %v1118_v59 }
  0x66   : > { %1063 = vmatmul.mubr.bf16.vlgmr.msra.gmra.mrb[8].mxu0 %v646_v60 }
  0xf9   : > { %v300_v61 = vpop.f32.mrb[0].mxu0 }
  0xfa   : > { %v984_v62 = vpop.f32.mrb[1].mxu0  ;;  %v388_v63 = vpop.f32.mrb[0].mxu1 }
  0xfb   : > { %v389_v0 = vadd.f32 %v388_v63, %v300_v61  ;;  %v303_v2 = vpop.f32.mrb[2].mxu0  ;;  %v1004_v3 = vpop.f32.mrb[1].mxu1 }
  0xfc   : > { %v985_v4 = vpop.f32.mrb[3].mxu0  ;;  %v391_v5 = vpop.f32.mrb[2].mxu1 }
  0xfd   : > { %v1005_v6 = vpop.f32.mrb[3].mxu1 }
 0x119   : > { %v499_v7 = vpop.f32.mrb[4].mxu0 }
 0x11a   : > { %v505_v8 = vadd.f32 %v499_v7, %v389_v0  ;;  %v1024_v9 = vpop.f32.mrb[5].mxu0  ;;  %v618_v10 = vpop.f32.mrb[4].mxu1 }
 0x11b   : > { %v502_v11 = vpop.f32.mrb[6].mxu0  ;;  %v1044_v12 = vpop.f32.mrb[5].mxu1 }
 0x11c   : > { %v624_v1 = vadd.f32 %v618_v10, %v505_v8  ;;  %v1025_v13 = vpop.f32.mrb[7].mxu0  ;;  %v621_v14 = vpop.f32.mrb[6].mxu1 }
 0x11d   : > { %v1045_v15 = vpop.f32.mrb[7].mxu1 }
 0x139   : > { %v730_v16 = vpop.f32.mrb[8].mxu0 }
 0x13a   : > { %v736_v18 = vadd.f32 %v730_v16, %v624_v1  ;;  %v1064_v19 = vpop.f32.mrb[9].mxu0 }
 0x13b   : > { %v733_v20 = vpop.f32.mrb[10].mxu0 }
 0x13c   : > { %v744_v21 = vadd.f32 %v917_v17, %v736_v18  ;;  %v1065_v22 = vpop.f32.mrb[11].mxu0 }
 0x13e   : > { %v745_v23 = vmax.f32 %v744_v21, 0.0 }
 0x140   : > { %v746_v24 = vpack.c.bf16 %v745_v23, %v745_v23 }
 0x142   : > { %747 = vst [vmem:[%s168_s29] sm:$0xf] %v746_v24 }
 0x143 PF: > { %s13_s12 = sadd.s32 1, %s1126_s12  }
 0x144   : > { %p10_p4 = scmp.ge.s32.totalorder %s13_s12, 4  }
 0x146   :  { %12 = sbr.rel (!%p10_p4) target bundleno = 1 (0x1), region = 66 }

// kernel: speaker_encoder_forward.14
= control target key start
LH: loop header
LB: loop body
LE: loop exit
PB: predicated region body
PF: predicated region fallthrough
CT: control target
= control target key end

     0   :  { %s1259_s15 = smov 0   ;;  %s1472_s0 = inlined_call_operand.vmem [shape: bf16[2,2,6,128], index: 0, kind: input, shape index: {}]   ;;  %s1473_s1 = inlined_call_operand.vmem [shape: bf16[5,128,128], index: 1, kind: input, shape index: {}]   ;;  %s1474_s2 = inlined_call_operand.vmem [shape: f32[1,128], index: 2, kind: input, shape index: {}]   ;;  %s1475_s3 = inlined_call_operand.vmem [shape: bf16[2,4,2,128], index: 3, kind: input, shape index: {}]   ;;  %s1476_s4 = inlined_call_operand.vmem [shape: bf16[2,4,128], index: 4, kind: output, shape index: {}]  }
   0x1 LB: > { %s904_s16 = sadd.s32 4294967295, %s1230_s15   ;;  %p908_p0 = scmp.ge.s32.totalorder %s1230_s15, 1  ;;  %s1230_s15 = sphi %s1259_s15, %s14_s15  }
   0x2   : > { %p171_p1 = scmp.lt.s32.totalorder %s1230_s15, 3 }
   0x4   : > { %p172_p2 = pnand %p908_p0, %p171_p1 }
   0x5   : > { %v1181_v0 = vld [vmem:[%s1473_s1 + $0x40] sm:$0xff] (!%p172_p2)   ;;  %v1232_v1 = vmov (!%p172_p2), 0.0   ;;  %v1183_v3 = vld [vmem:[%s1473_s1 + $0x48] sm:$0xff] (!%p172_p2)   ;;  %vm1233_vm0 = vmmov (!%p172_p2), 0   ;;  %v1185_v5 = vld [vmem:[%s1473_s1 + $0x50] sm:$0xff] (!%p172_p2)   ;;  %p200_p3 = scmp.lt.s32.totalorder (!%p172_p2), %s904_s16, 1 }
   0x6   : > { %175 = sbr.rel (%p172_p2) target bundleno = 325 (0x145), region = 36  ;;  %1071 = vmatprep.subr.bf16.mxu0 (!%p172_p2), %v1232_v1  ;;  %1091 = vmatprep.subr.bf16.mxu1 (!%p172_p2), %v1232_v1  ;;  %v1182_v2 = vld [vmem:[%s1473_s1] sm:$0xff] (!%p172_p2)   ;;  %v1184_v4 = vld [vmem:[%s1473_s1 + $0x8] sm:$0xff] (!%p172_p2)   ;;  %v1186_v6 = vld [vmem:[%s1473_s1 + $0x10] sm:$0xff] (!%p172_p2)   ;;  %vm791_vm1 = vcmask (!%p172_p2), 1041408   ;;  %vm829_vm2 = vcmask (!%p172_p2), 1041409  }
   0x7   : > { %1072 = vmatpush3.bf16.msra.mxu0 (!%p172_p2), %v1181_v0  ;;  %1087 = vmatprep.mubr.msk.bf16.mxu0 (!%p172_p2), %vm1233_vm0, %v1232_v1  ;;  %v1187_v7 = vld [vmem:[%s1473_s1 + $0x58] sm:$0xff] (!%p172_p2)   ;;  %v1189_v9 = vld [vmem:[%s1473_s1 + $0x60] sm:$0xff] (!%p172_p2)   ;;  %v1191_v11 = vld [vmem:[%s1473_s1 + $0x68] sm:$0xff] (!%p172_p2)   ;;  %vm831_vm3 = vcmask (!%p172_p2), 1042434   ;;  %vm833_vm4 = vcmask (!%p172_p2), 1043459  }
   0x8   : > { %1092 = vmatpush3.bf16.msra.mxu1 (!%p172_p2), %v1182_v2  ;;  %1073 = vmatprep.subr.bf16.mxu0 (!%p172_p2), %v1232_v1  ;;  %v1188_v8 = vld [vmem:[%s1473_s1 + $0x18] sm:$0xff] (!%p172_p2)   ;;  %v1190_v10 = vld [vmem:[%s1473_s1 + $0x20] sm:$0xff] (!%p172_p2)   ;;  %v1192_v12 = vld [vmem:[%s1473_s1 + $0x28] sm:$0xff] (!%p172_p2)  }
   0x9   : > { %1093 = vmatprep.subr.bf16.mxu1 (!%p172_p2), %v1232_v1  ;;  %1107 = vmatprep.mubr.msk.bf16.mxu1 (!%p172_p2), %vm1233_vm0, %v1232_v1  ;;  %v1193_v13 = vld [vmem:[%s1473_s1 + $0x70] sm:$0xff] (!%p172_p2)   ;;  %v1195_v15 = vld [vmem:[%s1473_s1 + $0x78] sm:$0xff] (!%p172_p2)   ;;  %v1197_v19 = vld [vmem:[%s1473_s1 + $0x80] sm:$0xff] (!%p172_p2)  }
   0xa   : > { %v1194_v14 = vld [vmem:[%s1473_s1 + $0x30] sm:$0xff] (!%p172_p2)   ;;  %v1196_v16 = vld [vmem:[%s1473_s1 + $0x38] sm:$0xff] (!%p172_p2)   ;;  %v1198_v20 = vld [vmem:[%s1473_s1 + $0xc0] sm:$0xff] (!%p172_p2)  }
   0xb   : > { %1074 = vmatpush3.bf16.msra.mxu0 (!%p172_p2), %v1183_v3  ;;  %v1199_v21 = vld [vmem:[%s1473_s1 + $0x88] sm:$0xff] (!%p172_p2)   ;;  %v1201_v23 = vld [vmem:[%s1473_s1 + $0x90] sm:$0xff] (!%p172_p2)   ;;  %v1203_v25 = vld [vmem:[%s1473_s1 + $0x98] sm:$0xff] (!%p172_p2)  }
   0xc   : > { %1094 = vmatpush3.bf16.msra.mxu1 (!%p172_p2), %v1184_v4  ;;  %1075 = vmatprep.subr.bf16.mxu0 (!%p172_p2), %v1232_v1  ;;  %v1200_v22 = vld [vmem:[%s1473_s1 + $0xc8] sm:$0xff] (!%p172_p2)   ;;  %v1202_v24 = vld [vmem:[%s1473_s1 + $0xd0] sm:$0xff] (!%p172_p2)   ;;  %v1204_v26 = vld [vmem:[%s1473_s1 + $0xd8] sm:$0xff] (!%p172_p2)  }
   0xd   : > { %1095 = vmatprep.subr.bf16.mxu1 %v1232_v1  ;;  %s1478_s16 = smov (!%p200_p3, %s904_s16), 1  ;;  %v1205_v27 = vld [vmem:[%s1473_s1 + $0xa0] sm:$0xff]   ;;  %v1207_v30 = vld [vmem:[%s1473_s1 + $0xa8] sm:$0xff]   ;;  %v1209_v34 = vld [vmem:[%s1473_s1 + $0xb0] sm:$0xff]  }
   0xe   : > { %s1025_s19 = sshll.u32 %s1478_s16, 3  ;;  %v1206_v28 = vld [vmem:[%s1473_s1 + $0xe0] sm:$0xff]   ;;  %v1208_v32 = vld [vmem:[%s1473_s1 + $0xe8] sm:$0xff]   ;;  %v1210_v36 = vld [vmem:[%s1473_s1 + $0xf0] sm:$0xff]   ;;  %s912_s10 = sshll.u32 %s1478_s16, 1 }
   0xf   : > { %1076 = vmatpush3.bf16.msra.mxu0 %v1185_v5  ;;  %s1337_s24 = scalar_lea.vmem %s1472_s0, %s1025_s19  ;;  %v1211_v39 = vld [vmem:[%s1473_s1 + $0xb8] sm:$0xff]   ;;  %v1214_v44 = vld [vmem:[%s1473_s1 + $0x100] sm:$0xff]   ;;  %v1216_v46 = vld [vmem:[%s1473_s1 + $0x108] sm:$0xff]   ;;  %s212_s13 = scalar_lea.vmem %s1476_s4, %s912_s10 }
  0x10   : > { %1096 = vmatpush3.bf16.msra.mxu1 %v1186_v6  ;;  %1077 = vmatprep.subr.bf16.mxu0 %v1232_v1  ;;  %v913_v17 = vld [vmem:[%s1337_s24 + $0x4] sm:$0x3]  ;;  %v214_v18 = vld [vmem:[%s1337_s24] sm:$0x3]  ;;  %v1212_v42 = vld [vmem:[%s1473_s1 + $0xf8] sm:$0xff]  }
  0x11   : > { %1097 = vmatprep.subr.bf16.mxu1 %v1232_v1  ;;  %v1213_v29 = vld [vmem:[%s1337_s24] ss:$0 sps:$4 sm:$0x77]   ;;  %v1215_v31 = vld [vmem:[%s1337_s24 + $0x4] ss:$0 sps:$4 sm:$0x77]  }
  0x12   : > { %v450_v33 = vshll.u32 %v1213_v29, 16  ;;  %v568_v35 = vshll.u32 %v1215_v31, 16  ;;  %v448_v37 = vshrl.u32 %v1213_v29, 16  ;;  %v566_v40 = vshrl.u32 %v1215_v31, 16  ;;  %v1217_v47 = vld [vmem:[%s1473_s1 + $0x110] sm:$0xff]   ;;  %v1218_v48 = vld [vmem:[%s1473_s1 + $0x118] sm:$0xff]  }
  0x13   : > { %1078 = vmatpush3.bf16.msra.mxu0 %v1187_v7  ;;  %v1219_v49 = vld [vmem:[%s1473_s1 + $0x120] sm:$0xff]   ;;  %v1220_v50 = vld [vmem:[%s1473_s1 + $0x128] sm:$0xff]   ;;  %v1221_v51 = vld [vmem:[%s1473_s1 + $0x130] sm:$0xff]  }
  0x14   : > { %1098 = vmatpush3.bf16.msra.mxu1 %v1188_v8  ;;  %1079 = vmatprep.subr.bf16.mxu0 %v1232_v1  ;;  %v452_v38 = vrot.slane %v450_v33, 1  ;;  %v570_v41 = vrot.slane %v568_v35, 1  ;;  %v1223_v52 = vld [vmem:[%s1337_s24] ss:$0 sps:$4 sm:$0x66]   ;;  %v1222_v53 = vld [vmem:[%s1473_s1 + $0x138] sm:$0xff]  }
  0x15   : > { %1099 = vmatprep.subr.bf16.mxu1 %v1232_v1  ;;  %v683_v54 = vrot.slane %v1223_v52, 1  ;;  %s911_s24 = sshll.u32 %s1478_s16, 2 }
  0x16   : > { %v453_v43 = vor.u32 %v452_v38, %v448_v37  ;;  %v571_v45 = vor.u32 %v570_v41, %v566_v40  ;;  %s208_s7 = scalar_lea.vmem %s1475_s3, %s911_s24 }
  0x17   : > { %1080 = vmatpush3.bf16.msra.mxu0 %v1189_v9  ;;  %v783_v0 = vld [vmem:[%s208_s7] sm:$0x1]  ;;  %v784_v2 = vld [vmem:[%s208_s7 + $0x1] sm:$0x1]  ;;  %v785_v4 = vld [vmem:[%s208_s7 + $0x2] sm:$0x1] }
  0x18   : > { %1100 = vmatpush3.bf16.msra.mxu1 %v1190_v10  ;;  %1081 = vmatprep.subr.bf16.mxu0 %v1232_v1  ;;  %v788_v3 = vunpack.c.l.bf16 %v784_v2  ;;  %v786_v5 = vld [vmem:[%s208_s7 + $0x3] sm:$0x1]  ;;  %v789_v6 = vunpack.c.l.bf16 %v785_v4 }
  0x19   : > { %1101 = vmatprep.subr.bf16.mxu1 %v1232_v1 }
  0x1a   : > { %v799_v8 = vsel %vm791_vm1, %v788_v3, 0.0 }
  0x1b   : > { %1082 = vmatpush3.bf16.msra.mxu0 %v1191_v11 }
  0x1c   : > { %1102 = vmatpush3.bf16.msra.mxu1 %v1192_v12  ;;  %1083 = vmatprep.subr.bf16.mxu0 %v1232_v1 }
  0x1d   : > { %1103 = vmatprep.subr.bf16.mxu1 %v1232_v1 }
  0x1f   : > { %1084 = vmatpush3.bf16.msra.mxu0 %v1193_v13  ;;  %v790_v13 = vunpack.c.l.bf16 %v786_v5 }
  0x20   : > { %1104 = vmatpush3.bf16.msra.mxu1 %v1194_v14  ;;  %1085 = vmatprep.subr.bf16.mxu0 %v1232_v1 }
  0x21   : > { %1105 = vmatprep.subr.bf16.mxu1 %v1232_v1 }
  0x23   : > { %1086 = vmatpush3.bf16.msra.mxu0 %v1195_v15 }
  0x24   : > { %1106 = vmatpush3.bf16.msra.mxu1 %v1196_v16  ;;  %1111 = vmatprep.subr.bf16.mxu0 %v1232_v1 }
  0x25   : > { %1131 = vmatprep.subr.bf16.mxu1 %v1232_v1 }
  0x26   : > { %1088 = vmatmul.mubr.bf16.vlgmr.msra.gmra.mrb[0].mxu0 %v913_v17  ;;  %v800_v17 = vrot.slane %v799_v8, 4 }
  0x27   : > { %1108 = vmatmul.mubr.bf16.vlgmr.msra.gmra.mrb[0].mxu1 %v214_v18  ;;  %1112 = vmatpush3.bf16.msra.mxu0 %v1197_v19  ;;  %v806_v18 = vsel %vm791_vm1, %v789_v6, 0.0 }
  0x28   : > { %1132 = vmatpush3.bf16.msra.mxu1 %v1198_v20  ;;  %1113 = vmatprep.subr.bf16.mxu0 %v1232_v1 }
  0x29   : > { %1133 = vmatprep.subr.bf16.mxu1 %v1232_v1  ;;  %1127 = vmatprep.mubr.msk.bf16.mxu0 %vm1233_vm0, %v1232_v1 }
  0x2a   : > { %1147 = vmatprep.mubr.msk.bf16.mxu1 %vm1233_vm0, %v1232_v1 }
  0x2b   : > { %1114 = vmatpush3.bf16.msra.mxu0 %v1199_v21 }
  0x2c   : > { %1134 = vmatpush3.bf16.msra.mxu1 %v1200_v22  ;;  %1115 = vmatprep.subr.bf16.mxu0 %v1232_v1 }
  0x2d   : > { %1135 = vmatprep.subr.bf16.mxu1 %v1232_v1 }
  0x2f   : > { %1116 = vmatpush3.bf16.msra.mxu0 %v1201_v23  ;;  %v807_v23 = vrot.slane %v806_v18, 4 }
  0x30   : > { %1136 = vmatpush3.bf16.msra.mxu1 %v1202_v24  ;;  %1117 = vmatprep.subr.bf16.mxu0 %v1232_v1  ;;  %v813_v24 = vsel %vm791_vm1, %v790_v13, 0.0 }
  0x31   : > { %1137 = vmatprep.subr.bf16.mxu1 %v1232_v1 }
  0x33   : > { %1118 = vmatpush3.bf16.msra.mxu0 %v1203_v25 }
  0x34   : > { %1138 = vmatpush3.bf16.msra.mxu1 %v1204_v26  ;;  %1119 = vmatprep.subr.bf16.mxu0 %v1232_v1  ;;  %v801_v26 = vadd.f32 %v800_v17, %v799_v8 }
  0x35   : > { %1139 = vmatprep.subr.bf16.mxu1 %v1232_v1 }
  0x37   : > { %1120 = vmatpush3.bf16.msra.mxu0 %v1205_v27  ;;  %v814_v27 = vrot.slane %v813_v24, 4 }
  0x38   : > { %1140 = vmatpush3.bf16.msra.mxu1 %v1206_v28  ;;  %1121 = vmatprep.subr.bf16.mxu0 %v1232_v1  ;;  %v808_v28 = vadd.f32 %v807_v23, %v806_v18 }
  0x39   : > { %1141 = vmatprep.subr.bf16.mxu1 %v1232_v1  ;;  %v815_v31 = vadd.f32 %v814_v27, %v813_v24 }
  0x3b   : > { %1122 = vmatpush3.bf16.msra.mxu0 %v1207_v30  ;;  %v802_v30 = vrot.slane %v801_v26, 2  ;;  %v816_v35 = vrot.slane %v815_v31, 2 }
  0x3c   : > { %1142 = vmatpush3.bf16.msra.mxu1 %v1208_v32  ;;  %1123 = vmatprep.subr.bf16.mxu0 %v1232_v1  ;;  %v809_v32 = vrot.slane %v808_v28, 2 }
  0x3d   : > { %1143 = vmatprep.subr.bf16.mxu1 %v1232_v1 }
  0x3f   : > { %1124 = vmatpush3.bf16.msra.mxu0 %v1209_v34  ;;  %v803_v34 = vadd.f32 %v802_v30, %v801_v26 }
  0x40   : > { %1144 = vmatpush3.bf16.msra.mxu1 %v1210_v36  ;;  %1125 = vmatprep.subr.bf16.mxu0 %v1232_v1  ;;  %v810_v36 = vadd.f32 %v809_v32, %v808_v28 }
  0x41   : > { %1145 = vmatprep.subr.bf16.mxu1 %v1232_v1  ;;  %v804_v38 = vrot.slane %v803_v34, 1 }
  0x42   : > { %v811_v40 = vrot.slane %v810_v36, 1 }
  0x43   : > { %1126 = vmatpush3.bf16.msra.mxu0 %v1211_v39  ;;  %v817_v39 = vadd.f32 %v816_v35, %v815_v31 }
  0x44   : > { %1146 = vmatpush3.bf16.msra.mxu1 %v1212_v42  ;;  %1151 = vmatprep.subr.bf16.mxu0 %v1232_v1  ;;  %v805_v42 = vadd.f32 %v804_v38, %v803_v34 }
  0x46   : > { %1128 = vmatmul.mubr.bf16.vlgmr.msra.gmra.mrb[4].mxu0 %v453_v43  ;;  %v818_v43 = vrot.slane %v817_v39, 1 }
  0x47   : > { %1152 = vmatpush3.bf16.msra.mxu0 %v1214_v44  ;;  %1148 = vmatmul.mubr.bf16.vlgmr.msra.gmra.mrb[4].mxu1 %v571_v45  ;;  %v812_v44 = vadd.f32 %v811_v40, %v810_v36 }
  0x48   : > { %1153 = vmatprep.subr.bf16.mxu0 %v1232_v1  ;;  %1167 = vmatprep.mubr.msk.bf16.mxu0 %vm1233_vm0, %v1232_v1 }
  0x4b   : > { %1154 = vmatpush3.bf16.msra.mxu0 %v1216_v46  ;;  %v822_v46 = vmul.f32 0.5, %v805_v42 }
  0x4c   : > { %1155 = vmatprep.subr.bf16.mxu0 %v1232_v1 }
  0x4f   : > { %1156 = vmatpush3.bf16.msra.mxu0 %v1217_v47  ;;  %v819_v47 = vadd.f32 %v818_v43, %v817_v39 }
  0x50   : > { %1157 = vmatprep.subr.bf16.mxu0 %v1232_v1 }
  0x51   : > { %v824_v52 = vmul.f32 0.5, %v819_v47 }
  0x53   : > { %1158 = vmatpush3.bf16.msra.mxu0 %v1218_v48  ;;  %v823_v48 = vmul.f32 0.5, %v812_v44 }
  0x54   : > { %1159 = vmatprep.subr.bf16.mxu0 %v1232_v1 }
  0x57   : > { %1160 = vmatpush3.bf16.msra.mxu0 %v1219_v49 }
  0x58   : > { %1161 = vmatprep.subr.bf16.mxu0 %v1232_v1 }
  0x5b   : > { %1162 = vmatpush3.bf16.msra.mxu0 %v1220_v50 }
  0x5c   : > { %1163 = vmatprep.subr.bf16.mxu0 %v1232_v1 }
  0x5f   : > { %1164 = vmatpush3.bf16.msra.mxu0 %v1221_v51  ;;  %v1022_v51 = vld [vmem:[%s1474_s2] ss:$0 sm:$0xff] }
  0x60   : > { %1165 = vmatprep.subr.bf16.mxu0 %v1232_v1  ;;  %v787_v1 = vunpack.c.l.bf16 %v783_v0 }
  0x62   : > { %v792_v7 = vsel %vm791_vm1, %v787_v1, 0.0 }
  0x63   : > { %1166 = vmatpush3.bf16.msra.mxu0 %v1222_v53  ;;  %v793_v16 = vrot.slane %v792_v7, 4 }
  0x65   : > { %v794_v25 = vadd.f32 %v793_v16, %v792_v7 }
  0x66   : > { %1168 = vmatmul.mubr.bf16.vlgmr.msra.gmra.mrb[8].mxu0 %v683_v54 }
  0x67   : > { %v795_v29 = vrot.slane %v794_v25, 2 }
  0x69   : > { %v796_v33 = vadd.f32 %v795_v29, %v794_v25 }
  0x6b   : > { %v797_v37 = vrot.slane %v796_v33, 1 }
  0x6d   : > { %v798_v41 = vadd.f32 %v797_v37, %v796_v33 }
  0x6f   : > { %v821_v45 = vmul.f32 0.5, %v798_v41 }
  0x71   : > { %v830_v49 = vsel %vm829_vm2, %v822_v46, %v821_v45 }
  0x72   : > { %v832_v54 = vsel %vm831_vm3, %v823_v48, %v830_v49 }
  0xf9   : > { %v332_v55 = vpop.f32.mrb[0].mxu0 }
  0xfa   : > { %v1089_v56 = vpop.f32.mrb[1].mxu0  ;;  %v420_v57 = vpop.f32.mrb[0].mxu1 }
  0xfb   : > { %v421_v58 = vadd.f32 %v420_v57, %v332_v55  ;;  %v335_v59 = vpop.f32.mrb[2].mxu0  ;;  %v1109_v60 = vpop.f32.mrb[1].mxu1 }
  0xfc   : > { %v1090_v61 = vpop.f32.mrb[3].mxu0  ;;  %v423_v62 = vpop.f32.mrb[2].mxu1  ;;  %v834_v59 = vsel %vm833_vm4, %v824_v52, %v832_v54 }
  0xfd   : > { %v1110_v63 = vpop.f32.mrb[3].mxu1 }
 0x119   : > { %v537_v9 = vpop.f32.mrb[4].mxu0 }
 0x11a   : > { %v543_v10 = vadd.f32 %v537_v9, %v421_v58  ;;  %v1129_v11 = vpop.f32.mrb[5].mxu0  ;;  %v655_v12 = vpop.f32.mrb[4].mxu1 }
 0x11b   : > { %v540_v14 = vpop.f32.mrb[6].mxu0  ;;  %v1149_v15 = vpop.f32.mrb[5].mxu1 }
 0x11c   : > { %v661_v19 = vadd.f32 %v655_v12, %v543_v10  ;;  %v1130_v20 = vpop.f32.mrb[7].mxu0  ;;  %v658_v21 = vpop.f32.mrb[6].mxu1 }
 0x11d   : > { %v1150_v22 = vpop.f32.mrb[7].mxu1 }
 0x139   : > { %v767_v50 = vpop.f32.mrb[8].mxu0 }
 0x13a   : > { %v773_v53 = vadd.f32 %v767_v50, %v661_v19  ;;  %v1169_v55 = vpop.f32.mrb[9].mxu0 }
 0x13b   : > { %v770_v56 = vpop.f32.mrb[10].mxu0 }
 0x13c   : > { %v781_v57 = vadd.f32 %v1022_v51, %v773_v53  ;;  %v1170_v58 = vpop.f32.mrb[11].mxu0 }
 0x13e   : > { %v782_v60 = vmax.f32 %v781_v57, 0.0 }
 0x140   : > { %v836_v61 = vadd.f32 %v834_v59, %v782_v60 }
 0x142   : > { %v837_v62 = vpack.c.bf16 %v836_v61, %v836_v61 }
 0x144   : > { %838 = vst [vmem:[%s212_s13] sm:$0x3] %v837_v62 }
 0x145 PF: > { %s14_s15 = sadd.s32 1, %s1230_s15  }
 0x146   : > { %p11_p4 = scmp.ge.s32.totalorder %s14_s15, 4  }
 0x148   :  { %13 = sbr.rel (!%p11_p4) target bundleno = 1 (0x1), region = 74 }

// kernel: speaker_encoder_forward.15
= control target key start
LH: loop header
LB: loop body
LE: loop exit
PB: predicated region body
PF: predicated region fallthrough
CT: control target
= control target key end

     0   :  { %v1362_v0 = vmov 0.0   ;;  %vm1363_vm0 = vmmov 0   ;;  %vm43_vm1 = vcmask 1043456   ;;  %vm156_vm2 = vcmask 1041409   ;;  %s1757_s1 = inlined_call_operand.vmem [shape: bf16[3,128,128], index: 1, kind: input, shape index: {}]   ;;  %s1758_s0 = inlined_call_operand.vmem [shape: bf16[8,4,128], index: 0, kind: input, shape index: {}]   ;;  %s1759_s3 = inlined_call_operand.vmem [shape: bf16[3,128,128], index: 3, kind: input, shape index: {}]   ;;  %s1760_s2 = inlined_call_operand.vmem [shape: f32[3,1,128], index: 2, kind: input, shape index: {}]   ;;  %s1761_s4 = inlined_call_operand.vmem [shape: f32[3,1,128], index: 4, kind: input, shape index: {}]   ;;  %s1762_s5 = inlined_call_operand.vmem [shape: bf16[128,128], index: 5, kind: input, shape index: {}]   ;;  %s1763_s6 = inlined_call_operand.vmem [shape: f32[1,128], index: 6, kind: input, shape index: {}]   ;;  %s1764_s7 = inlined_call_operand.vmem [shape: f32[8,128], index: 7, kind: output, shape index: {}]  }
   0x1   :  { %1164 = vmatprep.subr.bf16.mxu0 %v1362_v0  ;;  %v1306_v1 = vld [vmem:[%s1757_s1] sm:$0xff]   ;;  %1180 = vmatprep.mubr.msk.bf16.mxu0 %vm1363_vm0, %v1362_v0  ;;  %v1307_v2 = vld [vmem:[%s1757_s1 + $0x8] sm:$0xff]   ;;  %v1308_v3 = vld [vmem:[%s1757_s1 + $0x10] sm:$0xff]   ;;  %vm158_vm3 = vcmask 1042434   ;;  %vm160_vm4 = vcmask 1043459   ;;  %vm162_vm5 = vcmask 1044484  }
   0x2   :  { %1184 = vmatprep.subr.bf16.mxu1 %v1362_v0  ;;  %1200 = vmatprep.mubr.msk.bf16.mxu1 %vm1363_vm0, %v1362_v0  ;;  %v1309_v4 = vld [vmem:[%s1757_s1 + $0x18] sm:$0xff]   ;;  %v27_v5 = vld [vmem:[%s1758_s0] sm:$0x3]  ;;  %v28_v6 = vld [vmem:[%s1758_s0 + $0x2] sm:$0x3]  ;;  %vm164_vm6 = vcmask 1045509  }
   0x3   :  { %1165 = vmatpush3.bf16.msra.mxu0 %v1306_v1  ;;  %v29_v7 = vld [vmem:[%s1758_s0 + $0x4] sm:$0x3]  ;;  %v30_v8 = vld [vmem:[%s1758_s0 + $0x6] sm:$0x3]  ;;  %v31_v9 = vld [vmem:[%s1758_s0 + $0x8] sm:$0x3]  ;;  %v35_v11 = vunpack.c.l.bf16 %v27_v5  ;;  %v36_v12 = vunpack.c.l.bf16 %v28_v6 }
   0x4   :  { %1166 = vmatprep.subr.bf16.mxu0 %v1362_v0  ;;  %v32_v10 = vld [vmem:[%s1758_s0 + $0xa] sm:$0x3]  ;;  %v37_v13 = vunpack.c.l.bf16 %v29_v7  ;;  %v33_v14 = vld [vmem:[%s1758_s0 + $0xc] sm:$0x3]  ;;  %v34_v15 = vld [vmem:[%s1758_s0 + $0xe] sm:$0x3]  ;;  %v38_v16 = vunpack.c.l.bf16 %v30_v8  ;;  %v39_v17 = vunpack.c.l.bf16 %v31_v9 }
   0x5   :  { %v40_v18 = vunpack.c.l.bf16 %v32_v10  ;;  %v41_v19 = vunpack.c.l.bf16 %v33_v14  ;;  %v42_v20 = vunpack.c.l.bf16 %v34_v15  ;;  %v44_v21 = vsel %vm43_vm1, %v35_v11, 0.0  ;;  %v1314_v23 = vld [vmem:[%s1759_s3] sm:$0xff]   ;;  %v1315_v24 = vld [vmem:[%s1759_s3 + $0x8] sm:$0xff]   ;;  %v1316_v42 = vld [vmem:[%s1759_s3 + $0x10] sm:$0xff]  }
   0x6   :  { %v51_v22 = vsel %vm43_vm1, %v36_v12, 0.0  ;;  %v1310_v25 = vld [vmem:[%s1757_s1 + $0x20] sm:$0xff]   ;;  %v45_v26 = vrot.slane %v44_v21, 4  ;;  %v58_v28 = vsel %vm43_vm1, %v37_v13, 0.0  ;;  %v65_v29 = vsel %vm43_vm1, %v38_v16, 0.0  ;;  %1185 = vmatpush3.bf16.msra.mxu1 %v1314_v23  ;;  %v1311_v51 = vld [vmem:[%s1757_s1 + $0x28] sm:$0xff]  }
   0x7   :  { %1167 = vmatpush3.bf16.msra.mxu0 %v1307_v2  ;;  %v52_v27 = vrot.slane %v51_v22, 4  ;;  %v59_v30 = vrot.slane %v58_v28, 4  ;;  %v66_v31 = vrot.slane %v65_v29, 4  ;;  %v72_v32 = vsel %vm43_vm1, %v39_v17, 0.0  ;;  %1186 = vmatprep.subr.bf16.mxu1 %v1362_v0  ;;  %v1317_v60 = vld [vmem:[%s1759_s3 + $0x18] sm:$0xff]   ;;  %v1312_v61 = vld [vmem:[%s1757_s1 + $0x30] sm:$0xff]  }
   0x8   :  { %1168 = vmatprep.subr.bf16.mxu0 %v1362_v0  ;;  %v79_v33 = vsel %vm43_vm1, %v40_v18, 0.0  ;;  %v46_v34 = vadd.f32 %v45_v26, %v44_v21  ;;  %v73_v36 = vrot.slane %v72_v32, 4  ;;  %v86_v40 = vsel %vm43_vm1, %v41_v19, 0.0  ;;  %v1318_v15 = vld [vmem:[%s1759_s3 + $0x20] sm:$0xff]   ;;  %v1313_v16 = vld [vmem:[%s1757_s1 + $0x38] sm:$0xff]  }
   0x9   :  { %v53_v35 = vadd.f32 %v52_v27, %v51_v22  ;;  %v80_v37 = vrot.slane %v79_v33, 4  ;;  %v60_v38 = vadd.f32 %v59_v30, %v58_v28  ;;  %v67_v39 = vadd.f32 %v66_v31, %v65_v29 }
   0xa   :  { %v93_v41 = vsel %vm43_vm1, %v42_v20, 0.0  ;;  %v47_v43 = vrot.slane %v46_v34, 2  ;;  %v74_v45 = vadd.f32 %v73_v36, %v72_v32  ;;  %v87_v49 = vrot.slane %v86_v40, 4  ;;  %1187 = vmatpush3.bf16.msra.mxu1 %v1315_v24 }
   0xb   :  { %1169 = vmatpush3.bf16.msra.mxu0 %v1308_v3  ;;  %v54_v44 = vrot.slane %v53_v35, 2  ;;  %v81_v46 = vadd.f32 %v80_v37, %v79_v33  ;;  %v61_v47 = vrot.slane %v60_v38, 2  ;;  %v68_v48 = vrot.slane %v67_v39, 2  ;;  %1188 = vmatprep.subr.bf16.mxu1 %v1362_v0  ;;  %v1319_v33 = vld [vmem:[%s1759_s3 + $0x28] sm:$0xff]  }
   0xc   :  { %1170 = vmatprep.subr.bf16.mxu0 %v1362_v0  ;;  %v94_v50 = vrot.slane %v93_v41, 4  ;;  %v48_v52 = vadd.f32 %v47_v43, %v46_v34  ;;  %v75_v54 = vrot.slane %v74_v45, 2  ;;  %v88_v58 = vadd.f32 %v87_v49, %v86_v40 }
   0xd   :  { %v55_v53 = vadd.f32 %v54_v44, %v53_v35  ;;  %v82_v55 = vrot.slane %v81_v46, 2  ;;  %v62_v56 = vadd.f32 %v61_v47, %v60_v38  ;;  %v69_v57 = vadd.f32 %v68_v48, %v67_v39 }
   0xe   :  { %v95_v59 = vadd.f32 %v94_v50, %v93_v41  ;;  %v49_v62 = vrot.slane %v48_v52, 1  ;;  %v76_v1 = vadd.f32 %v75_v54, %v74_v45  ;;  %v89_v5 = vrot.slane %v88_v58, 2  ;;  %1189 = vmatpush3.bf16.msra.mxu1 %v1316_v42 }
   0xf   :  { %1171 = vmatpush3.bf16.msra.mxu0 %v1309_v4  ;;  %v56_v63 = vrot.slane %v55_v53, 1  ;;  %v83_v2 = vadd.f32 %v82_v55, %v81_v46  ;;  %v63_v3 = vrot.slane %v62_v56, 1  ;;  %v70_v4 = vrot.slane %v69_v57, 1  ;;  %1190 = vmatprep.subr.bf16.mxu1 %v1362_v0 }
  0x10   :  { %1172 = vmatprep.subr.bf16.mxu0 %v1362_v0  ;;  %v96_v6 = vrot.slane %v95_v59, 2  ;;  %v50_v7 = vadd.f32 %v49_v62, %v48_v52  ;;  %v77_v9 = vrot.slane %v76_v1, 1  ;;  %v90_v13 = vadd.f32 %v89_v5, %v88_v58  ;;  %v1322_v58 = vld [vmem:[%s1757_s1 + $0x40] sm:$0xff]  }
  0x11   :  { %v57_v8 = vadd.f32 %v56_v63, %v55_v53  ;;  %v84_v10 = vrot.slane %v83_v2, 1  ;;  %v64_v11 = vadd.f32 %v63_v3, %v62_v56  ;;  %v71_v12 = vadd.f32 %v70_v4, %v69_v57  ;;  %v1320_v56 = vld [vmem:[%s1759_s3 + $0x30] sm:$0xff]   ;;  %v1321_v57 = vld [vmem:[%s1759_s3 + $0x38] sm:$0xff]   ;;  %v1326_v62 = vld [vmem:[%s1757_s1 + $0x60] sm:$0xff]  }
  0x12   :  { %v97_v14 = vadd.f32 %v96_v6, %v95_v59  ;;  %v78_v17 = vadd.f32 %v77_v9, %v76_v1  ;;  %v1490_v19 = vmul.f32 0.25, %v50_v7  ;;  %vm166_vm7 = vcmask 1046534   ;;  %1191 = vmatpush3.bf16.msra.mxu1 %v1317_v60  ;;  %v1323_v59 = vld [vmem:[%s1757_s1 + $0x48] sm:$0xff]   ;;  %v1324_v60 = vld [vmem:[%s1757_s1 + $0x50] sm:$0xff]   ;;  %v970_v1 = vld [vmem:[%s1760_s2] ss:$0 sm:$0xff] }
  0x13   :  { %1173 = vmatpush3.bf16.msra.mxu0 %v1310_v25  ;;  %v85_v18 = vadd.f32 %v84_v10, %v83_v2  ;;  %v1492_v20 = vmul.f32 0.25, %v57_v8  ;;  %v91_v21 = vrot.slane %v90_v13, 1  ;;  %v1494_v23 = vmul.f32 0.25, %v64_v11  ;;  %1192 = vmatprep.subr.bf16.mxu1 %v1362_v0  ;;  %v1327_v63 = vld [vmem:[%s1757_s1 + $0x68] sm:$0xff]   ;;  %v1328_v9 = vld [vmem:[%s1757_s1 + $0x70] sm:$0xff]   ;;  %v1329_v10 = vld [vmem:[%s1757_s1 + $0x78] sm:$0xff]  }
  0x14   :  { %1174 = vmatprep.subr.bf16.mxu0 %v1362_v0  ;;  %v98_v22 = vrot.slane %v97_v14, 1  ;;  %v1496_v24 = vmul.f32 0.25, %v71_v12  ;;  %vm168_vm8 = vcmask 1047559   ;;  %v1498_v25 = vmul.f32 0.25, %v78_v17  ;;  %v1330_v11 = vld [vmem:[%s1759_s3 + $0x40] sm:$0xff]   ;;  %v1331_v12 = vld [vmem:[%s1759_s3 + $0x48] sm:$0xff]  }
  0x15   :  { %v1500_v26 = vmul.f32 0.25, %v85_v18  ;;  %v109_v27 = vpack.c.bf16 %v1490_v19, %v1490_v19  ;;  %v110_v28 = vpack.c.bf16 %v1492_v20, %v1492_v20  ;;  %v92_v29 = vadd.f32 %v91_v21, %v90_v13  ;;  %v1332_v13 = vld [vmem:[%s1759_s3 + $0x50] sm:$0xff]  }
  0x16   :  { %v99_v30 = vadd.f32 %v98_v22, %v97_v14  ;;  %v111_v31 = vpack.c.bf16 %v1494_v23, %v1494_v23  ;;  %v112_v32 = vpack.c.bf16 %v1496_v24, %v1496_v24  ;;  %v113_v34 = vpack.c.bf16 %v1498_v25, %v1498_v25  ;;  %1193 = vmatpush3.bf16.msra.mxu1 %v1318_v15  ;;  %v1333_v14 = vld [vmem:[%s1759_s3 + $0x58] sm:$0xff]   ;;  %v1334_v15 = vld [vmem:[%s1759_s3 + $0x60] sm:$0xff]  }
  0x17   :  { %1175 = vmatpush3.bf16.msra.mxu0 %v1311_v51  ;;  %v114_v35 = vpack.c.bf16 %v1500_v26, %v1500_v26  ;;  %v148_v36 = vunpack.c.l.b16 %v109_v27  ;;  %v149_v37 = vunpack.c.l.b16 %v110_v28  ;;  %v1519_v38 = vmul.f32 0.25, %v92_v29  ;;  %1194 = vmatprep.subr.bf16.mxu1 %v1362_v0  ;;  %v979_v28 = vld [vmem:[%s1761_s4] ss:$0 sm:$0xff] }
  0x18   :  { %1176 = vmatprep.subr.bf16.mxu0 %v1362_v0  ;;  %v1521_v39 = vmul.f32 0.25, %v99_v30  ;;  %v150_v40 = vunpack.c.l.b16 %v111_v31  ;;  %v151_v41 = vunpack.c.l.b16 %v112_v32  ;;  %v152_v42 = vunpack.c.l.b16 %v113_v34  ;;  %v1337_v34 = vld [vmem:[%s1759_s3 + $0x78] sm:$0xff]  }
  0x19   :  { %v153_v43 = vunpack.c.l.b16 %v114_v35  ;;  %v157_v44 = vsel %vm156_vm2, %v149_v37, %v148_v36  ;;  %v115_v45 = vpack.c.bf16 %v1519_v38, %v1519_v38  ;;  %v382_v17 = vsel %vm156_vm2, %v1492_v20, %v1490_v19  ;;  %v1338_v35 = vld [vmem:[%s1757_s1 + $0x80] sm:$0xff]   ;;  %v1339_v36 = vld [vmem:[%s1757_s1 + $0x88] sm:$0xff]   ;;  %v1340_v37 = vld [vmem:[%s1757_s1 + $0x90] sm:$0xff]  }
  0x1a   :  { %v116_v46 = vpack.c.bf16 %v1521_v39, %v1521_v39  ;;  %v159_v47 = vsel %vm158_vm3, %v150_v40, %v157_v44  ;;  %1195 = vmatpush3.bf16.msra.mxu1 %v1319_v33  ;;  %v383_v18 = vsel %vm158_vm3, %v1494_v23, %v382_v17  ;;  %v1336_v33 = vld [vmem:[%s1759_s3 + $0x70] sm:$0xff]   ;;  %v1343_v40 = vld [vmem:[%s1757_s1 + $0xa8] sm:$0xff]  }
  0x1b   :  { %1177 = vmatpush3.bf16.msra.mxu0 %v1312_v61  ;;  %v161_v48 = vsel %vm160_vm4, %v151_v41, %v159_v47  ;;  %v154_v49 = vunpack.c.l.b16 %v115_v45  ;;  %1196 = vmatprep.subr.bf16.mxu1 %v1362_v0  ;;  %v1325_v61 = vld [vmem:[%s1757_s1 + $0x58] sm:$0xff]   ;;  %v384_v21 = vsel %vm160_vm4, %v1496_v24, %v383_v18  ;;  %v1005_v41 = vld [vmem:[%s1760_s2 + $0x1] ss:$0 sm:$0xff] }
  0x1c   :  { %1178 = vmatprep.subr.bf16.mxu0 %v1362_v0  ;;  %v155_v50 = vunpack.c.l.b16 %v116_v46  ;;  %v163_v51 = vsel %vm162_vm5, %v152_v42, %v161_v48  ;;  %v385_v22 = vsel %vm162_vm5, %v1498_v25, %v384_v21  ;;  %v1360_v21 = vld [vmem:[%s1762_s5 + $0x30] sm:$0xff]  }
  0x1d   :  { %v165_v52 = vsel %vm164_vm6, %v153_v43, %v163_v51  ;;  %v386_v27 = vsel %vm164_vm6, %v1500_v26, %v385_v22  ;;  %v1346_v51 = vld [vmem:[%s1759_s3 + $0x80] sm:$0xff]   ;;  %v1361_v22 = vld [vmem:[%s1762_s5 + $0x38] sm:$0xff]  }
  0x1e   :  { %v167_v53 = vsel %vm166_vm7, %v154_v49, %v165_v52  ;;  %1197 = vmatpush3.bf16.msra.mxu1 %v1320_v56  ;;  %v387_v29 = vsel %vm166_vm7, %v1519_v38, %v386_v27  ;;  %v1341_v38 = vld [vmem:[%s1757_s1 + $0x98] sm:$0xff]   ;;  %v1344_v49 = vld [vmem:[%s1757_s1 + $0xb0] sm:$0xff]   ;;  %v1347_v52 = vld [vmem:[%s1759_s3 + $0x88] sm:$0xff]  }
  0x1f   :  { %1179 = vmatpush3.bf16.msra.mxu0 %v1313_v16  ;;  %v169_v54 = vsel %vm168_vm8, %v155_v50, %v167_v53  ;;  %1198 = vmatprep.subr.bf16.mxu1 %v1362_v0  ;;  %v1335_v16 = vld [vmem:[%s1759_s3 + $0x68] sm:$0xff]   ;;  %v388_v23 = vsel %vm168_vm8, %v1521_v39, %v387_v29  ;;  %v1342_v39 = vld [vmem:[%s1757_s1 + $0xa0] sm:$0xff]   ;;  %v1345_v50 = vld [vmem:[%s1757_s1 + $0xb8] sm:$0xff]  }
  0x20   :  { %1204 = vmatprep.subr.bf16.mxu0 %v1362_v0  ;;  %v170_v55 = vpack.c.b16 %v169_v54, %v169_v54  ;;  %v1348_v53 = vld [vmem:[%s1759_s3 + $0x90] sm:$0xff]   ;;  %v1349_v54 = vld [vmem:[%s1759_s3 + $0x98] sm:$0xff]   ;;  %v1351_v56 = vld [vmem:[%s1759_s3 + $0xa8] sm:$0xff]  }
  0x21   :  { %v1083_v27 = vld [vmem:[%s1761_s4 + $0x2] ss:$0 sm:$0xff] }
  0x22   :  { %1181 = vmatmul.mubr.bf16.vlgmr.msra.gmra.mrb[0].mxu0 %v170_v55  ;;  %1199 = vmatpush3.bf16.msra.mxu1 %v1321_v57  ;;  %v1350_v55 = vld [vmem:[%s1759_s3 + $0xa0] sm:$0xff]  }
  0x23   :  { %1220 = vmatprep.mubr.msk.bf16.mxu0 %vm1363_vm0, %v1362_v0  ;;  %1224 = vmatprep.subr.bf16.mxu1 %v1362_v0  ;;  %v1031_v57 = vld [vmem:[%s1761_s4 + $0x1] ss:$0 sm:$0xff] }
  0x24   :  { %1205 = vmatpush3.bf16.msra.mxu0 %v1322_v58 }
  0x25   :  { %1206 = vmatprep.subr.bf16.mxu0 %v1362_v0 }
  0x28   :  { %1207 = vmatpush3.bf16.msra.mxu0 %v1323_v59 }
  0x29   :  { %1208 = vmatprep.subr.bf16.mxu0 %v1362_v0 }
  0x2c   :  { %1209 = vmatpush3.bf16.msra.mxu0 %v1324_v60 }
  0x2d   :  { %1210 = vmatprep.subr.bf16.mxu0 %v1362_v0 }
  0x30   :  { %1211 = vmatpush3.bf16.msra.mxu0 %v1325_v61 }
  0x31   :  { %1212 = vmatprep.subr.bf16.mxu0 %v1362_v0 }
  0x34   :  { %1213 = vmatpush3.bf16.msra.mxu0 %v1326_v62 }
  0x35   :  { %1214 = vmatprep.subr.bf16.mxu0 %v1362_v0 }
  0x38   :  { %1215 = vmatpush3.bf16.msra.mxu0 %v1327_v63 }
  0x39   :  { %1216 = vmatprep.subr.bf16.mxu0 %v1362_v0 }
  0x3c   :  { %1217 = vmatpush3.bf16.msra.mxu0 %v1328_v9  ;;  %v1358_v9 = vld [vmem:[%s1762_s5 + $0x20] sm:$0xff]  }
  0x3d   :  { %1218 = vmatprep.subr.bf16.mxu0 %v1362_v0 }
  0x40   :  { %1219 = vmatpush3.bf16.msra.mxu0 %v1329_v10  ;;  %v1359_v10 = vld [vmem:[%s1762_s5 + $0x28] sm:$0xff]  }
  0x41   :  { %1244 = vmatprep.subr.bf16.mxu0 %v1362_v0 }
  0xf5   :  { %v254_v2 = vpop.f32.mrb[0].mxu0 }
  0xf6   :  { %v255_v3 = vadd.f32 %v970_v1, %v254_v2  ;;  %v1182_v4 = vpop.f32.mrb[1].mxu0 }
  0xf7   :  { %v257_v5 = vpop.f32.mrb[2].mxu0  ;;  %v1353_v4 = vld [vmem:[%s1759_s3 + $0xb8] sm:$0xff]  }
  0xf8   :  { %v260_v6 = vmax.f32 %v255_v3, 0.0  ;;  %v1183_v7 = vpop.f32.mrb[3].mxu0  ;;  %v1352_v3 = vld [vmem:[%s1759_s3 + $0xb0] sm:$0xff]   ;;  %v1354_v5 = vld [vmem:[%s1762_s5] sm:$0xff]  }
  0xf9   :  { %v1356_v7 = vld [vmem:[%s1762_s5 + $0x10] sm:$0xff]  }
  0xfa   :  { %v261_v8 = vpack.c.bf16 %v260_v6, %v260_v6  ;;  %v1355_v6 = vld [vmem:[%s1762_s5 + $0x8] sm:$0xff]  }
  0xfc   :  { %1201 = vmatmul.mubr.bf16.vlgmr.msra.gmra.mrb[0].mxu1 %v261_v8  ;;  %v1357_v8 = vld [vmem:[%s1762_s5 + $0x18] sm:$0xff]  }
  0xfd   :  { %1240 = vmatprep.mubr.msk.bf16.mxu1 %vm1363_vm0, %v1362_v0  ;;  %1225 = vmatpush3.bf16.msra.mxu1 %v1330_v11  ;;  %v1057_v11 = vld [vmem:[%s1760_s2 + $0x2] ss:$0 sm:$0xff] }
  0xfe   :  { %1226 = vmatprep.subr.bf16.mxu1 %v1362_v0 }
 0x101   :  { %1227 = vmatpush3.bf16.msra.mxu1 %v1331_v12 }
 0x102   :  { %1228 = vmatprep.subr.bf16.mxu1 %v1362_v0 }
 0x105   :  { %1229 = vmatpush3.bf16.msra.mxu1 %v1332_v13 }
 0x106   :  { %1230 = vmatprep.subr.bf16.mxu1 %v1362_v0 }
 0x109   :  { %1231 = vmatpush3.bf16.msra.mxu1 %v1333_v14 }
 0x10a   :  { %1232 = vmatprep.subr.bf16.mxu1 %v1362_v0 }
 0x10d   :  { %1233 = vmatpush3.bf16.msra.mxu1 %v1334_v15 }
 0x10e   :  { %1234 = vmatprep.subr.bf16.mxu1 %v1362_v0 }
 0x111   :  { %1235 = vmatpush3.bf16.msra.mxu1 %v1335_v16 }
 0x112   :  { %1236 = vmatprep.subr.bf16.mxu1 %v1362_v0 }
 0x115   :  { %1237 = vmatpush3.bf16.msra.mxu1 %v1336_v33 }
 0x116   :  { %1238 = vmatprep.subr.bf16.mxu1 %v1362_v0 }
 0x119   :  { %1239 = vmatpush3.bf16.msra.mxu1 %v1337_v34 }
 0x11a   :  { %1264 = vmatprep.subr.bf16.mxu1 %v1362_v0 }
 0x1cf   :  { %v367_v19 = vpop.f32.mrb[0].mxu1 }
 0x1d0   :  { %v368_v20 = vadd.f32 %v979_v28, %v367_v19  ;;  %v1202_v30 = vpop.f32.mrb[1].mxu1 }
 0x1d1   :  { %v370_v24 = vpop.f32.mrb[2].mxu1 }
 0x1d2   :  { %v373_v31 = vmax.f32 %v368_v20, 0.0  ;;  %v1203_v32 = vpop.f32.mrb[3].mxu1 }
 0x1d4   :  { %v1626_v25 = vadd.f32 %v388_v23, %v373_v31 }
 0x1d6   :  { %v391_v26 = vpack.c.bf16 %v1626_v25, %v1626_v25 }
 0x1d8   :  { %1221 = vmatmul.mubr.bf16.vlgmr.msra.gmra.mrb[4].mxu0 %v391_v26 }
 0x1d9   :  { %1260 = vmatprep.mubr.msk.bf16.mxu0 %vm1363_vm0, %v1362_v0  ;;  %1245 = vmatpush3.bf16.msra.mxu0 %v1338_v35 }
 0x1da   :  { %1246 = vmatprep.subr.bf16.mxu0 %v1362_v0 }
 0x1dd   :  { %1247 = vmatpush3.bf16.msra.mxu0 %v1339_v36 }
 0x1de   :  { %1248 = vmatprep.subr.bf16.mxu0 %v1362_v0 }
 0x1e1   :  { %1249 = vmatpush3.bf16.msra.mxu0 %v1340_v37 }
 0x1e2   :  { %1250 = vmatprep.subr.bf16.mxu0 %v1362_v0 }
 0x1e5   :  { %1251 = vmatpush3.bf16.msra.mxu0 %v1341_v38 }
 0x1e6   :  { %1252 = vmatprep.subr.bf16.mxu0 %v1362_v0 }
 0x1e9   :  { %1253 = vmatpush3.bf16.msra.mxu0 %v1342_v39 }
 0x1ea   :  { %1254 = vmatprep.subr.bf16.mxu0 %v1362_v0 }
 0x1ed   :  { %1255 = vmatpush3.bf16.msra.mxu0 %v1343_v40 }
 0x1ee   :  { %1256 = vmatprep.subr.bf16.mxu0 %v1362_v0 }
 0x1f1   :  { %1257 = vmatpush3.bf16.msra.mxu0 %v1344_v49 }
 0x1f2   :  { %1258 = vmatprep.subr.bf16.mxu0 %v1362_v0 }
 0x1f5   :  { %1259 = vmatpush3.bf16.msra.mxu0 %v1345_v50 }
 0x1f6   :  { %1284 = vmatprep.subr.bf16.mxu0 %v1362_v0 }
 0x2ab   :  { %v499_v42 = vpop.f32.mrb[4].mxu0 }
 0x2ac   :  { %v500_v43 = vadd.f32 %v1005_v41, %v499_v42  ;;  %v1222_v44 = vpop.f32.mrb[5].mxu0 }
 0x2ad   :  { %v502_v45 = vpop.f32.mrb[6].mxu0 }
 0x2ae   :  { %v505_v46 = vmax.f32 %v500_v43, 0.0  ;;  %v1223_v47 = vpop.f32.mrb[7].mxu0 }
 0x2b0   :  { %v506_v48 = vpack.c.bf16 %v505_v46, %v505_v46 }
 0x2b2   :  { %1241 = vmatmul.mubr.bf16.vlgmr.msra.gmra.mrb[4].mxu1 %v506_v48 }
 0x2b3   :  { %1280 = vmatprep.mubr.msk.bf16.mxu1 %vm1363_vm0, %v1362_v0  ;;  %1265 = vmatpush3.bf16.msra.mxu1 %v1346_v51 }
 0x2b4   :  { %1266 = vmatprep.subr.bf16.mxu1 %v1362_v0 }
 0x2b7   :  { %1267 = vmatpush3.bf16.msra.mxu1 %v1347_v52 }
 0x2b8   :  { %1268 = vmatprep.subr.bf16.mxu1 %v1362_v0 }
 0x2bb   :  { %1269 = vmatpush3.bf16.msra.mxu1 %v1348_v53 }
 0x2bc   :  { %1270 = vmatprep.subr.bf16.mxu1 %v1362_v0 }
 0x2bf   :  { %1271 = vmatpush3.bf16.msra.mxu1 %v1349_v54 }
 0x2c0   :  { %1272 = vmatprep.subr.bf16.mxu1 %v1362_v0 }
 0x2c3   :  { %1273 = vmatpush3.bf16.msra.mxu1 %v1350_v55 }
 0x2c4   :  { %1274 = vmatprep.subr.bf16.mxu1 %v1362_v0 }
 0x2c7   :  { %1275 = vmatpush3.bf16.msra.mxu1 %v1351_v56 }
 0x2c8   :  { %1276 = vmatprep.subr.bf16.mxu1 %v1362_v0 }
 0x2cb   :  { %1277 = vmatpush3.bf16.msra.mxu1 %v1352_v3 }
 0x2cc   :  { %1278 = vmatprep.subr.bf16.mxu1 %v1362_v0 }
 0x2cf   :  { %1279 = vmatpush3.bf16.msra.mxu1 %v1353_v4 }
 0x385   :  { %v614_v58 = vpop.f32.mrb[4].mxu1 }
 0x386   :  { %v615_v59 = vadd.f32 %v1031_v57, %v614_v58  ;;  %v1242_v60 = vpop.f32.mrb[5].mxu1 }
 0x387   :  { %v617_v61 = vpop.f32.mrb[6].mxu1 }
 0x388   :  { %v620_v62 = vmax.f32 %v615_v59, 0.0  ;;  %v1243_v63 = vpop.f32.mrb[7].mxu1 }
 0x38a   :  { %v621_v1 = vadd.f32 %v620_v62, %v1626_v25 }
 0x38c   :  { %v622_v2 = vpack.c.bf16 %v621_v1, %v621_v1 }
 0x38e   :  { %1261 = vmatmul.mubr.bf16.vlgmr.msra.gmra.mrb[8].mxu0 %v622_v2 }
 0x38f   :  { %1300 = vmatprep.mubr.msk.bf16.mxu0 %vm1363_vm0, %v1362_v0  ;;  %1285 = vmatpush3.bf16.msra.mxu0 %v1354_v5 }
 0x390   :  { %1286 = vmatprep.subr.bf16.mxu0 %v1362_v0 }
 0x393   :  { %1287 = vmatpush3.bf16.msra.mxu0 %v1355_v6 }
 0x394   :  { %1288 = vmatprep.subr.bf16.mxu0 %v1362_v0 }
 0x397   :  { %1289 = vmatpush3.bf16.msra.mxu0 %v1356_v7 }
 0x398   :  { %1290 = vmatprep.subr.bf16.mxu0 %v1362_v0 }
 0x39b   :  { %1291 = vmatpush3.bf16.msra.mxu0 %v1357_v8 }
 0x39c   :  { %1292 = vmatprep.subr.bf16.mxu0 %v1362_v0 }
 0x39f   :  { %1293 = vmatpush3.bf16.msra.mxu0 %v1358_v9 }
 0x3a0   :  { %1294 = vmatprep.subr.bf16.mxu0 %v1362_v0 }
 0x3a3   :  { %1295 = vmatpush3.bf16.msra.mxu0 %v1359_v10 }
 0x3a4   :  { %1296 = vmatprep.subr.bf16.mxu0 %v1362_v0 }
 0x3a7   :  { %1297 = vmatpush3.bf16.msra.mxu0 %v1360_v21 }
 0x3a8   :  { %1298 = vmatprep.subr.bf16.mxu0 %v1362_v0  ;;  %v1092_v0 = vld [vmem:[%s1763_s6] ss:$0 sm:$0xff] }
 0x3ab   :  { %1299 = vmatpush3.bf16.msra.mxu0 %v1361_v22 }
 0x461   :  { %v730_v12 = vpop.f32.mrb[8].mxu0 }
 0x462   :  { %v731_v13 = vadd.f32 %v1057_v11, %v730_v12  ;;  %v1262_v14 = vpop.f32.mrb[9].mxu0 }
 0x463   :  { %v733_v15 = vpop.f32.mrb[10].mxu0 }
 0x464   :  { %v736_v16 = vmax.f32 %v731_v13, 0.0  ;;  %v1263_v17 = vpop.f32.mrb[11].mxu0 }
 0x466   :  { %v737_v18 = vpack.c.bf16 %v736_v16, %v736_v16 }
 0x468   :  { %1281 = vmatmul.mubr.bf16.vlgmr.msra.gmra.mrb[8].mxu1 %v737_v18 }
 0x53b   :  { %v845_v28 = vpop.f32.mrb[8].mxu1 }
 0x53c   :  { %v846_v29 = vadd.f32 %v1083_v27, %v845_v28  ;;  %v1282_v19 = vpop.f32.mrb[9].mxu1 }
 0x53d   :  { %v848_v20 = vpop.f32.mrb[10].mxu1 }
 0x53e   :  { %v851_v30 = vmax.f32 %v846_v29, 0.0  ;;  %v1283_v23 = vpop.f32.mrb[11].mxu1 }
 0x540   :  { %v852_v24 = vadd.f32 %v851_v30, %v621_v1 }
 0x542   :  { %v853_v31 = vpack.c.bf16 %v852_v24, %v852_v24 }
 0x544   :  { %1301 = vmatmul.mubr.bf16.vlgmr.msra.gmra.mrb[12].mxu0 %v853_v31 }
 0x617   :  { %v959_v32 = vpop.f32.mrb[12].mxu0 }
 0x618   :  { %v960_v25 = vadd.f32 %v1092_v0, %v959_v32  ;;  %v1302_v26 = vpop.f32.mrb[13].mxu0 }
 0x619   :  { %v962_v33 = vpop.f32.mrb[14].mxu0 }
 0x61a   :  { %965 = vst [vmem:[%s1764_s7] sm:$0xff] %v960_v25  ;;  %v1303_v34 = vpop.f32.mrb[15].mxu0 }

</bundles_post_ra>
